<compile_context>
chip_gen: v5e
topology: v5e:2x2
jax: 0.10.0
libtpu: 0.0.40
codegen_flags: <defaults>
</compile_context>

<pallas_src>
import functools

import jax
import jax.numpy as jnp
from jax.experimental import pallas as pl
from jax.experimental.pallas import tpu as pltpu


# ----------------------------------------------------------------------------
# small helpers
# ----------------------------------------------------------------------------
def _round_up(x, m):
    return ((x + m - 1) // m) * m


def _tile_rows(m, max_tile=512):
    """16-aligned (bf16 packing) row tile, aiming for >= 2 grid steps so the
    v7x megacore has work for both TensorCores.  Returns (tm, grid, m_padded)."""
    m16 = _round_up(max(m, 1), 16)
    half = _round_up((m16 + 1) // 2, 16)
    tm = max(16, min(max_tile, half))
    grid = _round_up(m16, tm) // tm
    return tm, grid, grid * tm


# ----------------------------------------------------------------------------
# Pallas kernels
# ----------------------------------------------------------------------------
def _epilogue(y, epi_ref, act):
    """bias + activation; epi row 0 = bias, row 1 = mu-column mask (head only)."""
    y = y + epi_ref[0:1, :]
    if act == "relu":
        y = jnp.maximum(y, 0.0)
    elif act == "head":
        mu_mask = epi_ref[1:2, :]
        t = jnp.exp(-jnp.abs(y))                               # stable for all y
        sig = jnp.where(y >= 0.0, 1.0 / (1.0 + t), t / (1.0 + t))
        sp = jnp.maximum(y, 0.0) + jnp.log(1.0 + t)            # stable softplus
        y = mu_mask * sig + (1.0 - mu_mask) * sp
    return y


def _fused_matmul_kernel(p_ref, w_ref, epi_ref, y_ref, *, act):
    y = jnp.dot(p_ref[...], w_ref[...], preferred_element_type=jnp.float32)
    y = _epilogue(y, epi_ref, act)
    y_ref[...] = y.astype(y_ref.dtype)


def _fused_matmul_stats_kernel(p_ref, w_ref, epi_ref, y_ref, stats_ref, *,
                               act, m_valid, m_pad):
    """Matmul + per-tile BatchNorm partial statistics (sum / sumsq).  Each grid
    step writes its OWN stats block -> grid stays fully 'parallel' (v7x)."""
    y = jnp.dot(p_ref[...], w_ref[...], preferred_element_type=jnp.float32)
    y = _epilogue(y, epi_ref, act)
    y_ref[...] = y.astype(y_ref.dtype)

    if m_pad != m_valid:                                       # static: only when padded
        tm = y_ref.shape[0]
        row = jax.lax.broadcasted_iota(jnp.int32, (tm, 1), 0) + pl.program_id(0) * tm
        y = jnp.where(row < m_valid, y, 0.0)

    stats_ref[0, 0:1, :] = jnp.sum(y, axis=0, keepdims=True)
    stats_ref[0, 1:2, :] = jnp.sum(y * y, axis=0, keepdims=True)


# ----------------------------------------------------------------------------
# pallas_call wrapper
# ----------------------------------------------------------------------------
def fused_matmul(patches, weights, bias_row, *, act="none", head_mask=None,
                 with_stats=False, out_dtype=jnp.bfloat16, max_tile=512):
    """(M, K) x (K, N) -> (M, N) with bf16 MXU inputs / f32 accumulation, fused
    bias + activation and (optionally) fused per-tile BatchNorm statistics."""
    M, K = patches.shape
    K2, N = weights.shape
    assert K == K2 and bias_row.shape == (N,)

    tm, grid_m, m_pad = _tile_rows(M, max_tile)
    if m_pad != M:
        patches = jnp.pad(patches, ((0, m_pad - M), (0, 0)))
    patches = patches.astype(jnp.bfloat16)
    weights = weights.astype(jnp.bfloat16)
    mask_row = (jnp.zeros((N,), jnp.float32) if head_mask is None
                else head_mask.astype(jnp.float32))
    epi = jnp.stack([bias_row.astype(jnp.float32), mask_row], axis=0)   # (2, N)

    in_specs = [
        pl.BlockSpec((tm, K), lambda i: (i, 0)),
        pl.BlockSpec((K, N), lambda i: (0, 0)),        # weights stay resident
        pl.BlockSpec((2, N), lambda i: (0, 0)),
    ]
    y_shape = jax.ShapeDtypeStruct((m_pad, N), out_dtype)
    y_spec = pl.BlockSpec((tm, N), lambda i: (i, 0))

    out_itemsize = jnp.dtype(out_dtype).itemsize
    cost = pl.CostEstimate(
        flops=2 * m_pad * K * N,
        transcendentals=(m_pad * N if act == "head" else 0),
        bytes_accessed=(m_pad * K * 2 + K * N * 2 + 2 * N * 4
                        + m_pad * N * out_itemsize
                        + (grid_m * 2 * N * 4 if with_stats else 0)),
    )

    if with_stats:
        kernel = functools.partial(_fused_matmul_stats_kernel, act=act,
                                   m_valid=M, m_pad=m_pad)
        out_shape = (y_shape, jax.ShapeDtypeStruct((grid_m, 2, N), jnp.float32))
        out_specs = (y_spec, pl.BlockSpec((1, 2, N), lambda i: (i, 0, 0)))
    else:
        kernel = functools.partial(_fused_matmul_kernel, act=act)
        out_shape = y_shape
        out_specs = y_spec

    out = pl.pallas_call(
        kernel,
        out_shape=out_shape,
        grid=(grid_m,),
        in_specs=in_specs,
        out_specs=out_specs,
        compiler_params=pltpu.CompilerParams(
            dimension_semantics=("parallel",),
            # plenty for these tiles on every generation; scale together with
            # max_tile if batch / channel counts grow (v5e default is 16 MiB).
            vmem_limit_bytes=32 * 1024 * 1024),
        cost_estimate=cost,
    )(patches, weights, epi)

    if with_stats:
        y, stats = out
        return y[:M], stats
    return out[:M]


# ----------------------------------------------------------------------------
# 3x3 formulation of ConvTranspose2d(k=4, s=2, p=1) + layout glue (plain jnp,
# fused by XLA into a single pass between pallas_calls)
# ----------------------------------------------------------------------------
# output parity py uses kernel rows ky with window offset wy:
#   py=0: (ky=3 -> wy=0), (ky=1 -> wy=1);  py=1: (ky=2 -> wy=1), (ky=0 -> wy=2)
_TAPS = {0: ((3, 0), (1, 1)), 1: ((2, 1), (0, 2))}


def _scatter_weights_3x3(w_pt):
    """(C_in, C_out, 4, 4) ConvTranspose2d weight -> zero-scattered (9*C_in, 4*C_out).

    TODO(synk): in a real model precompute these scattered weights once per
    parameter update instead of per forward call.
    """
    c_in, c_out = w_pt.shape[0], w_pt.shape[1]
    w3 = jnp.zeros((3, 3, c_in, 4 * c_out), w_pt.dtype)
    for py in (0, 1):
        for px in (0, 1):
            p = py * 2 + px
            for ky, wy in _TAPS[py]:
                for kx, wx in _TAPS[px]:
                    w3 = w3.at[wy, wx, :, p * c_out:(p + 1) * c_out].set(
                        w_pt[:, :, ky, kx])
    return w3.reshape(9 * c_in, 4 * c_out)


def _im2col_3x3(x):
    """NHWC activation -> 3x3 im2col patches (B*H*W, 9*C) (zero border pad)."""
    B, H, W, C = x.shape
    xp = jnp.pad(x, ((0, 0), (1, 1), (1, 1), (0, 0)))
    taps = [xp[:, wy:wy + H, wx:wx + W, :] for wy in range(3) for wx in range(3)]
    return jnp.stack(taps, axis=3).reshape(B * H * W, 9 * C)


def _slab_to_patches(y_slab, B, Hp, Wp, C, scale, shift):
    """Raw conv slab (B*Hp*Wp, 4*C) -> BN scale/shift + ReLU -> slab->NHWC
    reindex -> zero pad -> 3x3 im2col patches (B*4*Hp*Wp, 9*C).
    Pure jnp: XLA fuses the whole chain into one slab-read -> patch-write pass
    (no separate BN pallas_call, no materialized depth_to_space activation)."""
    y = y_slab.astype(jnp.float32) * jnp.tile(scale, 4) + jnp.tile(shift, 4)
    y = jnp.maximum(y, 0.0).astype(jnp.bfloat16)
    x = y.reshape(B, Hp, Wp, 2, 2, C)
    x = jnp.transpose(x, (0, 1, 3, 2, 4, 5)).reshape(B, 2 * Hp, 2 * Wp, C)
    return _im2col_3x3(x)


def _bn_fold(stats, gamma, beta, n_count, eps=1e-5):
    """Reduce per-tile (grid_m, 2, 4*C) partials -> per-channel scale/shift."""
    C = gamma.shape[0]
    s = stats.sum(axis=0).reshape(2, 4, C).sum(axis=1)          # (2, C)
    mean = s[0] / n_count
    # TODO(synk): E[x^2]-E[x]^2 in f32 is fine at these scales; switch to a
    # mean-shifted accumulation if batch / resolution grows a lot.
    var = jnp.maximum(s[1] / n_count - mean * mean, 0.0)        # biased (training) var
    inv_std = jax.lax.rsqrt(var + eps)
    scale = gamma.astype(jnp.float32) * inv_std
    shift = beta.astype(jnp.float32) - mean * scale
    return scale, shift


# ----------------------------------------------------------------------------
# ConvGaussDecoder forward
# ----------------------------------------------------------------------------
def conv_gauss_decoder_forward(z, params, hidden_dims, out_channels=3):
    B = z.shape[0]
    c0 = hidden_dims[0]

    # linear projection + ReLU (single matmul, lane-dense N = c0*16 output)
    x = fused_matmul(z, params["lin_w"], params["lin_b"], act="relu",
                     out_dtype=jnp.bfloat16)                   # (B, c0*16)

    # x.view(-1, c0, 4, 4) (NCHW) -> NHWC -> first layer's 3x3 patches
    x = x.reshape(B, c0, 4, 4).transpose(0, 2, 3, 1)           # (B, 4, 4, c0)
    H = W = 4
    patches = _im2col_3x3(x)                                   # (B*16, 9*c0)

    for i in range(len(hidden_dims) - 1):
        c_out = hidden_dims[i + 1]
        w3 = _scatter_weights_3x3(params[f"dec{i}_w"])         # (9*Cin, 4*Cout)
        b_row = jnp.tile(params[f"dec{i}_b"].astype(jnp.float32), 4)
        y, stats = fused_matmul(patches, w3, b_row, act="none",
                                with_stats=True, out_dtype=jnp.bfloat16)
        scale, shift = _bn_fold(stats, params[f"bn{i}_g"], params[f"bn{i}_b"],
                                n_count=4 * B * H * W)
        patches = _slab_to_patches(y, B, H, W, c_out, scale, shift)
        H, W = 2 * H, 2 * W

    # fused mu/std head, zero-padded so 4*n_pp == 128 lanes (sliced afterwards)
    n_head = 2 * out_channels
    n_pp = _round_up(n_head, 32)
    w_head = jnp.concatenate([params["mu_w"], params["std_w"]], axis=1)
    b_head = jnp.concatenate([params["mu_b"], params["std_b"]], axis=0)
    if n_pp != n_head:
        w_head = jnp.pad(w_head, ((0, 0), (0, n_pp - n_head), (0, 0), (0, 0)))
        b_head = jnp.pad(b_head, ((0, n_pp - n_head),))
    w3 = _scatter_weights_3x3(w_head)                          # (9*Clast, 4*n_pp)
    mu_mask = jnp.tile((jnp.arange(n_pp) < out_channels).astype(jnp.float32), 4)
    y = fused_matmul(patches, w3, jnp.tile(b_head.astype(jnp.float32), 4),
                     act="head", head_mask=mu_mask,
                     out_dtype=jnp.float32)                    # (B*H*W, 4*n_pp)

    y = y.reshape(B, H, W, 2, 2, n_pp)[..., :n_head]
    y = jnp.transpose(y, (0, 1, 3, 2, 4, 5)).reshape(B, 2 * H, 2 * W, n_head)
    mu = y[..., :out_channels]
    std = y[..., out_channels:] + 1e-8
    return mu, std
    # TODO(synk): the ConvVAEncoder, reparameterized sampling, Normal/Bernoulli
    # log-probs and the BernoulliDecoderLinearMiss of ConvNotMIWAE are
    # probabilistic glue (plain JAX), not kernelized here; get_beta()/sample()
    # are not part of forward().


# ----------------------------------------------------------------------------
# deterministic synthetic parameters (shapes follow the module __init__)
# ----------------------------------------------------------------------------
def init_params(key, n_latent, hidden_dims, out_channels):
    keys = iter(jax.random.split(key, 32))
    p = {}
    c0 = hidden_dims[0]
    p["lin_w"] = 0.05 * jax.random.normal(next(keys), (n_latent, c0 * 16), jnp.float32)
    p["lin_b"] = 0.05 * jax.random.normal(next(keys), (c0 * 16,), jnp.float32)
    for i in range(len(hidden_dims) - 1):
        cin, cout = hidden_dims[i], hidden_dims[i + 1]
        p[f"dec{i}_w"] = 0.05 * jax.random.normal(next(keys), (cin, cout, 4, 4), jnp.float32)
        p[f"dec{i}_b"] = 0.05 * jax.random.normal(next(keys), (cout,), jnp.float32)
        p[f"bn{i}_g"] = 1.0 + 0.1 * jax.random.normal(next(keys), (cout,), jnp.float32)
        p[f"bn{i}_b"] = 0.1 * jax.random.normal(next(keys), (cout,), jnp.float32)
    clast = hidden_dims[-1]
    p["mu_w"] = 0.05 * jax.random.normal(next(keys), (clast, out_channels, 4, 4), jnp.float32)
    p["mu_b"] = 0.05 * jax.random.normal(next(keys), (out_channels,), jnp.float32)
    p["std_w"] = 0.05 * jax.random.normal(next(keys), (clast, out_channels, 4, 4), jnp.float32)
    p["std_b"] = 0.05 * jax.random.normal(next(keys), (out_channels,), jnp.float32)
    return p


# ----------------------------------------------------------------------------
# pure-JAX f32 reference (lax conv) for the correctness check
# ----------------------------------------------------------------------------
def reference_forward(z, params, hidden_dims):
    def deconv_ref(x, w_pt, b):
        w_hwio = jnp.transpose(w_pt[:, :, ::-1, ::-1], (2, 3, 0, 1))  # (kh,kw,ic,oc)
        y = jax.lax.conv_general_dilated(
            x, w_hwio, window_strides=(1, 1), padding=((2, 2), (2, 2)),
            lhs_dilation=(2, 2),
            dimension_numbers=("NHWC", "HWIO", "NHWC"),
            precision=jax.lax.Precision.HIGHEST,
        )
        return y + b

    B = z.shape[0]
    c0 = hidden_dims[0]
    x = jnp.maximum(
        jnp.dot(z, params["lin_w"], precision=jax.lax.Precision.HIGHEST) + params["lin_b"], 0.0)
    x = x.reshape(B, c0, 4, 4).transpose(0, 2, 3, 1)
    for i in range(len(hidden_dims) - 1):
        x = deconv_ref(x, params[f"dec{i}_w"], params[f"dec{i}_b"])
        mean = jnp.mean(x, axis=(0, 1, 2), keepdims=True)
        var = jnp.mean((x - mean) ** 2, axis=(0, 1, 2), keepdims=True)
        x = (x - mean) * jax.lax.rsqrt(var + 1e-5) * params[f"bn{i}_g"] + params[f"bn{i}_b"]
        x = jnp.maximum(x, 0.0)
    mu = jax.nn.sigmoid(deconv_ref(x, params["mu_w"], params["mu_b"]))
    std = jax.nn.softplus(deconv_ref(x, params["std_w"], params["std_b"]))
    return mu, std + 1e-8


# ----------------------------------------------------------------------------
if __name__ == "__main__":
    # small shapes consistent with the module structure (4x4 -> 8x8 -> 16x16 -> 32x32)
    batch = 2
    n_latent = 32
    hidden_dims = (64, 32, 16)
    out_channels = 3

    key = jax.random.PRNGKey(0)
    k_param, k_z = jax.random.split(key)
    params = init_params(k_param, n_latent, hidden_dims, out_channels)
    z = jax.random.normal(k_z, (batch, n_latent), jnp.float32)

    fwd = jax.jit(functools.partial(conv_gauss_decoder_forward,
                                    hidden_dims=hidden_dims, out_channels=out_channels))
    mu, std = fwd(z, params)
    mu = jax.block_until_ready(mu)
    std = jax.block_until_ready(std)

    assert mu.shape == (batch, 32, 32, out_channels)
    assert std.shape == (batch, 32, 32, out_channels)

    mu_ref, std_ref = reference_forward(z, params, hidden_dims)
    # bf16 MXU inputs / bf16 intermediate activations vs. an f32 HIGHEST reference
    assert jnp.allclose(mu.astype(jnp.float32), mu_ref, rtol=3e-2, atol=3e-2), "mu mismatch"
    assert jnp.allclose(std.astype(jnp.float32), std_ref, rtol=3e-2, atol=3e-2), "std mismatch"

    print("KERNEL_OK")
</pallas_src>

<mosaic_0001>
module attributes {stable_mosaic.version = 11 : i64} {
  func.func @_fused_matmul_kernel(%arg0: i32, %arg1: memref<16x32xbf16, #tpu.memory_space<vmem>>, %arg2: memref<32x1024xbf16, #tpu.memory_space<vmem>>, %arg3: memref<2x1024xf32, #tpu.memory_space<vmem>>, %arg4: memref<16x1024xbf16, #tpu.memory_space<vmem>>) attributes {dimension_semantics = [#tpu.dimension_semantics<parallel>], iteration_bounds = array<i64: 1>, scalar_prefetch = 0 : i64, scratch_operands = 0 : i64, tpu.core_type = #tpu.core_type<tc>, window_params = [{transform_indices = @transform_0, window_bounds = array<i64: 16, 32>}, {pipeline_mode = #tpu.pipeline_mode<synchronous>, transform_indices = @transform_1, window_bounds = array<i64: 32, 1024>}, {pipeline_mode = #tpu.pipeline_mode<synchronous>, transform_indices = @transform_2, window_bounds = array<i64: 2, 1024>}, {transform_indices = @transform_3, window_bounds = array<i64: 16, 1024>}]} {
    %c0 = arith.constant 0 : index
    %c0_0 = arith.constant 0 : index
    %0 = vector.load %arg1[%c0, %c0_0] : memref<16x32xbf16, #tpu.memory_space<vmem>>, vector<16x32xbf16>
    %c0_1 = arith.constant 0 : index
    %c0_2 = arith.constant 0 : index
    %1 = vector.load %arg2[%c0_1, %c0_2] : memref<32x1024xbf16, #tpu.memory_space<vmem>>, vector<32x1024xbf16>
    %cst = arith.constant dense<0.000000e+00> : vector<16x1024xf32>
    %2 = tpu.matmul %0, %1, %cst {dimension_numbers = #tpu.dot_dimension_numbers<[1], [0], [0], [1], [0, 0, 1, 1], [], []>} : vector<16x32xbf16>, vector<32x1024xbf16>, vector<16x1024xf32> -> vector<16x1024xf32>
    %c0_3 = arith.constant 0 : index
    %c0_4 = arith.constant 0 : index
    %3 = vector.load %arg3[%c0_3, %c0_4] : memref<2x1024xf32, #tpu.memory_space<vmem>>, vector<1x1024xf32>
    %4 = vector.broadcast %3 : vector<1x1024xf32> to vector<16x1024xf32>
    %5 = arith.addf %2, %4 : vector<16x1024xf32>
    %cst_5 = arith.constant 0.000000e+00 : f32
    %6 = vector.broadcast %cst_5 : f32 to vector<16x1024xf32>
    %7 = arith.maximumf %5, %6 : vector<16x1024xf32>
    %8 = arith.truncf %7 : vector<16x1024xf32> to vector<16x1024xbf16>
    %c0_6 = arith.constant 0 : index
    %c0_7 = arith.constant 0 : index
    %9 = vector.load %arg4[%c0_6, %c0_7] : memref<16x1024xbf16, #tpu.memory_space<vmem>>, vector<16x1024xbf16>
    tpu.vector_store %arg4[%c0_6, %c0_7], %8 {strides = array<i32>} : memref<16x1024xbf16, #tpu.memory_space<vmem>>, vector<16x1024xbf16>,
    return
  }
  func.func @transform_0(%arg0: i32) -> (i32, i32) {
    %c0_i32 = arith.constant 0 : i32
    %c0_i32_0 = arith.constant 0 : i32
    return %arg0, %c0_i32 : i32, i32
  }
  func.func @transform_1(%arg0: i32) -> (i32, i32) {
    %c0_i32 = arith.constant 0 : i32
    %c0_i32_0 = arith.constant 0 : i32
    %c0_i32_1 = arith.constant 0 : i32
    return %c0_i32, %c0_i32_0 : i32, i32
  }
  func.func @transform_2(%arg0: i32) -> (i32, i32) {
    %c0_i32 = arith.constant 0 : i32
    %c0_i32_0 = arith.constant 0 : i32
    %c0_i32_1 = arith.constant 0 : i32
    return %c0_i32, %c0_i32_0 : i32, i32
  }
  func.func @transform_3(%arg0: i32) -> (i32, i32) {
    %c0_i32 = arith.constant 0 : i32
    %c0_i32_0 = arith.constant 0 : i32
    return %arg0, %c0_i32 : i32, i32
  }
}

module attributes {stable_mosaic.version = 11 : i64} {
  func.func @_fused_matmul_stats_kernel(%arg0: i32, %arg1: memref<16x576xbf16, #tpu.memory_space<vmem>>, %arg2: memref<576x128xbf16, #tpu.memory_space<vmem>>, %arg3: memref<2x128xf32, #tpu.memory_space<vmem>>, %arg4: memref<16x128xbf16, #tpu.memory_space<vmem>>, %arg5: memref<1x2x128xf32, #tpu.memory_space<vmem>>) attributes {dimension_semantics = [#tpu.dimension_semantics<parallel>], iteration_bounds = array<i64: 2>, scalar_prefetch = 0 : i64, scratch_operands = 0 : i64, tpu.core_type = #tpu.core_type<tc>, window_params = [{transform_indices = @transform_0, window_bounds = array<i64: 16, 576>}, {pipeline_mode = #tpu.pipeline_mode<synchronous>, transform_indices = @transform_1, window_bounds = array<i64: 576, 128>}, {pipeline_mode = #tpu.pipeline_mode<synchronous>, transform_indices = @transform_2, window_bounds = array<i64: 2, 128>}, {transform_indices = @transform_3, window_bounds = array<i64: 16, 128>}, {transform_indices = @transform_4, window_bounds = array<i64: 1, 2, 128>}]} {
    %c0 = arith.constant 0 : index
    %c0_0 = arith.constant 0 : index
    %0 = vector.load %arg1[%c0, %c0_0] : memref<16x576xbf16, #tpu.memory_space<vmem>>, vector<16x576xbf16>
    %c0_1 = arith.constant 0 : index
    %c0_2 = arith.constant 0 : index
    %1 = vector.load %arg2[%c0_1, %c0_2] : memref<576x128xbf16, #tpu.memory_space<vmem>>, vector<576x128xbf16>
    %cst = arith.constant dense<0.000000e+00> : vector<16x128xf32>
    %2 = tpu.matmul %0, %1, %cst {dimension_numbers = #tpu.dot_dimension_numbers<[1], [0], [0], [1], [0, 0, 1, 1], [], []>} : vector<16x576xbf16>, vector<576x128xbf16>, vector<16x128xf32> -> vector<16x128xf32>
    %c0_3 = arith.constant 0 : index
    %c0_4 = arith.constant 0 : index
    %3 = vector.load %arg3[%c0_3, %c0_4] : memref<2x128xf32, #tpu.memory_space<vmem>>, vector<1x128xf32>
    %4 = vector.broadcast %3 : vector<1x128xf32> to vector<16x128xf32>
    %5 = arith.addf %2, %4 : vector<16x128xf32>
    %6 = arith.truncf %5 : vector<16x128xf32> to vector<16x128xbf16>
    %c0_5 = arith.constant 0 : index
    %c0_6 = arith.constant 0 : index
    %7 = vector.load %arg4[%c0_5, %c0_6] : memref<16x128xbf16, #tpu.memory_space<vmem>>, vector<16x128xbf16>
    tpu.vector_store %arg4[%c0_5, %c0_6], %6 {strides = array<i32>} : memref<16x128xbf16, #tpu.memory_space<vmem>>, vector<16x128xbf16>,
    %cst_7 = arith.constant dense<0.000000e+00> : vector<128xf32>
    %8 = vector.multi_reduction <add>, %5, %cst_7 [0] : vector<16x128xf32> to vector<128xf32>
    %9 = vector.shape_cast %8 : vector<128xf32> to vector<1x128xf32>
    %c0_8 = arith.constant 0 : index
    %c0_9 = arith.constant 0 : index
    %c0_10 = arith.constant 0 : index
    %10 = vector.load %arg5[%c0_8, %c0_9, %c0_10] : memref<1x2x128xf32, #tpu.memory_space<vmem>>, vector<1x1x128xf32>
    %11 = vector.shape_cast %10 : vector<1x1x128xf32> to vector<1x128xf32>
    %12 = vector.shape_cast %9 : vector<1x128xf32> to vector<1x1x128xf32>
    tpu.vector_store %arg5[%c0_8, %c0_9, %c0_10], %12 {strides = array<i32>} : memref<1x2x128xf32, #tpu.memory_space<vmem>>, vector<1x1x128xf32>,
    %13 = arith.mulf %5, %5 : vector<16x128xf32>
    %cst_11 = arith.constant dense<0.000000e+00> : vector<128xf32>
    %14 = vector.multi_reduction <add>, %13, %cst_11 [0] : vector<16x128xf32> to vector<128xf32>
    %15 = vector.shape_cast %14 : vector<128xf32> to vector<1x128xf32>
    %c0_12 = arith.constant 0 : index
    %c1 = arith.constant 1 : index
    %c0_13 = arith.constant 0 : index
    %16 = vector.load %arg5[%c0_12, %c1, %c0_13] : memref<1x2x128xf32, #tpu.memory_space<vmem>>, vector<1x1x128xf32>
    %17 = vector.shape_cast %16 : vector<1x1x128xf32> to vector<1x128xf32>
    %18 = vector.shape_cast %15 : vector<1x128xf32> to vector<1x1x128xf32>
    tpu.vector_store %arg5[%c0_12, %c1, %c0_13], %18 {strides = array<i32>} : memref<1x2x128xf32, #tpu.memory_space<vmem>>, vector<1x1x128xf32>,
    return
  }
  func.func @transform_0(%arg0: i32) -> (i32, i32) {
    %c0_i32 = arith.constant 0 : i32
    %c0_i32_0 = arith.constant 0 : i32
    return %arg0, %c0_i32 : i32, i32
  }
  func.func @transform_1(%arg0: i32) -> (i32, i32) {
    %c0_i32 = arith.constant 0 : i32
    %c0_i32_0 = arith.constant 0 : i32
    %c0_i32_1 = arith.constant 0 : i32
    return %c0_i32, %c0_i32_0 : i32, i32
  }
  func.func @transform_2(%arg0: i32) -> (i32, i32) {
    %c0_i32 = arith.constant 0 : i32
    %c0_i32_0 = arith.constant 0 : i32
    %c0_i32_1 = arith.constant 0 : i32
    return %c0_i32, %c0_i32_0 : i32, i32
  }
  func.func @transform_3(%arg0: i32) -> (i32, i32) {
    %c0_i32 = arith.constant 0 : i32
    %c0_i32_0 = arith.constant 0 : i32
    return %arg0, %c0_i32 : i32, i32
  }
  func.func @transform_4(%arg0: i32) -> (i32, i32, i32) {
    %c0_i32 = arith.constant 0 : i32
    %c0_i32_0 = arith.constant 0 : i32
    %c0_i32_1 = arith.constant 0 : i32
    return %arg0, %c0_i32, %c0_i32_0 : i32, i32, i32
  }
}

module attributes {stable_mosaic.version = 11 : i64} {
  func.func @_fused_matmul_stats_kernel(%arg0: i32, %arg1: memref<64x288xbf16, #tpu.memory_space<vmem>>, %arg2: memref<288x64xbf16, #tpu.memory_space<vmem>>, %arg3: memref<2x64xf32, #tpu.memory_space<vmem>>, %arg4: memref<64x64xbf16, #tpu.memory_space<vmem>>, %arg5: memref<1x2x64xf32, #tpu.memory_space<vmem>>) attributes {dimension_semantics = [#tpu.dimension_semantics<parallel>], iteration_bounds = array<i64: 2>, scalar_prefetch = 0 : i64, scratch_operands = 0 : i64, tpu.core_type = #tpu.core_type<tc>, window_params = [{transform_indices = @transform_0, window_bounds = array<i64: 64, 288>}, {pipeline_mode = #tpu.pipeline_mode<synchronous>, transform_indices = @transform_1, window_bounds = array<i64: 288, 64>}, {pipeline_mode = #tpu.pipeline_mode<synchronous>, transform_indices = @transform_2, window_bounds = array<i64: 2, 64>}, {transform_indices = @transform_3, window_bounds = array<i64: 64, 64>}, {transform_indices = @transform_4, window_bounds = array<i64: 1, 2, 64>}]} {
    %c0 = arith.constant 0 : index
    %c0_0 = arith.constant 0 : index
    %0 = vector.load %arg1[%c0, %c0_0] : memref<64x288xbf16, #tpu.memory_space<vmem>>, vector<64x288xbf16>
    %c0_1 = arith.constant 0 : index
    %c0_2 = arith.constant 0 : index
    %1 = vector.load %arg2[%c0_1, %c0_2] : memref<288x64xbf16, #tpu.memory_space<vmem>>, vector<288x64xbf16>
    %cst = arith.constant dense<0.000000e+00> : vector<64x64xf32>
    %2 = tpu.matmul %0, %1, %cst {dimension_numbers = #tpu.dot_dimension_numbers<[1], [0], [0], [1], [0, 0, 1, 1], [], []>} : vector<64x288xbf16>, vector<288x64xbf16>, vector<64x64xf32> -> vector<64x64xf32>
    %c0_3 = arith.constant 0 : index
    %c0_4 = arith.constant 0 : index
    %3 = vector.load %arg3[%c0_3, %c0_4] : memref<2x64xf32, #tpu.memory_space<vmem>>, vector<1x64xf32>
    %4 = vector.broadcast %3 : vector<1x64xf32> to vector<64x64xf32>
    %5 = arith.addf %2, %4 : vector<64x64xf32>
    %6 = arith.truncf %5 : vector<64x64xf32> to vector<64x64xbf16>
    %c0_5 = arith.constant 0 : index
    %c0_6 = arith.constant 0 : index
    %7 = vector.load %arg4[%c0_5, %c0_6] : memref<64x64xbf16, #tpu.memory_space<vmem>>, vector<64x64xbf16>
    tpu.vector_store %arg4[%c0_5, %c0_6], %6 {strides = array<i32>} : memref<64x64xbf16, #tpu.memory_space<vmem>>, vector<64x64xbf16>,
    %cst_7 = arith.constant dense<0.000000e+00> : vector<64xf32>
    %8 = vector.multi_reduction <add>, %5, %cst_7 [0] : vector<64x64xf32> to vector<64xf32>
    %9 = vector.shape_cast %8 : vector<64xf32> to vector<1x64xf32>
    %c0_8 = arith.constant 0 : index
    %c0_9 = arith.constant 0 : index
    %c0_10 = arith.constant 0 : index
    %10 = vector.load %arg5[%c0_8, %c0_9, %c0_10] : memref<1x2x64xf32, #tpu.memory_space<vmem>>, vector<1x1x64xf32>
    %11 = vector.shape_cast %10 : vector<1x1x64xf32> to vector<1x64xf32>
    %12 = vector.shape_cast %9 : vector<1x64xf32> to vector<1x1x64xf32>
    tpu.vector_store %arg5[%c0_8, %c0_9, %c0_10], %12 {strides = array<i32>} : memref<1x2x64xf32, #tpu.memory_space<vmem>>, vector<1x1x64xf32>,
    %13 = arith.mulf %5, %5 : vector<64x64xf32>
    %cst_11 = arith.constant dense<0.000000e+00> : vector<64xf32>
    %14 = vector.multi_reduction <add>, %13, %cst_11 [0] : vector<64x64xf32> to vector<64xf32>
    %15 = vector.shape_cast %14 : vector<64xf32> to vector<1x64xf32>
    %c0_12 = arith.constant 0 : index
    %c1 = arith.constant 1 : index
    %c0_13 = arith.constant 0 : index
    %16 = vector.load %arg5[%c0_12, %c1, %c0_13] : memref<1x2x64xf32, #tpu.memory_space<vmem>>, vector<1x1x64xf32>
    %17 = vector.shape_cast %16 : vector<1x1x64xf32> to vector<1x64xf32>
    %18 = vector.shape_cast %15 : vector<1x64xf32> to vector<1x1x64xf32>
    tpu.vector_store %arg5[%c0_12, %c1, %c0_13], %18 {strides = array<i32>} : memref<1x2x64xf32, #tpu.memory_space<vmem>>, vector<1x1x64xf32>,
    return
  }
  func.func @transform_0(%arg0: i32) -> (i32, i32) {
    %c0_i32 = arith.constant 0 : i32
    %c0_i32_0 = arith.constant 0 : i32
    return %arg0, %c0_i32 : i32, i32
  }
  func.func @transform_1(%arg0: i32) -> (i32, i32) {
    %c0_i32 = arith.constant 0 : i32
    %c0_i32_0 = arith.constant 0 : i32
    %c0_i32_1 = arith.constant 0 : i32
    return %c0_i32, %c0_i32_0 : i32, i32
  }
  func.func @transform_2(%arg0: i32) -> (i32, i32) {
    %c0_i32 = arith.constant 0 : i32
    %c0_i32_0 = arith.constant 0 : i32
    %c0_i32_1 = arith.constant 0 : i32
    return %c0_i32, %c0_i32_0 : i32, i32
  }
  func.func @transform_3(%arg0: i32) -> (i32, i32) {
    %c0_i32 = arith.constant 0 : i32
    %c0_i32_0 = arith.constant 0 : i32
    return %arg0, %c0_i32 : i32, i32
  }
  func.func @transform_4(%arg0: i32) -> (i32, i32, i32) {
    %c0_i32 = arith.constant 0 : i32
    %c0_i32_0 = arith.constant 0 : i32
    %c0_i32_1 = arith.constant 0 : i32
    return %arg0, %c0_i32, %c0_i32_0 : i32, i32, i32
  }
}

module attributes {stable_mosaic.version = 11 : i64} {
  func.func @_fused_matmul_kernel(%arg0: i32, %arg1: memref<256x144xbf16, #tpu.memory_space<vmem>>, %arg2: memref<144x128xbf16, #tpu.memory_space<vmem>>, %arg3: memref<2x128xf32, #tpu.memory_space<vmem>>, %arg4: memref<256x128xf32, #tpu.memory_space<vmem>>) attributes {dimension_semantics = [#tpu.dimension_semantics<parallel>], iteration_bounds = array<i64: 2>, scalar_prefetch = 0 : i64, scratch_operands = 0 : i64, tpu.core_type = #tpu.core_type<tc>, window_params = [{transform_indices = @transform_0, window_bounds = array<i64: 256, 144>}, {pipeline_mode = #tpu.pipeline_mode<synchronous>, transform_indices = @transform_1, window_bounds = array<i64: 144, 128>}, {pipeline_mode = #tpu.pipeline_mode<synchronous>, transform_indices = @transform_2, window_bounds = array<i64: 2, 128>}, {transform_indices = @transform_3, window_bounds = array<i64: 256, 128>}]} {
    %c0 = arith.constant 0 : index
    %c0_0 = arith.constant 0 : index
    %0 = vector.load %arg1[%c0, %c0_0] : memref<256x144xbf16, #tpu.memory_space<vmem>>, vector<256x144xbf16>
    %c0_1 = arith.constant 0 : index
    %c0_2 = arith.constant 0 : index
    %1 = vector.load %arg2[%c0_1, %c0_2] : memref<144x128xbf16, #tpu.memory_space<vmem>>, vector<144x128xbf16>
    %cst = arith.constant dense<0.000000e+00> : vector<256x128xf32>
    %2 = tpu.matmul %0, %1, %cst {dimension_numbers = #tpu.dot_dimension_numbers<[1], [0], [0], [1], [0, 0, 1, 1], [], []>} : vector<256x144xbf16>, vector<144x128xbf16>, vector<256x128xf32> -> vector<256x128xf32>
    %c0_3 = arith.constant 0 : index
    %c0_4 = arith.constant 0 : index
    %3 = vector.load %arg3[%c0_3, %c0_4] : memref<2x128xf32, #tpu.memory_space<vmem>>, vector<1x128xf32>
    %4 = vector.broadcast %3 : vector<1x128xf32> to vector<256x128xf32>
    %5 = arith.addf %2, %4 : vector<256x128xf32>
    %c1 = arith.constant 1 : index
    %c0_5 = arith.constant 0 : index
    %6 = vector.load %arg3[%c1, %c0_5] : memref<2x128xf32, #tpu.memory_space<vmem>>, vector<1x128xf32>
    %7 = math.absf %5 : vector<256x128xf32>
    %cst_6 = arith.constant 0.000000e+00 : f32
    %8 = vector.broadcast %cst_6 : f32 to vector<256x128xf32>
    %9 = arith.subf %8, %7 : vector<256x128xf32>
    %10 = math.exp %9 : vector<256x128xf32>
    %cst_7 = arith.constant 0.000000e+00 : f32
    %11 = vector.broadcast %cst_7 : f32 to vector<256x128xf32>
    %12 = arith.cmpf oge, %5, %11 : vector<256x128xf32>
    %cst_8 = arith.constant 1.000000e+00 : f32
    %13 = vector.broadcast %cst_8 : f32 to vector<256x128xf32>
    %14 = arith.addf %13, %10 : vector<256x128xf32>
    %cst_9 = arith.constant 1.000000e+00 : f32
    %15 = vector.broadcast %cst_9 : f32 to vector<256x128xf32>
    %16 = arith.divf %15, %14 : vector<256x128xf32>
    %cst_10 = arith.constant 1.000000e+00 : f32
    %17 = vector.broadcast %cst_10 : f32 to vector<256x128xf32>
    %18 = arith.addf %17, %10 : vector<256x128xf32>
    %19 = arith.divf %10, %18 : vector<256x128xf32>
    %20 = arith.select %12, %16, %19 : vector<256x128xi1>, vector<256x128xf32>
    %cst_11 = arith.constant 0.000000e+00 : f32
    %21 = vector.broadcast %cst_11 : f32 to vector<256x128xf32>
    %22 = arith.maximumf %5, %21 : vector<256x128xf32>
    %cst_12 = arith.constant 1.000000e+00 : f32
    %23 = vector.broadcast %cst_12 : f32 to vector<256x128xf32>
    %24 = arith.addf %23, %10 : vector<256x128xf32>
    %25 = math.log %24 : vector<256x128xf32>
    %26 = arith.addf %22, %25 : vector<256x128xf32>
    %27 = vector.broadcast %6 : vector<1x128xf32> to vector<256x128xf32>
    %28 = arith.mulf %27, %20 : vector<256x128xf32>
    %cst_13 = arith.constant 1.000000e+00 : f32
    %29 = vector.broadcast %cst_13 : f32 to vector<1x128xf32>
    %30 = arith.subf %29, %6 : vector<1x128xf32>
    %31 = vector.broadcast %30 : vector<1x128xf32> to vector<256x128xf32>
    %32 = arith.mulf %31, %26 : vector<256x128xf32>
    %33 = arith.addf %28, %32 : vector<256x128xf32>
    %c0_14 = arith.constant 0 : index
    %c0_15 = arith.constant 0 : index
    %34 = vector.load %arg4[%c0_14, %c0_15] : memref<256x128xf32, #tpu.memory_space<vmem>>, vector<256x128xf32>
    tpu.vector_store %arg4[%c0_14, %c0_15], %33 {strides = array<i32>} : memref<256x128xf32, #tpu.memory_space<vmem>>, vector<256x128xf32>,
    return
  }
  func.func @transform_0(%arg0: i32) -> (i32, i32) {
    %c0_i32 = arith.constant 0 : i32
    %c0_i32_0 = arith.constant 0 : i32
    return %arg0, %c0_i32 : i32, i32
  }
  func.func @transform_1(%arg0: i32) -> (i32, i32) {
    %c0_i32 = arith.constant 0 : i32
    %c0_i32_0 = arith.constant 0 : i32
    %c0_i32_1 = arith.constant 0 : i32
    return %c0_i32, %c0_i32_0 : i32, i32
  }
  func.func @transform_2(%arg0: i32) -> (i32, i32) {
    %c0_i32 = arith.constant 0 : i32
    %c0_i32_0 = arith.constant 0 : i32
    %c0_i32_1 = arith.constant 0 : i32
    return %c0_i32, %c0_i32_0 : i32, i32
  }
  func.func @transform_3(%arg0: i32) -> (i32, i32) {
    %c0_i32 = arith.constant 0 : i32
    %c0_i32_0 = arith.constant 0 : i32
    return %arg0, %c0_i32 : i32, i32
  }
}

</mosaic_0001>

<bundles_post_ra>
// kernel: tile.73
= control target key start
LH: loop header
LB: loop body
LE: loop exit
PB: predicated region body
PF: predicated region fallthrough
CT: control target
= control target key end

     0   :  { %s22_s0 = inlined_call_operand.vmem [shape: f32[32], index: 0, kind: input, shape index: {}]   ;;  %s23_s1 = inlined_call_operand.vmem [shape: f32[4,32], index: 1, kind: output, shape index: {}]  }
   0x1   :  { %v4_v0 = vld [vmem:[%s22_s0] ss:$0 sm:$0xff] }
   0x2   :  { %5 = vst [vmem:[%s23_s1] sm:$0xf] %v4_v0 }

// kernel: tile.43
= control target key start
LH: loop header
LB: loop body
LE: loop exit
PB: predicated region body
PF: predicated region fallthrough
CT: control target
= control target key end

     0   :  { %2 = vsyncpa [#allocation1], 0  ;;  %s48_s8 = smov [#allocation0]   ;;  %s65_s0 = inlined_call_operand.hbm [shape: f32[32], index: 0, kind: input, shape index: {}]   ;;  %s66_s1 = inlined_call_operand.vmem [shape: f32[4,32], index: 1, kind: output, shape index: {}]  }
   0x1   :  { %s8_s0 = sshll.u32 %s65_s0, 4  ;;  %s10_s9 = sshll.u32 %s48_s8, 4  ;;  %s9_s0 = int_to_ptr.hbm [resolvable:$true] %s8_s0  ;;  %s11_s9 = int_to_ptr.vmem [resolvable:$true] %s10_s9 }
   0x2   :  { %13 = dma.hbm_to_vmem [thread:$0]  %s9_s0, 16, %s11_s9, [#allocation1]  }
   0x3   :  { %46 = dma.done.wait [#allocation1], 16  }
   0x4   :  { %47 = vsyncadd [#allocation1], 4294967280  ;;  %v18_v0 = vld [vmem:[#allocation0] ss:$0 sm:$0xff] }
   0x5   :  { %19 = vst [vmem:[%s66_s1] sm:$0xf] %v18_v0 }
   0x6   :  { %20 = vsyncpa [#allocation1], 1 }

// kernel: tile.79
= control target key start
LH: loop header
LB: loop body
LE: loop exit
PB: predicated region body
PF: predicated region fallthrough
CT: control target
= control target key end

     0   :  { %s37_s8 = smov 32   ;;  %s38_s9 = smov 64   ;;  %vm7_vm0 = vcmask 261120   ;;  %vm13_vm1 = vcmask 1048320   ;;  %vm19_vm2 = vcmask 785920   ;;  %vm25_vm3 = vcmask 523520   ;;  %s55_s0 = inlined_call_operand.vmem [shape: f32[4,32], index: 0, kind: input, shape index: {}]   ;;  %s56_s1 = inlined_call_operand.vmem [shape: f32[1,128], index: 1, kind: output, shape index: {}]  }
   0x1   :  { %v4_v0 = vld [vmem:[%s55_s0] sm:$0xf]  ;;  %s36_s0 = smov 96  }
   0x2   :  { %5 = vst [vmem:[#allocation1] sm:$0xf] %v4_v0 }
   0x9   :  { %v10_v1 = vld [vmem:[#allocation1 + $0x3] sm:$0x1]   ;;  %v22_v2 = vld [vmem:[#allocation1 + $0x1] sm:$0x1]   ;;  %v16_v3 = vld [vmem:[#allocation1 + $0x2] sm:$0x1]  }
   0xa   :  { %11 = vrot.lane.b32.xlu0 %v10_v1, %s36_s0  ;;  %23 = vrot.lane.b32.xlu1 %v22_v2, %s37_s8  ;;  %v6_v4 = vld [vmem:[#allocation1] sm:$0x1]  }
   0xb   :  { %8 = vst.msk [vmem:[#allocation0] sm:$0x1] %vm7_vm0, %v6_v4  }
  0x12   :  { %17 = vrot.lane.b32.xlu0 %v16_v3, %s38_s9 }
  0x7c   :  { %v12_v5 = vpop.permute.xlu0 %11   ;;  %v24_v6 = vpop.permute.xlu1 %23  }
  0x7d   :  { %14 = vst.msk [vmem:[#allocation0] sm:$0x1] %vm13_vm1, %v12_v5  }
  0x84   :  { %v18_v7 = vpop.permute.xlu0 %17  }
  0x85   :  { %20 = vst.msk [vmem:[#allocation0] sm:$0x1] %vm19_vm2, %v18_v7  }
  0x86   :  { %26 = vst.msk [vmem:[#allocation0] sm:$0x1] %vm25_vm3, %v24_v6  }
  0x8d   :  { %v29_v8 = vld [vmem:[#allocation0] sm:$0x1] }
  0x8e   :  { %32 = vst [vmem:[%s56_s1] sm:$0x1] %v29_v8 }

// kernel: tile.58
= control target key start
LH: loop header
LB: loop body
LE: loop exit
PB: predicated region body
PF: predicated region fallthrough
CT: control target
= control target key end

     0   :  { %2 = vsyncpa [#allocation1], 0  ;;  %s48_s8 = smov [#allocation0]   ;;  %s65_s0 = inlined_call_operand.hbm [shape: f32[16], index: 0, kind: input, shape index: {}]   ;;  %s66_s1 = inlined_call_operand.vmem [shape: f32[4,16], index: 1, kind: output, shape index: {}]  }
   0x1   :  { %s8_s0 = sshll.u32 %s65_s0, 4  ;;  %s10_s9 = sshll.u32 %s48_s8, 4  ;;  %s9_s0 = int_to_ptr.hbm [resolvable:$true] %s8_s0  ;;  %s11_s9 = int_to_ptr.vmem [resolvable:$true] %s10_s9 }
   0x2   :  { %13 = dma.hbm_to_vmem [thread:$0]  %s9_s0, 16, %s11_s9, [#allocation1]  }
   0x3   :  { %46 = dma.done.wait [#allocation1], 16  }
   0x4   :  { %47 = vsyncadd [#allocation1], 4294967280  ;;  %v18_v0 = vld [vmem:[#allocation0] ss:$0 sm:$0xff] }
   0x5   :  { %19 = vst [vmem:[%s66_s1] sm:$0xf] %v18_v0 }
   0x6   :  { %20 = vsyncpa [#allocation1], 1 }

// kernel: tile.59
= control target key start
LH: loop header
LB: loop body
LE: loop exit
PB: predicated region body
PF: predicated region fallthrough
CT: control target
= control target key end

     0   :  { %s37_s8 = smov 16   ;;  %s38_s9 = smov 32   ;;  %vm7_vm0 = vcmask 130048   ;;  %vm13_vm1 = vcmask 523648   ;;  %vm19_vm2 = vcmask 392448   ;;  %vm25_vm3 = vcmask 261248   ;;  %s55_s0 = inlined_call_operand.vmem [shape: f32[4,16], index: 0, kind: input, shape index: {}]   ;;  %s56_s1 = inlined_call_operand.vmem [shape: f32[1,64], index: 1, kind: output, shape index: {}]  }
   0x1   :  { %v4_v0 = vld [vmem:[%s55_s0] sm:$0xf]  ;;  %s36_s0 = smov 48  }
   0x2   :  { %5 = vst [vmem:[#allocation1] sm:$0xf] %v4_v0 }
   0x9   :  { %v10_v1 = vld [vmem:[#allocation1 + $0x3] sm:$0x1]   ;;  %v22_v2 = vld [vmem:[#allocation1 + $0x1] sm:$0x1]   ;;  %v16_v3 = vld [vmem:[#allocation1 + $0x2] sm:$0x1]  }
   0xa   :  { %11 = vrot.lane.b32.xlu0 %v10_v1, %s36_s0  ;;  %23 = vrot.lane.b32.xlu1 %v22_v2, %s37_s8  ;;  %v6_v4 = vld [vmem:[#allocation1] sm:$0x1]  }
   0xb   :  { %8 = vst.msk [vmem:[#allocation0] sm:$0x1] %vm7_vm0, %v6_v4  }
  0x12   :  { %17 = vrot.lane.b32.xlu0 %v16_v3, %s38_s9 }
  0x7c   :  { %v12_v5 = vpop.permute.xlu0 %11   ;;  %v24_v6 = vpop.permute.xlu1 %23  }
  0x7d   :  { %14 = vst.msk [vmem:[#allocation0] sm:$0x1] %vm13_vm1, %v12_v5  }
  0x84   :  { %v18_v7 = vpop.permute.xlu0 %17  }
  0x85   :  { %20 = vst.msk [vmem:[#allocation0] sm:$0x1] %vm19_vm2, %v18_v7  }
  0x86   :  { %26 = vst.msk [vmem:[#allocation0] sm:$0x1] %vm25_vm3, %v24_v6  }
  0x8d   :  { %v29_v8 = vld [vmem:[#allocation0] sm:$0x1] }
  0x8e   :  { %32 = vst [vmem:[%s56_s1] sm:$0x1] %v29_v8 }

// kernel: conv_gauss_decoder_forward.4
= control target key start
LH: loop header
LB: loop body
LE: loop exit
PB: predicated region body
PF: predicated region fallthrough
CT: control target
= control target key end

     0   :  { %vm136_vm0 = vcmask 261120   ;;  %s545_s1 = inlined_call_operand.vmem [shape: bf16[32,1024], index: 1, kind: input, shape index: {}]   ;;  %s546_s0 = inlined_call_operand.vmem [shape: bf16[16,32], index: 0, kind: input, shape index: {}]   ;;  %s547_s2 = inlined_call_operand.vmem [shape: f32[2,1024], index: 2, kind: input, shape index: {}]   ;;  %s548_s3 = inlined_call_operand.vmem [shape: bf16[16,1024], index: 3, kind: output, shape index: {}]  }
   0x1   :  { %v326_v0 = vld [vmem:[%s545_s1 + $0x40] sm:$0xf]  ;;  %v373_v2 = vld [vmem:[%s545_s1 + $0x44] sm:$0xf]  ;;  %v334_v5 = vld [vmem:[%s545_s1 + $0x48] sm:$0xf] }
   0x2   :  { %v377_v1 = vld [vmem:[%s545_s1 + $0x5c] sm:$0xf0]  ;;  %v328_v4 = vld [vmem:[%s545_s1 + $0x60] sm:$0xf0]  ;;  %v378_v6 = vld [vmem:[%s545_s1 + $0x64] sm:$0xf0] }
   0x3   :  { %v327_v3 = vor.u32 %v377_v1, %v326_v0  ;;  %v331_v7 = vor.u32 %v373_v2, %v328_v4  ;;  %v335_v8 = vor.u32 %v378_v6, %v334_v5  ;;  %v374_v9 = vld [vmem:[%s545_s1 + $0x4c] sm:$0xf]  ;;  %v294_v11 = vld [vmem:[%s545_s1] sm:$0xf]  ;;  %v365_v14 = vld [vmem:[%s545_s1 + $0x4] sm:$0xf] }
   0x4   :  { %v336_v10 = vld [vmem:[%s545_s1 + $0x68] sm:$0xf0]  ;;  %v369_v13 = vld [vmem:[%s545_s1 + $0x1c] sm:$0xf0]  ;;  %v296_v15 = vld [vmem:[%s545_s1 + $0x20] sm:$0xf0] }
   0x5   :  { %146 = vmatpush.bf16.msra.mxu0 %v327_v3  ;;  %v339_v12 = vor.u32 %v374_v9, %v336_v10  ;;  %160 = vmatpush.bf16.msra.mxu1 %v331_v7  ;;  %v295_v16 = vor.u32 %v369_v13, %v294_v11  ;;  %v299_v17 = vor.u32 %v365_v14, %v296_v15  ;;  %v302_v18 = vld [vmem:[%s545_s1 + $0x8] sm:$0xf]  ;;  %v366_v20 = vld [vmem:[%s545_s1 + $0xc] sm:$0xf]  ;;  %v364_v23 = vld [vmem:[%s546_s0] sm:$0xff] }
   0x6   :  { %174 = vmatpush.bf16.msra.mxu2 %v335_v8  ;;  %v370_v19 = vld [vmem:[%s545_s1 + $0x24] sm:$0xf0]  ;;  %v304_v22 = vld [vmem:[%s545_s1 + $0x28] sm:$0xf0]  ;;  %v350_v24 = vld [vmem:[%s545_s1 + $0x58] sm:$0xf] }
   0x7   :  { %188 = vmatpush.bf16.msra.mxu3 %v339_v12  ;;  %v303_v21 = vor.u32 %v370_v19, %v302_v18  ;;  %v307_v25 = vor.u32 %v366_v20, %v304_v22  ;;  %v380_v26 = vld [vmem:[%s545_s1 + $0x74] sm:$0xf0]  ;;  %v376_v27 = vld [vmem:[%s545_s1 + $0x5c] sm:$0xf]  ;;  %v342_v31 = vld [vmem:[%s545_s1 + $0x50] sm:$0xf] }
   0x8   :  { %v352_v28 = vld [vmem:[%s545_s1 + $0x78] sm:$0xf0]  ;;  %v351_v29 = vor.u32 %v380_v26, %v350_v24  ;;  %v379_v32 = vld [vmem:[%s545_s1 + $0x6c] sm:$0xf0]  ;;  %v375_v33 = vld [vmem:[%s545_s1 + $0x54] sm:$0xf] }
   0x9   :  { %147 = vmatpush.bf16.msra.mxu0 %v295_v16  ;;  %v355_v30 = vor.u32 %v376_v27, %v352_v28  ;;  %161 = vmatpush.bf16.msra.mxu1 %v299_v17  ;;  %v343_v34 = vor.u32 %v379_v32, %v342_v31  ;;  %v344_v35 = vld [vmem:[%s545_s1 + $0x70] sm:$0xf0]  ;;  %v318_v36 = vld [vmem:[%s545_s1 + $0x18] sm:$0xf]  ;;  %v368_v40 = vld [vmem:[%s545_s1 + $0x1c] sm:$0xf] }
   0xa   :  { %175 = vmatpush.bf16.msra.mxu2 %v303_v21  ;;  %v372_v37 = vld [vmem:[%s545_s1 + $0x34] sm:$0xf0]  ;;  %v347_v38 = vor.u32 %v375_v33, %v344_v35  ;;  %v320_v41 = vld [vmem:[%s545_s1 + $0x38] sm:$0xf0]  ;;  %v310_v42 = vld [vmem:[%s545_s1 + $0x10] sm:$0xf] }
   0xb   :  { %189 = vmatpush.bf16.msra.mxu3 %v307_v25  ;;  %v319_v39 = vor.u32 %v372_v37, %v318_v36  ;;  %v323_v43 = vor.u32 %v368_v40, %v320_v41  ;;  %v371_v44 = vld [vmem:[%s545_s1 + $0x2c] sm:$0xf0]  ;;  %v367_v45 = vld [vmem:[%s545_s1 + $0x14] sm:$0xf]  ;;  %v511_v49 = vld [vmem:[%s547_s2] ss:$2 sm:$0xff] }
   0xc   :  { %356 = vmatmul.msk.bf16.vlgmr.msra.gmra.mxu0 %vm136_vm0, %v364_v23  ;;  %v312_v46 = vld [vmem:[%s545_s1 + $0x30] sm:$0xf0]  ;;  %357 = vmatmul.msk.bf16.vlgmr.msra.gmra.mxu1 %vm136_vm0, %v364_v23  ;;  %v311_v47 = vor.u32 %v371_v44, %v310_v42  ;;  %v35_v50 = vperm.slane %v511_v49, 0  ;;  %v36_v51 = vperm.slane %v511_v49, 1  ;;  %v37_v58 = vperm.slane %v511_v49, 2 }
   0xd   :  { %358 = vmatmul.msk.bf16.vlgmr.msra.gmra.mxu2 %vm136_vm0, %v364_v23  ;;  %202 = vmatpush.bf16.msrb.mxu0 %v343_v34  ;;  %v315_v48 = vor.u32 %v367_v45, %v312_v46  ;;  %v38_v59 = vperm.slane %v511_v49, 3  ;;  %v39_v10 = vperm.slane %v511_v49, 4  ;;  %v40_v12 = vperm.slane %v511_v49, 5 }
   0xe   :  { %230 = vmatpush.bf16.msrb.mxu2 %v351_v29  ;;  %359 = vmatmul.msk.bf16.vlgmr.msra.gmra.mxu3 %vm136_vm0, %v364_v23  ;;  %v41_v25 = vperm.slane %v511_v49, 6  ;;  %v42_v27 = vperm.slane %v511_v49, 7 }
   0xf   :  { %244 = vmatpush.bf16.msrb.mxu3 %v355_v30  ;;  %216 = vmatpush.bf16.msrb.mxu1 %v347_v38 }
  0x11   :  { %203 = vmatpush.bf16.msrb.mxu0 %v311_v47 }
  0x12   :  { %231 = vmatpush.bf16.msrb.mxu2 %v319_v39 }
  0x13   :  { %245 = vmatpush.bf16.msrb.mxu3 %v323_v43  ;;  %217 = vmatpush.bf16.msrb.mxu1 %v315_v48 }
  0x1c   :  { %360 = vmatmul.msk.bf16.vlgmr.msrb.gmra.mxu0 %vm136_vm0, %v364_v23  ;;  %361 = vmatmul.msk.bf16.vlgmr.msrb.gmra.mxu1 %vm136_vm0, %v364_v23 }
  0x1d   :  { %362 = vmatmul.msk.bf16.vlgmr.msrb.gmra.mxu2 %vm136_vm0, %v364_v23 }
  0x1e   :  { %363 = vmatmul.msk.bf16.vlgmr.msrb.gmra.mxu3 %vm136_vm0, %v364_v23 }
  0x89   :  { %v149_v52 = vpop.f32.mrf.mxu0  ;;  %v163_v54 = vpop.f32.mrf.mxu1 }
  0x8a   :  { %v150_v53 = vadd.f32 %v149_v52, %v35_v50  ;;  %v164_v55 = vadd.f32 %v163_v54, %v36_v51 }
  0x8c   :  { %v252_v56 = vmax.f32 %v150_v53, 0.0  ;;  %v253_v57 = vmax.f32 %v164_v55, 0.0 }
  0x8e   :  { %v268_v60 = vpack.c.bf16 %v253_v57, %v252_v56 }
  0x90   :  { %v177_v61 = vpop.f32.mrf.mxu2  ;;  %276 = vst [vmem:[%s548_s3] sm:$0xff] %v268_v60 }
  0x91   :  { %v178_v62 = vadd.f32 %v177_v61, %v37_v58  ;;  %v191_v63 = vpop.f32.mrf.mxu3  ;;  %v151_v0 = vpop.f32.mrf.mxu0 }
  0x92   :  { %v192_v1 = vadd.f32 %v191_v63, %v38_v59  ;;  %v152_v2 = vadd.f32 %v151_v0, %v35_v50  ;;  %v165_v3 = vpop.f32.mrf.mxu1 }
  0x93   :  { %v254_v4 = vmax.f32 %v178_v62, 0.0  ;;  %v166_v5 = vadd.f32 %v165_v3, %v36_v51 }
  0x94   :  { %v255_v6 = vmax.f32 %v192_v1, 0.0  ;;  %v260_v7 = vmax.f32 %v152_v2, 0.0 }
  0x95   :  { %v261_v8 = vmax.f32 %v166_v5, 0.0 }
  0x96   :  { %v269_v9 = vpack.c.bf16 %v255_v6, %v254_v4 }
  0x97   :  { %v272_v11 = vpack.c.bf16 %v261_v8, %v260_v7 }
  0x98   :  { %277 = vst [vmem:[%s548_s3 + $0x8] sm:$0xff] %v269_v9  ;;  %v179_v13 = vpop.f32.mrf.mxu2 }
  0x99   :  { %280 = vst [vmem:[%s548_s3 + $0x20] sm:$0xff] %v272_v11  ;;  %v180_v14 = vadd.f32 %v179_v13, %v37_v58  ;;  %v193_v15 = vpop.f32.mrf.mxu3  ;;  %v205_v16 = vpop.f32.mrf.mxu0 }
  0x9a   :  { %v194_v17 = vadd.f32 %v193_v15, %v38_v59  ;;  %v206_v18 = vadd.f32 %v205_v16, %v39_v10  ;;  %v219_v19 = vpop.f32.mrf.mxu1 }
  0x9b   :  { %v262_v20 = vmax.f32 %v180_v14, 0.0  ;;  %v220_v21 = vadd.f32 %v219_v19, %v40_v12 }
  0x9c   :  { %v263_v22 = vmax.f32 %v194_v17, 0.0  ;;  %v256_v23 = vmax.f32 %v206_v18, 0.0 }
  0x9d   :  { %v257_v24 = vmax.f32 %v220_v21, 0.0 }
  0x9e   :  { %v273_v26 = vpack.c.bf16 %v263_v22, %v262_v20 }
  0x9f   :  { %v270_v28 = vpack.c.bf16 %v257_v24, %v256_v23 }
  0xa0   :  { %281 = vst [vmem:[%s548_s3 + $0x28] sm:$0xff] %v273_v26  ;;  %v233_v29 = vpop.f32.mrf.mxu2 }
  0xa1   :  { %278 = vst [vmem:[%s548_s3 + $0x10] sm:$0xff] %v270_v28  ;;  %v234_v30 = vadd.f32 %v233_v29, %v41_v25  ;;  %v247_v31 = vpop.f32.mrf.mxu3  ;;  %v207_v32 = vpop.f32.mrf.mxu0 }
  0xa2   :  { %v248_v33 = vadd.f32 %v247_v31, %v42_v27  ;;  %v208_v34 = vadd.f32 %v207_v32, %v39_v10  ;;  %v221_v35 = vpop.f32.mrf.mxu1 }
  0xa3   :  { %v258_v36 = vmax.f32 %v234_v30, 0.0  ;;  %v222_v37 = vadd.f32 %v221_v35, %v40_v12 }
  0xa4   :  { %v259_v38 = vmax.f32 %v248_v33, 0.0  ;;  %v264_v39 = vmax.f32 %v208_v34, 0.0 }
  0xa5   :  { %v265_v40 = vmax.f32 %v222_v37, 0.0 }
  0xa6   :  { %v271_v41 = vpack.c.bf16 %v259_v38, %v258_v36 }
  0xa7   :  { %v274_v42 = vpack.c.bf16 %v265_v40, %v264_v39 }
  0xa8   :  { %279 = vst [vmem:[%s548_s3 + $0x18] sm:$0xff] %v271_v41  ;;  %v235_v43 = vpop.f32.mrf.mxu2 }
  0xa9   :  { %282 = vst [vmem:[%s548_s3 + $0x30] sm:$0xff] %v274_v42  ;;  %v236_v44 = vadd.f32 %v235_v43, %v41_v25  ;;  %v249_v45 = vpop.f32.mrf.mxu3 }
  0xaa   :  { %v250_v46 = vadd.f32 %v249_v45, %v42_v27 }
  0xab   :  { %v266_v47 = vmax.f32 %v236_v44, 0.0 }
  0xac   :  { %v267_v48 = vmax.f32 %v250_v46, 0.0 }
  0xae   :  { %v275_v49 = vpack.c.bf16 %v267_v48, %v266_v47 }
  0xb0   :  { %283 = vst [vmem:[%s548_s3 + $0x38] sm:$0xff] %v275_v49 }

// kernel: conv_gauss_decoder_forward.5
= control target key start
LH: loop header
LB: loop body
LE: loop exit
PB: predicated region body
PF: predicated region fallthrough
CT: control target
= control target key end

     0   :  { %s986_s15 = smov 0   ;;  %s1138_s0 = inlined_call_operand.vmem [shape: bf16[32,576], index: 0, kind: input, shape index: {}]   ;;  %s1139_s1 = inlined_call_operand.vmem [shape: bf16[576,128], index: 1, kind: input, shape index: {}]   ;;  %s1140_s2 = inlined_call_operand.vmem [shape: f32[2,128], index: 2, kind: input, shape index: {}]   ;;  %s1141_s3 = inlined_call_operand.vmem [shape: bf16[32,128], index: 3, kind: output, shape index: {0}]   ;;  %s1142_s4 = inlined_call_operand.vmem [shape: f32[2,2,128], index: 4, kind: output, shape index: {1}]  }
   0x1 LB: > { %s992_s16 = sadd.s32 4294967295, %s959_s15   ;;  %p724_p0 = scmp.ge.s32.totalorder %s959_s15, 1  ;;  %s959_s15 = sphi %s986_s15, %s15_s15  }
   0x2   : > { %p167_p1 = scmp.lt.s32.totalorder %s959_s15, 3 }
   0x4   : > { %p168_p2 = pnand %p724_p0, %p167_p1 }
   0x5   : > { %s725_s17 = sshll.u32 (!%p168_p2), %s992_s16, 1  ;;  %p211_p4 = scmp.lt.s32.totalorder (!%p168_p2), %s992_s16, 1 }
   0x6   : > { %171 = sbr.rel (%p168_p2) target bundleno = 212 (0xd4), region = 32  ;;  %p199_p3 = scmp.lt.s32.totalorder (!%p168_p2), %s725_s17, 3 }
   0xb   : > { %v909_v0 = vld [vmem:[%s1139_s1 + $0x38] sm:$0xff]  ;;  %v908_v4 = vld [vmem:[%s1139_s1 + $0x30] sm:$0xff]  ;;  %v907_v8 = vld [vmem:[%s1139_s1 + $0x28] sm:$0xff]  ;;  %s1144_s17 = smov (!%p199_p3, %s725_s17), 3  ;;  %vm537_vm0 = vcmask 523264   ;;  %s1146_s16 = smov (!%p211_p4, %s992_s16), 1 }
   0xc   : > { %v925_v1 = vld [vmem:[%s1139_s1 + $0xb8] sm:$0xff]  ;;  %541 = vmatpush.bf16.msra.mxu0 %v909_v0  ;;  %v924_v5 = vld [vmem:[%s1139_s1 + $0xb0] sm:$0xff]  ;;  %v923_v9 = vld [vmem:[%s1139_s1 + $0xa8] sm:$0xff]  ;;  %s943_s12 = smul.u32 20, %s1144_s17 }
   0xd   : > { %v933_v2 = vld [vmem:[%s1139_s1 + $0xf8] sm:$0xff]  ;;  %569 = vmatpush.bf16.msra.mxu2 %v925_v1  ;;  %v932_v6 = vld [vmem:[%s1139_s1 + $0xf0] sm:$0xff]  ;;  %v931_v10 = vld [vmem:[%s1139_s1 + $0xe8] sm:$0xff] }
   0xe   : > { %v917_v3 = vld [vmem:[%s1139_s1 + $0x78] sm:$0xff]  ;;  %583 = vmatpush.bf16.msra.mxu3 %v933_v2  ;;  %v916_v7 = vld [vmem:[%s1139_s1 + $0x70] sm:$0xff]  ;;  %v915_v11 = vld [vmem:[%s1139_s1 + $0x68] sm:$0xff]  ;;  %s1081_s26 = scalar_lea.vmem %s1138_s0, %s943_s12 }
   0xf   : > { %555 = vmatpush.bf16.msra.mxu1 %v917_v3  ;;  %v906_v12 = vld [vmem:[%s1139_s1 + $0x20] sm:$0xff]  ;;  %v905_v16 = vld [vmem:[%s1139_s1 + $0x18] sm:$0xff]  ;;  %v904_v20 = vld [vmem:[%s1139_s1 + $0x10] sm:$0xff] }
  0x10   : > { %542 = vmatpush.bf16.msra.mxu0 %v908_v4  ;;  %v922_v13 = vld [vmem:[%s1139_s1 + $0xa0] sm:$0xff]  ;;  %v921_v17 = vld [vmem:[%s1139_s1 + $0x98] sm:$0xff]  ;;  %v920_v21 = vld [vmem:[%s1139_s1 + $0x90] sm:$0xff] }
  0x11   : > { %570 = vmatpush.bf16.msra.mxu2 %v924_v5  ;;  %v930_v14 = vld [vmem:[%s1139_s1 + $0xe0] sm:$0xff]  ;;  %v929_v18 = vld [vmem:[%s1139_s1 + $0xd8] sm:$0xff]  ;;  %v928_v22 = vld [vmem:[%s1139_s1 + $0xd0] sm:$0xff] }
  0x12   : > { %584 = vmatpush.bf16.msra.mxu3 %v932_v6  ;;  %v914_v15 = vld [vmem:[%s1139_s1 + $0x60] sm:$0xff]  ;;  %v913_v19 = vld [vmem:[%s1139_s1 + $0x58] sm:$0xff]  ;;  %v912_v23 = vld [vmem:[%s1139_s1 + $0x50] sm:$0xff] }
  0x13   : > { %556 = vmatpush.bf16.msra.mxu1 %v916_v7  ;;  %v903_v24 = vld [vmem:[%s1139_s1 + $0x8] sm:$0xff]  ;;  %v902_v28 = vld [vmem:[%s1139_s1] sm:$0xff]  ;;  %v899_v33 = vld [vmem:[%s1081_s26 + $0x10] sm:$0xf0] }
  0x14   : > { %543 = vmatpush.bf16.msra.mxu0 %v907_v8  ;;  %v919_v25 = vld [vmem:[%s1139_s1 + $0x88] sm:$0xff]  ;;  %v918_v29 = vld [vmem:[%s1139_s1 + $0x80] sm:$0xff]  ;;  %v900_v35 = vld [vmem:[%s1081_s26 + $0x18] sm:$0xf0] }
  0x15   : > { %571 = vmatpush.bf16.msra.mxu2 %v923_v9  ;;  %v927_v26 = vld [vmem:[%s1139_s1 + $0xc8] sm:$0xff]  ;;  %v926_v30 = vld [vmem:[%s1139_s1 + $0xc0] sm:$0xff]  ;;  %v734_v39 = vld [vmem:[%s1081_s26 + $0x14] sm:$0xf0] }
  0x16   : > { %585 = vmatpush.bf16.msra.mxu3 %v931_v10  ;;  %v911_v27 = vld [vmem:[%s1139_s1 + $0x48] sm:$0xff]  ;;  %v910_v31 = vld [vmem:[%s1139_s1 + $0x40] sm:$0xff]  ;;  %v937_v40 = vld [vmem:[%s1139_s1 + $0x118] sm:$0xff] }
  0x17   : > { %557 = vmatpush.bf16.msra.mxu1 %v915_v11  ;;  %v732_v32 = vld [vmem:[%s1081_s26] sm:$0xf]  ;;  %v740_v34 = vld [vmem:[%s1081_s26 + $0x8] sm:$0xf]  ;;  %v898_v36 = vld [vmem:[%s1081_s26 + $0xc] sm:$0xf] }
  0x18   : > { %544 = vmatpush.bf16.msra.mxu0 %v906_v12  ;;  %v742_v37 = vld [vmem:[%s1081_s26 + $0x1c] sm:$0xf0]  ;;  %v897_v38 = vld [vmem:[%s1081_s26 + $0x4] sm:$0xf]  ;;  %v733_v41 = vor.u32 %v899_v33, %v732_v32  ;;  %v741_v42 = vor.u32 %v900_v35, %v740_v34  ;;  %v936_v45 = vld [vmem:[%s1139_s1 + $0x110] sm:$0xff] }
  0x19   : > { %572 = vmatpush.bf16.msra.mxu2 %v922_v13  ;;  %v745_v43 = vor.u32 %v898_v36, %v742_v37  ;;  %v737_v44 = vor.u32 %v897_v38, %v734_v39  ;;  %v935_v46 = vld [vmem:[%s1139_s1 + $0x108] sm:$0xff]  ;;  %v934_v47 = vld [vmem:[%s1139_s1 + $0x100] sm:$0xff]  ;;  %v748_v48 = vld [vmem:[%s1081_s26 + $0x10] sm:$0xf] }
  0x1a   : > { %586 = vmatpush.bf16.msra.mxu3 %v930_v14  ;;  %v901_v49 = vld [vmem:[%s1081_s26 + $0x20] sm:$0xf0]  ;;  %v952_v54 = vld [vmem:[%s1140_s2] ss:$0 sm:$0xff]  ;;  %s728_s26 = sshll.u32 %s1144_s17, 2  ;;  %s729_s17 = sshll.u32 %s1146_s16, 1 }
  0x1b   : > { %558 = vmatpush.bf16.msra.mxu1 %v914_v15  ;;  %v749_v50 = vor.u32 %v901_v49, %v748_v48  ;;  %s209_s29 = scalar_lea.vmem %s1141_s3, %s728_s26  ;;  %s214_s6 = scalar_lea.vmem %s1142_s4, %s729_s17 }
  0x1c   : > { %545 = vmatpush.bf16.msra.mxu0 %v905_v16 }
  0x1d   : > { %573 = vmatpush.bf16.msra.mxu2 %v921_v17 }
  0x1e   : > { %587 = vmatpush.bf16.msra.mxu3 %v929_v18 }
  0x1f   : > { %559 = vmatpush.bf16.msra.mxu1 %v913_v19 }
  0x20   : > { %546 = vmatpush.bf16.msra.mxu0 %v904_v20 }
  0x21   : > { %574 = vmatpush.bf16.msra.mxu2 %v920_v21 }
  0x22   : > { %588 = vmatpush.bf16.msra.mxu3 %v928_v22 }
  0x23   : > { %560 = vmatpush.bf16.msra.mxu1 %v912_v23 }
  0x24   : > { %547 = vmatpush.bf16.msra.mxu0 %v903_v24 }
  0x25   : > { %575 = vmatpush.bf16.msra.mxu2 %v919_v25 }
  0x26   : > { %589 = vmatpush.bf16.msra.mxu3 %v927_v26 }
  0x27   : > { %561 = vmatpush.bf16.msra.mxu1 %v911_v27 }
  0x28   : > { %548 = vmatpush.bf16.msra.mxu0 %v902_v28 }
  0x29   : > { %576 = vmatpush.bf16.msra.mxu2 %v918_v29 }
  0x2a   : > { %590 = vmatpush.bf16.msra.mxu3 %v926_v30 }
  0x2b   : > { %562 = vmatpush.bf16.msra.mxu1 %v910_v31  ;;  %549 = vmatmul.bf16.vlgmr.msra.gmra.mxu0 %v733_v41 }
  0x2c   : > { %601 = vmatpush.bf16.msrb.mxu0 %v937_v40  ;;  %577 = vmatmul.bf16.vlgmr.msra.gmra.mxu2 %v741_v42 }
  0x2d   : > { %591 = vmatmul.bf16.vlgmr.msra.gmra.mxu3 %v745_v43 }
  0x2e   : > { %563 = vmatmul.bf16.vlgmr.msra.gmra.mxu1 %v737_v44 }
  0x30   : > { %602 = vmatpush.bf16.msrb.mxu0 %v936_v45 }
  0x34   : > { %603 = vmatpush.bf16.msrb.mxu0 %v935_v46 }
  0x38   : > { %604 = vmatpush.bf16.msrb.mxu0 %v934_v47 }
  0x3b   : > { %894 = vmatmul.msk.bf16.vlgmr.msrb.gmra.mxu0 %vm537_vm0, %v749_v50 }
  0xa8   : > { %v550_v51 = vpop.f32.mrf.mxu0 }
  0xa9   : > { %v551_v56 = vadd.f32 %v952_v54, %v550_v51 }
  0xab   : > { %v564_v52 = vpop.f32.mrf.mxu1 }
  0xac   : > { %v565_v60 = vadd.f32 %v564_v52, %v551_v56 }
  0xaf   : > { %v578_v53 = vpop.f32.mrf.mxu2 }
  0xb0   : > { %v552_v55 = vpop.f32.mrf.mxu0  ;;  %v592_v57 = vpop.f32.mrf.mxu3  ;;  %v579_v63 = vadd.f32 %v578_v53, %v565_v60 }
  0xb1   : > { %v553_v58 = vadd.f32 %v952_v54, %v552_v55 }
  0xb2   : > { %v593_v2 = vadd.f32 %v592_v57, %v579_v63 }
  0xb3   : > { %v566_v59 = vpop.f32.mrf.mxu1 }
  0xb4   : > { %v567_v0 = vadd.f32 %v566_v59, %v553_v58 }
  0xb7   : > { %v580_v61 = vpop.f32.mrf.mxu2 }
  0xb8   : > { %v606_v62 = vpop.f32.mrf.mxu0  ;;  %v581_v1 = vadd.f32 %v580_v61, %v567_v0  ;;  %v594_v3 = vpop.f32.mrf.mxu3 }
  0xb9   : > { %v607_v5 = vadd.f32 %v606_v62, %v593_v2 }
  0xba   : > { %v595_v4 = vadd.f32 %v594_v3, %v581_v1 }
  0xbb   : > { %v623_v8 = vmul.f32 %v607_v5, %v607_v5 }
  0xc0   : > { %v608_v6 = vpop.f32.mrf.mxu0 }
  0xc1   : > { %v609_v7 = vadd.f32 %v608_v6, %v595_v4 }
  0xc3   : > { %v941_v9 = vpack.c.bf16 %v609_v7, %v607_v5  ;;  %v615_v10 = vadd.f32 %v609_v7, %v607_v5  ;;  %v624_v11 = vmul.f32 %v609_v7, %v609_v7 }
  0xc5   : > { %942 = vst [vmem:[%s209_s29] sm:$0xff] %v941_v9   ;;  %v616_v12 = vrot.slane %v615_v10, 4  ;;  %v625_v13 = vadd.f32 %v624_v11, %v623_v8 }
  0xc7   : > { %v617_v14 = vadd.f32 %v616_v12, %v615_v10  ;;  %v626_v15 = vrot.slane %v625_v13, 4 }
  0xc9   : > { %v618_v16 = vrot.slane %v617_v14, 2  ;;  %v627_v17 = vadd.f32 %v626_v15, %v625_v13 }
  0xcb   : > { %v619_v18 = vadd.f32 %v618_v16, %v617_v14  ;;  %v628_v19 = vrot.slane %v627_v17, 2 }
  0xcd   : > { %v620_v20 = vrot.slane %v619_v18, 1  ;;  %v629_v21 = vadd.f32 %v628_v19, %v627_v17 }
  0xcf   : > { %v621_v22 = vadd.f32 %v620_v20, %v619_v18  ;;  %v630_v23 = vrot.slane %v629_v21, 1 }
  0xd1   : > { %622 = vst [vmem:[%s214_s6] sm:$0x1] %v621_v22  ;;  %v631_v24 = vadd.f32 %v630_v23, %v629_v21 }
  0xd3   : > { %632 = vst [vmem:[%s214_s6 + $0x1] sm:$0x1] %v631_v24 }
  0xd4 PF: > { %s15_s15 = sadd.s32 1, %s959_s15  }
  0xd5   : > { %p12_p5 = scmp.ge.s32.totalorder %s15_s15, 4  }
  0xd7   :  { %14 = sbr.rel (!%p12_p5) target bundleno = 1 (0x1), region = 74 }

// kernel: conv_gauss_decoder_forward.6
= control target key start
LH: loop header
LB: loop body
LE: loop exit
PB: predicated region body
PF: predicated region fallthrough
CT: control target
= control target key end

     0   :  { %s921_s15 = smov 0   ;;  %s1085_s0 = inlined_call_operand.vmem [shape: bf16[128,288], index: 0, kind: input, shape index: {}]   ;;  %s1086_s1 = inlined_call_operand.vmem [shape: bf16[288,64], index: 1, kind: input, shape index: {}]   ;;  %s1087_s2 = inlined_call_operand.vmem [shape: f32[2,64], index: 2, kind: input, shape index: {}]   ;;  %s1088_s3 = inlined_call_operand.vmem [shape: bf16[128,64], index: 3, kind: output, shape index: {0}]   ;;  %s1089_s4 = inlined_call_operand.vmem [shape: f32[2,2,64], index: 4, kind: output, shape index: {1}]  }
   0x1 LB: > { %s927_s16 = sadd.s32 4294967295, %s894_s15   ;;  %p700_p0 = scmp.ge.s32.totalorder %s894_s15, 1  ;;  %s894_s15 = sphi %s921_s15, %s15_s15  }
   0x2   : > { %p167_p1 = scmp.lt.s32.totalorder %s894_s15, 3 }
   0x4   : > { %p168_p2 = pnand %p700_p0, %p167_p1 }
   0x5   : > { %s701_s21 = sshll.u32 (!%p168_p2), %s927_s16, 3  ;;  %p211_p4 = scmp.lt.s32.totalorder (!%p168_p2), %s927_s16, 1 }
   0x6   : > { %171 = sbr.rel (%p168_p2) target bundleno = 243 (0xf3), region = 32  ;;  %p199_p3 = scmp.lt.s32.totalorder (!%p168_p2), %s701_s21, 15 }
   0xb   : > { %v851_v0 = vld [vmem:[%s1086_s1 + $0x38] sm:$0xff]  ;;  %v861_v2 = vld [vmem:[%s1086_s1 + $0x88] sm:$0xff]  ;;  %v850_v3 = vld [vmem:[%s1086_s1 + $0x30] sm:$0xff]  ;;  %s1091_s21 = smov (!%p199_p3, %s701_s21), 15  ;;  %vm438_vm0 = vcmask 261120   ;;  %vm546_vm1 = vcmask 519168  }
   0xc   : > { %v937_v1 = vld [vmem:[%s1086_s1 + $0x78] sm:$0xff]  ;;  %451 = vmatpush.bf16.msra.mxu0 %v851_v0  ;;  %862 = vmatpush.bf16.msra.mxu3 %v851_v0  ;;  %v858_v4 = vld [vmem:[%s1086_s1 + $0x70] sm:$0xff]  ;;  %v860_v5 = vld [vmem:[%s1086_s1 + $0x80] sm:$0xff]  ;;  %s878_s30 = smul.u32 12, %s1091_s21  ;;  %s704_s12 = sshll.u32 %s1091_s21, 2  ;;  %vm555_vm2 = vcmask 523264  }
   0xd   : > { %870 = vmatpush.bf16.msra.mxu1 %v937_v1  ;;  %515 = vmatpush.bf16.msra.mxu2 %v861_v2  ;;  %v849_v6 = vld [vmem:[%s1086_s1 + $0x28] sm:$0xff]  ;;  %v848_v11 = vld [vmem:[%s1086_s1 + $0x20] sm:$0xff]  ;;  %v847_v13 = vld [vmem:[%s1086_s1 + $0x18] sm:$0xff]  ;;  %s1036_s14 = scalar_lea.vmem %s1088_s3, %s704_s12  ;;  %s1093_s16 = smov (!%p211_p4, %s927_s16), 1  ;;  %vm577_vm3 = vcmask 516096  }
   0xe   : > { %v857_v7 = vld [vmem:[%s1086_s1 + $0x68] sm:$0xff]  ;;  %s965_s11 = scalar_lea.vmem %s1085_s0, %s878_s30  ;;  %v856_v12 = vld [vmem:[%s1086_s1 + $0x60] sm:$0xff]  ;;  %v855_v14 = vld [vmem:[%s1086_s1 + $0x58] sm:$0xff]  ;;  %s705_s21 = sshll.u32 %s1093_s16, 1 }
   0xf   : > { %v716_v8 = vld [vmem:[%s965_s11 + $0x8] sm:$0xf]  ;;  %v834_v9 = vld [vmem:[%s965_s11 + $0x10] sm:$0xf0]  ;;  %v728_v17 = vld [vmem:[%s965_s11 + $0x20] sm:$0xf]  ;;  %s214_s19 = scalar_lea.vmem %s1089_s4, %s705_s21 }
  0x10   : > { %452 = vmatpush.bf16.msra.mxu0 %v850_v3  ;;  %863 = vmatpush.bf16.msra.mxu3 %v850_v3  ;;  %v717_v10 = vor.u32 %v834_v9, %v716_v8  ;;  %v846_v15 = vld [vmem:[%s1086_s1 + $0x10] sm:$0xff]  ;;  %v837_v18 = vld [vmem:[%s965_s11 + $0x28] sm:$0xf0]  ;;  %v844_v22 = vld [vmem:[%s1086_s1] sm:$0xff] }
  0x11   : > { %871 = vmatpush.bf16.msra.mxu1 %v858_v4  ;;  %516 = vmatpush.bf16.msra.mxu2 %v860_v5  ;;  %v854_v16 = vld [vmem:[%s1086_s1 + $0x50] sm:$0xff]  ;;  %v845_v19 = vld [vmem:[%s1086_s1 + $0x8] sm:$0xff]  ;;  %v729_v21 = vor.u32 %v837_v18, %v728_v17  ;;  %v720_v23 = vld [vmem:[%s965_s11 + $0x18] sm:$0xf] }
  0x12   : > { %v853_v20 = vld [vmem:[%s1086_s1 + $0x48] sm:$0xff]  ;;  %v836_v24 = vld [vmem:[%s965_s11 + $0x20] sm:$0xf0]  ;;  %v708_v25 = vld [vmem:[%s965_s11] sm:$0xf] }
  0x13   : > { %v833_v26 = vld [vmem:[%s965_s11 + $0x8] sm:$0xf0]  ;;  %v852_v27 = vld [vmem:[%s1086_s1 + $0x40] sm:$0xff]  ;;  %v835_v28 = vld [vmem:[%s965_s11 + $0x1c] sm:$0xf]  ;;  %v721_v30 = vor.u32 %v836_v24, %v720_v23 }
  0x14   : > { %453 = vmatpush.bf16.msra.mxu0 %v849_v6  ;;  %864 = vmatpush.bf16.msra.mxu3 %v849_v6  ;;  %v722_v29 = vld [vmem:[%s965_s11 + $0x24] sm:$0xf0]  ;;  %v709_v31 = vor.u32 %v833_v26, %v708_v25  ;;  %v740_v33 = vld [vmem:[%s965_s11 + $0x38] sm:$0xf]  ;;  %v840_v34 = vld [vmem:[%s965_s11 + $0x40] sm:$0xf0] }
  0x15   : > { %872 = vmatpush.bf16.msra.mxu1 %v857_v7  ;;  %826 = vmatmul.msk.bf16.vlgmr.msra.gmra.mxu2 %vm438_vm0, %v717_v10  ;;  %v725_v32 = vor.u32 %v835_v28, %v722_v29  ;;  %v741_v35 = vor.u32 %v840_v34, %v740_v33  ;;  %v732_v36 = vld [vmem:[%s965_s11 + $0x30] sm:$0xf]  ;;  %v839_v37 = vld [vmem:[%s965_s11 + $0x38] sm:$0xf0]  ;;  %v838_v38 = vld [vmem:[%s965_s11 + $0x34] sm:$0xf] }
  0x16   : > { %v734_v39 = vld [vmem:[%s965_s11 + $0x3c] sm:$0xf0]  ;;  %v733_v40 = vor.u32 %v839_v37, %v732_v36  ;;  %v752_v42 = vld [vmem:[%s965_s11 + $0x50] sm:$0xf]  ;;  %v843_v43 = vld [vmem:[%s965_s11 + $0x58] sm:$0xf0] }
  0x17   : > { %v737_v41 = vor.u32 %v838_v38, %v734_v39  ;;  %v832_v44 = vld [vmem:[%s965_s11 + $0x4] sm:$0xf]  ;;  %v710_v45 = vld [vmem:[%s965_s11 + $0xc] sm:$0xf0]  ;;  %v753_v46 = vor.u32 %v843_v43, %v752_v42  ;;  %v744_v48 = vld [vmem:[%s965_s11 + $0x48] sm:$0xf] }
  0x18   : > { %454 = vmatpush.bf16.msra.mxu0 %v848_v11  ;;  %865 = vmatpush.bf16.msra.mxu3 %v848_v11  ;;  %v713_v47 = vor.u32 %v832_v44, %v710_v45  ;;  %v842_v49 = vld [vmem:[%s965_s11 + $0x50] sm:$0xf0]  ;;  %v841_v50 = vld [vmem:[%s965_s11 + $0x4c] sm:$0xf]  ;;  %v746_v51 = vld [vmem:[%s965_s11 + $0x54] sm:$0xf0] }
  0x19   : > { %873 = vmatpush.bf16.msra.mxu1 %v856_v12  ;;  %v745_v52 = vor.u32 %v842_v49, %v744_v48  ;;  %v749_v53 = vor.u32 %v841_v50, %v746_v51  ;;  %v1029_v58 = vld [vmem:[%s1087_s2] ss:$0 sm:$0xff] }
  0x1c   : > { %455 = vmatpush.bf16.msra.mxu0 %v847_v13  ;;  %866 = vmatpush.bf16.msra.mxu3 %v847_v13 }
  0x1d   : > { %874 = vmatpush.bf16.msra.mxu1 %v855_v14 }
  0x20   : > { %456 = vmatpush.bf16.msra.mxu0 %v846_v15  ;;  %867 = vmatpush.bf16.msra.mxu3 %v846_v15 }
  0x21   : > { %875 = vmatpush.bf16.msra.mxu1 %v854_v16 }
  0x24   : > { %457 = vmatpush.bf16.msra.mxu0 %v845_v19  ;;  %868 = vmatpush.bf16.msra.mxu3 %v845_v19 }
  0x25   : > { %876 = vmatpush.bf16.msra.mxu1 %v853_v20  ;;  %827 = vmatmul.msk.bf16.gmra.mxu2 %vm438_vm0, %v729_v21 }
  0x28   : > { %458 = vmatpush.bf16.msra.mxu0 %v844_v22  ;;  %869 = vmatpush.bf16.msra.mxu3 %v844_v22 }
  0x29   : > { %877 = vmatpush.bf16.msra.mxu1 %v852_v27 }
  0x2b   : > { %464 = vmatmul.bf16.vlgmr.msra.gmra.mxu3 %v721_v30  ;;  %459 = vmatmul.bf16.vlgmr.msra.gmra.mxu0 %v709_v31 }
  0x2c   : > { %480 = vmatpush.bf16.msrb.mxu0 %v937_v1  ;;  %493 = vmatmul.bf16.vlgmr.msra.gmra.mxu1 %v725_v32 }
  0x30   : > { %481 = vmatpush.bf16.msrb.mxu0 %v858_v4 }
  0x34   : > { %482 = vmatpush.bf16.msrb.mxu0 %v857_v7 }
  0x35   : > { %828 = vmatmul.msk.bf16.gmra.mxu2 %vm438_vm0, %v741_v35 }
  0x38   : > { %483 = vmatpush.bf16.msrb.mxu0 %v856_v12 }
  0x3b   : > { %469 = vmatmul.bf16.gmra.mxu3 %v733_v40 }
  0x3c   : > { %484 = vmatpush.bf16.msrb.mxu0 %v855_v14  ;;  %498 = vmatmul.bf16.gmra.mxu1 %v737_v41 }
  0x40   : > { %485 = vmatpush.bf16.msrb.mxu0 %v854_v16 }
  0x44   : > { %486 = vmatpush.bf16.msrb.mxu0 %v853_v20 }
  0x45   : > { %829 = vmatmul.msk.bf16.gmra.mxu2 %vm438_vm0, %v753_v46 }
  0x48   : > { %487 = vmatpush.bf16.msrb.mxu0 %v852_v27 }
  0x4b   : > { %488 = vmatmul.bf16.vlgmr.msrb.gmra.mxu0 %v713_v47  ;;  %474 = vmatmul.bf16.gmra.mxu3 %v745_v52 }
  0x4c   : > { %503 = vmatmul.bf16.gmra.mxu1 %v749_v53 }
  0x98   : > { %v518_v54 = vpop.f32.mrf.mxu2 }
  0xa0   : > { %v520_v55 = vpop.f32.mrf.mxu2 }
  0xa8   : > { %v523_v56 = vpop.f32.mrf.mxu2  ;;  %v460_v0 = vpop.f32.mrf.mxu0 }
  0xa9   : > { %v494_v57 = vpop.f32.mrf.mxu1  ;;  %v461_v15 = vadd.f32 %v1029_v58, %v460_v0 }
  0xae   : > { %v465_v59 = vpop.f32.mrf.mxu3 }
  0xaf   : > { %v466_v60 = vadd.f32 %v1029_v58, %v465_v59 }
  0xb0   : > { %v525_v63 = vpop.f32.mrf.mxu2  ;;  %v462_v9 = vpop.f32.mrf.mxu0 }
  0xb1   : > { %v495_v61 = vadd.f32 %v494_v57, %v466_v60  ;;  %v496_v62 = vpop.f32.mrf.mxu1  ;;  %v463_v27 = vadd.f32 %v1029_v58, %v462_v9 }
  0xb3   : > { %v524_v1 = vadd.f32 %v523_v56, %v495_v61 }
  0xb5   : > { %v540_v2 = vpack.c.bf16 %v524_v1, %v524_v1  ;;  %v581_v37 = vmul.f32 %v524_v1, %v524_v1  ;;  %v559_v45 = vsel %vm555_vm2, %v524_v1, 0.0 }
  0xb6   : > { %v467_v3 = vpop.f32.mrf.mxu3 }
  0xb7   : > { %549 = vst.msk [vmem:[%s1036_s14 + $0x8] sm:$0xf] %vm546_vm1, %v540_v2  ;;  %v468_v4 = vadd.f32 %v1029_v58, %v467_v3  ;;  %v590_v52 = vsel %vm555_vm2, %v581_v37, 0.0 }
  0xb8   : > { %v528_v8 = vpop.f32.mrf.mxu2 }
  0xb9   : > { %v497_v5 = vadd.f32 %v496_v62, %v468_v4  ;;  %v499_v6 = vpop.f32.mrf.mxu1 }
  0xbb   : > { %v526_v7 = vadd.f32 %v525_v63, %v497_v5 }
  0xbd   : > { %v541_v10 = vpack.c.bf16 %v526_v7, %v526_v7  ;;  %v582_v46 = vmul.f32 %v526_v7, %v526_v7  ;;  %v561_v53 = vsel %vm555_vm2, %v526_v7, 0.0 }
  0xbe   : > { %v470_v11 = vpop.f32.mrf.mxu3 }
  0xbf   : > { %550 = vst.msk [vmem:[%s1036_s14 + $0xc] sm:$0xf] %vm546_vm1, %v541_v10  ;;  %v471_v12 = vadd.f32 %v1029_v58, %v470_v11  ;;  %v592_v60 = vsel %vm555_vm2, %v582_v46, 0.0 }
  0xc0   : > { %v530_v19 = vpop.f32.mrf.mxu2 }
  0xc1   : > { %v500_v13 = vadd.f32 %v499_v6, %v471_v12  ;;  %v501_v16 = vpop.f32.mrf.mxu1 }
  0xc3   : > { %v529_v14 = vadd.f32 %v528_v8, %v500_v13 }
  0xc5   : > { %v542_v17 = vpack.c.bf16 %v529_v14, %v529_v14  ;;  %v563_v61 = vsel %vm555_vm2, %v529_v14, 0.0 }
  0xc6   : > { %v472_v21 = vpop.f32.mrf.mxu3 }
  0xc7   : > { %551 = vst.msk [vmem:[%s1036_s14 + $0x10] sm:$0xf] %vm546_vm1, %v542_v17  ;;  %v473_v22 = vadd.f32 %v1029_v58, %v472_v21 }
  0xc8   : > { %v489_v18 = vpop.f32.mrf.mxu0  ;;  %v533_v35 = vpop.f32.mrf.mxu2 }
  0xc9   : > { %v490_v20 = vadd.f32 %v489_v18, %v461_v15  ;;  %v502_v24 = vadd.f32 %v501_v16, %v473_v22  ;;  %v504_v30 = vpop.f32.mrf.mxu1 }
  0xcb   : > { %v519_v23 = vadd.f32 %v518_v54, %v490_v20  ;;  %v531_v26 = vadd.f32 %v530_v19, %v502_v24  ;;  %v583_v54 = vmul.f32 %v529_v14, %v529_v14 }
  0xcd   : > { %v538_v25 = vpack.c.bf16 %v519_v23, %v519_v23  ;;  %v543_v28 = vpack.c.bf16 %v531_v26, %v531_v26  ;;  %v579_v34 = vmul.f32 %v519_v23, %v519_v23  ;;  %v556_v39 = vsel %vm555_vm2, %v519_v23, 0.0 }
  0xce   : > { %v475_v32 = vpop.f32.mrf.mxu3  ;;  %v584_v62 = vmul.f32 %v531_v26, %v531_v26  ;;  %v594_v3 = vsel %vm555_vm2, %v583_v54, 0.0  ;;  %v565_v4 = vsel %vm555_vm2, %v531_v26, 0.0 }
  0xcf   : > { %547 = vst.msk [vmem:[%s1036_s14] sm:$0xf] %vm546_vm1, %v538_v25  ;;  %v476_v33 = vadd.f32 %v1029_v58, %v475_v32  ;;  %v587_v47 = vsel %vm555_vm2, %v579_v34, 0.0 }
  0xd0   : > { %v491_v29 = vpop.f32.mrf.mxu0  ;;  %552 = vst.msk [vmem:[%s1036_s14 + $0x14] sm:$0xf] %vm546_vm1, %v543_v28  ;;  %v535_v6 = vpop.f32.mrf.mxu2  ;;  %v596_v9 = vsel %vm555_vm2, %v584_v62, 0.0 }
  0xd1   : > { %v492_v31 = vadd.f32 %v491_v29, %v463_v27  ;;  %v505_v38 = vadd.f32 %v504_v30, %v476_v33  ;;  %v506_v63 = vpop.f32.mrf.mxu1 }
  0xd3   : > { %v521_v36 = vadd.f32 %v520_v55, %v492_v31  ;;  %v534_v44 = vadd.f32 %v533_v35, %v505_v38 }
  0xd5   : > { %v539_v40 = vpack.c.bf16 %v521_v36, %v521_v36  ;;  %v557_v41 = vsel %vm555_vm2, %v521_v36, 0.0  ;;  %v580_v42 = vmul.f32 %v521_v36, %v521_v36  ;;  %v544_v51 = vpack.c.bf16 %v534_v44, %v534_v44 }
  0xd6   : > { %v558_v43 = vadd.f32 %v557_v41, %v556_v39  ;;  %v477_v55 = vpop.f32.mrf.mxu3  ;;  %v585_v5 = vmul.f32 %v534_v44, %v534_v44  ;;  %v567_v10 = vsel %vm555_vm2, %v534_v44, 0.0 }
  0xd7   : > { %548 = vst.msk [vmem:[%s1036_s14 + $0x4] sm:$0xf] %vm546_vm1, %v539_v40  ;;  %v588_v48 = vsel %vm555_vm2, %v580_v42, 0.0  ;;  %v478_v59 = vadd.f32 %v1029_v58, %v477_v55 }
  0xd8   : > { %v560_v49 = vadd.f32 %v559_v45, %v558_v43  ;;  %v589_v50 = vadd.f32 %v588_v48, %v587_v47  ;;  %553 = vst.msk [vmem:[%s1036_s14 + $0x18] sm:$0xf] %vm546_vm1, %v544_v51  ;;  %v598_v15 = vsel %vm555_vm2, %v585_v5, 0.0 }
  0xd9   : > { %v507_v2 = vadd.f32 %v506_v63, %v478_v59 }
  0xda   : > { %v562_v56 = vadd.f32 %v561_v53, %v560_v49  ;;  %v591_v57 = vadd.f32 %v590_v52, %v589_v50 }
  0xdb   : > { %v536_v58 = vadd.f32 %v535_v6, %v507_v2 }
  0xdc   : > { %v593_v0 = vadd.f32 %v592_v60, %v591_v57  ;;  %v564_v1 = vadd.f32 %v563_v61, %v562_v56 }
  0xdd   : > { %v545_v13 = vpack.c.bf16 %v536_v58, %v536_v58  ;;  %v569_v14 = vsel %vm555_vm2, %v536_v58, 0.0  ;;  %v586_v16 = vmul.f32 %v536_v58, %v536_v58 }
  0xde   : > { %v566_v7 = vadd.f32 %v565_v4, %v564_v1  ;;  %v595_v8 = vadd.f32 %v594_v3, %v593_v0 }
  0xdf   : > { %554 = vst.msk [vmem:[%s1036_s14 + $0x1c] sm:$0xf] %vm546_vm1, %v545_v13  ;;  %v600_v19 = vsel %vm555_vm2, %v586_v16, 0.0 }
  0xe0   : > { %v568_v11 = vadd.f32 %v567_v10, %v566_v7  ;;  %v597_v12 = vadd.f32 %v596_v9, %v595_v8 }
  0xe2   : > { %v599_v17 = vadd.f32 %v598_v15, %v597_v12  ;;  %v570_v18 = vadd.f32 %v569_v14, %v568_v11 }
  0xe4   : > { %v571_v20 = vrot.slane %v570_v18, 4  ;;  %v601_v21 = vadd.f32 %v600_v19, %v599_v17 }
  0xe6   : > { %v572_v22 = vadd.f32 %v571_v20, %v570_v18  ;;  %v602_v23 = vrot.slane %v601_v21, 4 }
  0xe8   : > { %v573_v24 = vrot.slane %v572_v22, 2  ;;  %v603_v25 = vadd.f32 %v602_v23, %v601_v21 }
  0xea   : > { %v574_v26 = vadd.f32 %v573_v24, %v572_v22  ;;  %v604_v27 = vrot.slane %v603_v25, 2 }
  0xec   : > { %v575_v28 = vrot.slane %v574_v26, 1  ;;  %v605_v29 = vadd.f32 %v604_v27, %v603_v25 }
  0xee   : > { %v576_v30 = vadd.f32 %v575_v28, %v574_v26  ;;  %v606_v31 = vrot.slane %v605_v29, 1 }
  0xf0   : > { %578 = vst.msk [vmem:[%s214_s19] sm:$0x1] %vm577_vm3, %v576_v30  ;;  %v607_v32 = vadd.f32 %v606_v31, %v605_v29 }
  0xf2   : > { %608 = vst.msk [vmem:[%s214_s19 + $0x1] sm:$0x1] %vm577_vm3, %v607_v32 }
  0xf3 PF: > { %s15_s15 = sadd.s32 1, %s894_s15  }
  0xf4   : > { %p12_p5 = scmp.ge.s32.totalorder %s15_s15, 4  }
  0xf6   :  { %14 = sbr.rel (!%p12_p5) target bundleno = 1 (0x1), region = 74 }

// kernel: tile.68
= control target key start
LH: loop header
LB: loop body
LE: loop exit
PB: predicated region body
PF: predicated region fallthrough
CT: control target
= control target key end

     0   :  { %s22_s0 = inlined_call_operand.vmem [shape: f32[16], index: 0, kind: input, shape index: {}]   ;;  %s23_s1 = inlined_call_operand.vmem [shape: f32[4,16], index: 1, kind: output, shape index: {}]  }
   0x1   :  { %v4_v0 = vld [vmem:[%s22_s0] ss:$0 sm:$0xff] }
   0x2   :  { %5 = vst [vmem:[%s23_s1] sm:$0xf] %v4_v0 }

// kernel: conv_gauss_decoder_forward.7
= control target key start
LH: loop header
LB: loop body
LE: loop exit
PB: predicated region body
PF: predicated region fallthrough
CT: control target
= control target key end

     0   :  { %s2183_s12 = smov 0   ;;  %s3254_s0 = inlined_call_operand.vmem [shape: bf16[512,144], index: 0, kind: input, shape index: {}]   ;;  %s3255_s1 = inlined_call_operand.vmem [shape: bf16[144,128], index: 1, kind: input, shape index: {}]   ;;  %s3256_s2 = inlined_call_operand.vmem [shape: f32[2,128], index: 2, kind: input, shape index: {}]   ;;  %s3257_s3 = inlined_call_operand.vmem [shape: f32[512,128], index: 3, kind: output, shape index: {}]  }
   0x1 LB: > { %s1707_s13 = sadd.s32 4294967295, %s2161_s12   ;;  %p1711_p0 = scmp.ge.s32.totalorder %s2161_s12, 1  ;;  %s2161_s12 = sphi %s2183_s12, %s13_s12  }
   0x2   : > { %p139_p1 = scmp.lt.s32.totalorder %s2161_s12, 3 }
   0x4   : > { %p140_p2 = pnand %p1711_p0, %p139_p1 }
   0x5   : > { %s1712_s18 = sshll.u32 (!%p140_p2), %s1707_s13, 5 }
   0x6   : > { %143 = sbr.rel (%p140_p2) target bundleno = 445 (0x1bd), region = 32  ;;  %p165_p3 = scmp.lt.s32.totalorder (!%p140_p2), %s1712_s18, 63 }
   0xb   : > { %v1939_v0 = vld [vmem:[%s3255_s1 + $0x38] sm:$0xff]  ;;  %v1940_v1 = vld [vmem:[%s3255_s1 + $0x40] sm:$0xff]  ;;  %v1938_v2 = vld [vmem:[%s3255_s1 + $0x30] sm:$0xff]  ;;  %s3295_s18 = smov (!%p165_p3, %s1712_s18), 63  ;;  %vm428_vm0 = vcmask 130048  }
   0xc   : > { %477 = vmatpush.bf16.msra.mxu0 %v1939_v0  ;;  %1941 = vmatpush.bf16.msra.mxu2 %v1939_v0  ;;  %s1899_s21 = sshll.u32 %s3295_s18, 3  ;;  %v1937_v3 = vld [vmem:[%s3255_s1 + $0x28] sm:$0xff]  ;;  %v1936_v7 = vld [vmem:[%s3255_s1 + $0x20] sm:$0xff]  ;;  %v1935_v11 = vld [vmem:[%s3255_s1 + $0x18] sm:$0xff] }
   0xd   : > { %573 = vmatpush.bf16.msra.mxu1 %v1940_v1  ;;  %1949 = vmatpush.bf16.msra.mxu3 %v1940_v1  ;;  %s2208_s24 = scalar_lea.vmem %s3254_s0, %s1899_s21  ;;  %v1934_v12 = vld [vmem:[%s3255_s1 + $0x10] sm:$0xff]  ;;  %v1933_v16 = vld [vmem:[%s3255_s1 + $0x8] sm:$0xff]  ;;  %v1932_v19 = vld [vmem:[%s3255_s1] sm:$0xff]  ;;  %s2384_s20 = scalar_lea.vmem %s3257_s3, %s1899_s21 }
   0xe   : > { %v1900_v4 = vld [vmem:[%s2208_s24 + $0x4] sm:$0xf]  ;;  %v1721_v5 = vld [vmem:[%s2208_s24 + $0x8] sm:$0xf0]  ;;  %v1918_v8 = vld [vmem:[%s2208_s24 + $0x94] sm:$0xf] }
   0xf   : > { %v1724_v6 = vor.u32 %v1900_v4, %v1721_v5  ;;  %v1793_v9 = vld [vmem:[%s2208_s24 + $0x98] sm:$0xf0]  ;;  %v1902_v13 = vld [vmem:[%s2208_s24 + $0x14] sm:$0xf]  ;;  %v1920_v17 = vld [vmem:[%s2208_s24 + $0xa4] sm:$0xf] }
  0x10   : > { %478 = vmatpush.bf16.msra.mxu0 %v1938_v2  ;;  %1942 = vmatpush.bf16.msra.mxu2 %v1938_v2  ;;  %v1796_v10 = vor.u32 %v1918_v8, %v1793_v9  ;;  %v1729_v14 = vld [vmem:[%s2208_s24 + $0x18] sm:$0xf0]  ;;  %v1801_v18 = vld [vmem:[%s2208_s24 + $0xa8] sm:$0xf0]  ;;  %v1719_v20 = vld [vmem:[%s2208_s24] sm:$0xf] }
  0x11   : > { %1881 = vmatmul.msk.bf16.vlgmr.msra.gmra.mxu1 %vm428_vm0, %v1724_v6  ;;  %v1732_v15 = vor.u32 %v1902_v13, %v1729_v14  ;;  %v1901_v21 = vld [vmem:[%s2208_s24 + $0x4] sm:$0xf0]  ;;  %v1804_v22 = vor.u32 %v1920_v17, %v1801_v18  ;;  %v1783_v23 = vld [vmem:[%s2208_s24 + $0x80] sm:$0xf]  ;;  %v1904_v27 = vld [vmem:[%s2208_s24 + $0x24] sm:$0xf] }
  0x12   : > { %1890 = vmatmul.msk.bf16.vlgmr.msra.gmra.mxu3 %vm428_vm0, %v1796_v10  ;;  %v1917_v24 = vld [vmem:[%s2208_s24 + $0x84] sm:$0xf0]  ;;  %v1720_v25 = vor.u32 %v1901_v21, %v1719_v20  ;;  %v1737_v28 = vld [vmem:[%s2208_s24 + $0x28] sm:$0xf0]  ;;  %v1922_v30 = vld [vmem:[%s2208_s24 + $0xb4] sm:$0xf] }
  0x13   : > { %v1784_v26 = vor.u32 %v1917_v24, %v1783_v23  ;;  %v1740_v29 = vor.u32 %v1904_v27, %v1737_v28  ;;  %v1809_v31 = vld [vmem:[%s2208_s24 + $0xb8] sm:$0xf0]  ;;  %v1727_v32 = vld [vmem:[%s2208_s24 + $0x10] sm:$0xf]  ;;  %v1903_v33 = vld [vmem:[%s2208_s24 + $0x14] sm:$0xf0] }
  0x14   : > { %479 = vmatpush.bf16.msra.mxu0 %v1937_v3  ;;  %1943 = vmatpush.bf16.msra.mxu2 %v1937_v3  ;;  %v1812_v34 = vor.u32 %v1922_v30, %v1809_v31  ;;  %v1791_v35 = vld [vmem:[%s2208_s24 + $0x90] sm:$0xf]  ;;  %v1919_v36 = vld [vmem:[%s2208_s24 + $0x94] sm:$0xf0]  ;;  %v1728_v37 = vor.u32 %v1903_v33, %v1727_v32  ;;  %v1906_v39 = vld [vmem:[%s2208_s24 + $0x34] sm:$0xf] }
  0x15   : > { %v1792_v38 = vor.u32 %v1919_v36, %v1791_v35  ;;  %v1745_v40 = vld [vmem:[%s2208_s24 + $0x38] sm:$0xf0]  ;;  %v1924_v42 = vld [vmem:[%s2208_s24 + $0xc4] sm:$0xf]  ;;  %v1817_v43 = vld [vmem:[%s2208_s24 + $0xc8] sm:$0xf0] }
  0x16   : > { %v1748_v41 = vor.u32 %v1906_v39, %v1745_v40  ;;  %v1735_v44 = vld [vmem:[%s2208_s24 + $0x20] sm:$0xf]  ;;  %v1905_v45 = vld [vmem:[%s2208_s24 + $0x24] sm:$0xf0]  ;;  %v1820_v46 = vor.u32 %v1924_v42, %v1817_v43  ;;  %v1908_v51 = vld [vmem:[%s2208_s24 + $0x44] sm:$0xf] }
  0x17   : > { %v1799_v47 = vld [vmem:[%s2208_s24 + $0xa0] sm:$0xf]  ;;  %v1921_v48 = vld [vmem:[%s2208_s24 + $0xa4] sm:$0xf0]  ;;  %v1736_v49 = vor.u32 %v1905_v45, %v1735_v44  ;;  %v1753_v52 = vld [vmem:[%s2208_s24 + $0x48] sm:$0xf0] }
  0x18   : > { %480 = vmatpush.bf16.msra.mxu0 %v1936_v7  ;;  %1944 = vmatpush.bf16.msra.mxu2 %v1936_v7  ;;  %v1800_v50 = vor.u32 %v1921_v48, %v1799_v47  ;;  %v1756_v53 = vor.u32 %v1908_v51, %v1753_v52  ;;  %v1926_v54 = vld [vmem:[%s2208_s24 + $0xd4] sm:$0xf]  ;;  %v1825_v55 = vld [vmem:[%s2208_s24 + $0xd8] sm:$0xf0]  ;;  %v1743_v56 = vld [vmem:[%s2208_s24 + $0x30] sm:$0xf] }
  0x19   : > { %v1907_v57 = vld [vmem:[%s2208_s24 + $0x34] sm:$0xf0]  ;;  %v1828_v58 = vor.u32 %v1926_v54, %v1825_v55  ;;  %v1807_v59 = vld [vmem:[%s2208_s24 + $0xb0] sm:$0xf]  ;;  %v1910_v63 = vld [vmem:[%s2208_s24 + $0x54] sm:$0xf] }
  0x1a   : > { %v1923_v60 = vld [vmem:[%s2208_s24 + $0xb4] sm:$0xf0]  ;;  %v1744_v61 = vor.u32 %v1907_v57, %v1743_v56  ;;  %v1761_v0 = vld [vmem:[%s2208_s24 + $0x58] sm:$0xf0]  ;;  %v1928_v2 = vld [vmem:[%s2208_s24 + $0xe4] sm:$0xf] }
  0x1b   : > { %v1808_v62 = vor.u32 %v1923_v60, %v1807_v59  ;;  %v1764_v1 = vor.u32 %v1910_v63, %v1761_v0  ;;  %v1833_v3 = vld [vmem:[%s2208_s24 + $0xe8] sm:$0xf0]  ;;  %v1751_v4 = vld [vmem:[%s2208_s24 + $0x40] sm:$0xf]  ;;  %v1909_v5 = vld [vmem:[%s2208_s24 + $0x44] sm:$0xf0] }
  0x1c   : > { %481 = vmatpush.bf16.msra.mxu0 %v1935_v11  ;;  %1945 = vmatpush.bf16.msra.mxu2 %v1935_v11  ;;  %v1836_v6 = vor.u32 %v1928_v2, %v1833_v3  ;;  %v1815_v7 = vld [vmem:[%s2208_s24 + $0xc0] sm:$0xf]  ;;  %v1925_v8 = vld [vmem:[%s2208_s24 + $0xc4] sm:$0xf0]  ;;  %v1752_v9 = vor.u32 %v1909_v5, %v1751_v4  ;;  %v1912_v11 = vld [vmem:[%s2208_s24 + $0x64] sm:$0xf] }
  0x1d   : > { %v1816_v10 = vor.u32 %v1925_v8, %v1815_v7  ;;  %v1930_v14 = vld [vmem:[%s2208_s24 + $0xf4] sm:$0xf]  ;;  %v1911_v17 = vld [vmem:[%s2208_s24 + $0x54] sm:$0xf0]  ;;  %v1777_v24 = vld [vmem:[%s2208_s24 + $0x78] sm:$0xf0] }
  0x1e   : > { %v1927_v20 = vld [vmem:[%s2208_s24 + $0xd4] sm:$0xf0]  ;;  %v1914_v23 = vld [vmem:[%s2208_s24 + $0x74] sm:$0xf]  ;;  %v1913_v27 = vld [vmem:[%s2208_s24 + $0x64] sm:$0xf0] }
  0x1f   : > { %v1831_v28 = vld [vmem:[%s2208_s24 + $0xe0] sm:$0xf]  ;;  %v1916_v32 = vld [vmem:[%s2208_s24 + $0x84] sm:$0xf]  ;;  %v1785_v33 = vld [vmem:[%s2208_s24 + $0x88] sm:$0xf0] }
  0x20   : > { %482 = vmatpush.bf16.msra.mxu0 %v1934_v12  ;;  %1946 = vmatpush.bf16.msra.mxu2 %v1934_v12  ;;  %v1769_v12 = vld [vmem:[%s2208_s24 + $0x68] sm:$0xf0]  ;;  %v1775_v35 = vld [vmem:[%s2208_s24 + $0x70] sm:$0xf]  ;;  %v1915_v36 = vld [vmem:[%s2208_s24 + $0x74] sm:$0xf0] }
  0x21   : > { %1882 = vmatmul.msk.bf16.gmra.mxu1 %vm428_vm0, %v1732_v15  ;;  %v1772_v13 = vor.u32 %v1912_v11, %v1769_v12  ;;  %v1841_v15 = vld [vmem:[%s2208_s24 + $0xf8] sm:$0xf0]  ;;  %v1776_v39 = vor.u32 %v1915_v36, %v1775_v35  ;;  %v2311_v42 = vld [vmem:[%s3256_s2] ss:$0 sm:$0xff]  ;;  %v655_v7 = vld [vmem:[%s3256_s2 + $0x1] sm:$0x1] }
  0x22   : > { %1891 = vmatmul.msk.bf16.gmra.mxu3 %vm428_vm0, %v1804_v22  ;;  %v1844_v18 = vor.u32 %v1930_v14, %v1841_v15 }
  0x24   : > { %483 = vmatpush.bf16.msra.mxu0 %v1933_v16  ;;  %1947 = vmatpush.bf16.msra.mxu2 %v1933_v16  ;;  %v1759_v16 = vld [vmem:[%s2208_s24 + $0x50] sm:$0xf] }
  0x25   : > { %v1760_v21 = vor.u32 %v1911_v17, %v1759_v16  ;;  %v1553_v16 = vsub.f32 1.0, %v655_v7 }
  0x28   : > { %484 = vmatpush.bf16.msra.mxu0 %v1932_v19  ;;  %1948 = vmatpush.bf16.msra.mxu2 %v1932_v19  ;;  %v1823_v19 = vld [vmem:[%s2208_s24 + $0xd0] sm:$0xf] }
  0x29   : > { %v1824_v22 = vor.u32 %v1927_v20, %v1823_v19 }
  0x2b   : > { %485 = vmatmul.bf16.vlgmr.msra.gmra.mxu0 %v1720_v25  ;;  %525 = vmatmul.bf16.vlgmr.msra.gmra.mxu2 %v1784_v26  ;;  %v1780_v25 = vor.u32 %v1914_v23, %v1777_v24  ;;  %v1767_v26 = vld [vmem:[%s2208_s24 + $0x60] sm:$0xf] }
  0x2c   : > { %v1768_v30 = vor.u32 %v1913_v27, %v1767_v26  ;;  %v2350_v27 = vperm.slane %v1553_v16, 0 }
  0x31   : > { %1883 = vmatmul.msk.bf16.gmra.mxu1 %vm428_vm0, %v1740_v29  ;;  %v1929_v29 = vld [vmem:[%s2208_s24 + $0xe4] sm:$0xf0] }
  0x32   : > { %1892 = vmatmul.msk.bf16.gmra.mxu3 %vm428_vm0, %v1812_v34  ;;  %v1832_v31 = vor.u32 %v1929_v29, %v1831_v28  ;;  %v1788_v34 = vor.u32 %v1916_v32, %v1785_v33 }
  0x3b   : > { %490 = vmatmul.bf16.gmra.mxu0 %v1728_v37  ;;  %530 = vmatmul.bf16.gmra.mxu2 %v1792_v38  ;;  %v1839_v37 = vld [vmem:[%s2208_s24 + $0xf0] sm:$0xf]  ;;  %v1931_v38 = vld [vmem:[%s2208_s24 + $0xf4] sm:$0xf0] }
  0x3c   : > { %v1840_v40 = vor.u32 %v1931_v38, %v1839_v37 }
  0x41   : > { %1884 = vmatmul.msk.bf16.gmra.mxu1 %vm428_vm0, %v1748_v41 }
  0x42   : > { %1893 = vmatmul.msk.bf16.gmra.mxu3 %vm428_vm0, %v1820_v46 }
  0x4b   : > { %495 = vmatmul.bf16.gmra.mxu0 %v1736_v49  ;;  %535 = vmatmul.bf16.gmra.mxu2 %v1800_v50 }
  0x51   : > { %1885 = vmatmul.msk.bf16.gmra.mxu1 %vm428_vm0, %v1756_v53 }
  0x52   : > { %1894 = vmatmul.msk.bf16.gmra.mxu3 %vm428_vm0, %v1828_v58 }
  0x5b   : > { %500 = vmatmul.bf16.gmra.mxu0 %v1744_v61  ;;  %540 = vmatmul.bf16.gmra.mxu2 %v1808_v62 }
  0x61   : > { %1886 = vmatmul.msk.bf16.gmra.mxu1 %vm428_vm0, %v1764_v1 }
  0x62   : > { %1895 = vmatmul.msk.bf16.gmra.mxu3 %vm428_vm0, %v1836_v6 }
  0x6b   : > { %505 = vmatmul.bf16.gmra.mxu0 %v1752_v9  ;;  %545 = vmatmul.bf16.gmra.mxu2 %v1816_v10 }
  0x71   : > { %1887 = vmatmul.msk.bf16.gmra.mxu1 %vm428_vm0, %v1772_v13 }
  0x72   : > { %1896 = vmatmul.msk.bf16.gmra.mxu3 %vm428_vm0, %v1844_v18 }
  0x7b   : > { %510 = vmatmul.bf16.gmra.mxu0 %v1760_v21  ;;  %550 = vmatmul.bf16.gmra.mxu2 %v1824_v22 }
  0x81   : > { %1888 = vmatmul.msk.bf16.gmra.mxu1 %vm428_vm0, %v1780_v25 }
  0x8b   : > { %515 = vmatmul.bf16.gmra.mxu0 %v1768_v30  ;;  %555 = vmatmul.bf16.gmra.mxu2 %v1832_v31 }
  0x8e   : > { %v575_v41 = vpop.f32.mrf.mxu1 }
  0x91   : > { %1889 = vmatmul.msk.bf16.gmra.mxu1 %vm428_vm0, %v1788_v34 }
  0x95   : > { %v620_v2 = vpop.f32.mrf.mxu3 }
  0x96   : > { %v577_v47 = vpop.f32.mrf.mxu1 }
  0x9b   : > { %520 = vmatmul.bf16.gmra.mxu0 %v1776_v39  ;;  %560 = vmatmul.bf16.gmra.mxu2 %v1840_v40 }
  0x9d   : > { %v622_v33 = vpop.f32.mrf.mxu3 }
  0x9e   : > { %v580_v57 = vpop.f32.mrf.mxu1 }
  0xa6   : > { %v582_v11 = vpop.f32.mrf.mxu1 }
  0xa8   : > { %v486_v43 = vpop.f32.mrf.mxu0 }
  0xa9   : > { %v487_v44 = vadd.f32 %v2311_v42, %v486_v43 }
  0xab   : > { %v2314_v45 = vadd.f32 %v575_v41, %v487_v44 }
  0xad   : > { %v656_v46 = vand.u32 2147483647, %v2314_v45  ;;  %v1392_v31 = vmax.f32 %v2314_v45, 0.0  ;;  %vm784_vm5 = vcmp.ge.f32.partialorder %v2314_v45, 0.0 }
  0xae   : > { %v2317_v49 = vpop.f32.mrf.mxu2 }
  0xaf   : > { %v688_v48 = vsub.f32 0.0, %v656_v46 }
  0xb0   : > { %v488_v50 = vpop.f32.mrf.mxu0 }
  0xb1   : > { %v720_v51 = vmul.f32 1.442695, %v688_v48  ;;  %v489_v52 = vadd.f32 %v2311_v42, %v488_v50 }
  0xb3   : > { %1960 = vpow2.f32 %v720_v51  ;;  %v2320_v53 = vadd.f32 %v577_v47, %v489_v52  ;;  %v2366_v47 = vld [vmem:[%s3256_s2 + $0x1] ss:$0 sm:$0xff] }
  0xb5   : > { %v657_v54 = vand.u32 2147483647, %v2320_v53  ;;  %vm785_vm10 = vcmp.ge.f32.partialorder %v2320_v53, 0.0 }
  0xb6   : > { %v2323_v56 = vpop.f32.mrf.mxu2 }
  0xb7   : > { %v689_v55 = vsub.f32 0.0, %v657_v54 }
  0xb8   : > { %v491_v58 = vpop.f32.mrf.mxu0 }
  0xb9   : > { %v2325_v59 = vpop.eup %1960  ;;  %v722_v60 = vmul.f32 1.442695, %v689_v55  ;;  %v492_v61 = vadd.f32 %v2311_v42, %v491_v58 }
  0xba   : > { %v816_v62 = vadd.f32 1.0, %v2325_v59 }
  0xbb   : > { %1962 = vpow2.f32 %v722_v60  ;;  %v2329_v63 = vadd.f32 %v580_v57, %v492_v61 }
  0xbc   : > { %1964 = vrcp.f32 %v816_v62  ;;  %v857_v20 = vand.u32 2147483647, %v816_v62  ;;  %v859_v21 = vand.u32 2147483648, %v816_v62  ;;  %vm853_vm2 = vweird.f32 %v816_v62 }
  0xbd   : > { %v658_v0 = vand.u32 2147483647, %v2329_v63  ;;  %1966 = vlog2.f32 %v816_v62  ;;  %vm786_vm11 = vcmp.ge.f32.partialorder %v2329_v63, 0.0 }
  0xbe   : > { %v531_v3 = vpop.f32.mrf.mxu2  ;;  %v860_v35 = vor.u32 1.1754944e-38, %v859_v21  ;;  %vm858_vm4 = vcmp.eq.f32.partialorder %v857_v20, 8.507059e+37 }
  0xbf   : > { %v690_v1 = vsub.f32 0.0, %v658_v0  ;;  %v532_v4 = vadd.f32 %v2311_v42, %v531_v3  ;;  %v1393_v3 = vmax.f32 %v2320_v53, 0.0 }
  0xc0   : > { %v493_v5 = vpop.f32.mrf.mxu0 }
  0xc1   : > { %v2333_v6 = vpop.eup %1962  ;;  %v724_v8 = vmul.f32 1.442695, %v690_v1  ;;  %v494_v9 = vadd.f32 %v2311_v42, %v493_v5  ;;  %v2342_v13 = vadd.f32 %v620_v2, %v532_v4 }
  0xc2   : > { %v1965_v10 = vpop.eup %1964  ;;  %v2340_v12 = vadd.f32 1.0, %v2333_v6 }
  0xc3   : > { %v849_v14 = vmul.f32 %v1965_v10, %v816_v62  ;;  %1968 = vpow2.f32 %v724_v8  ;;  %v2344_v15 = vadd.f32 %v582_v11, %v494_v9  ;;  %v1967_v17 = vpop.eup %1966  ;;  %v674_v19 = vand.u32 2147483647, %v2342_v13  ;;  %v585_v62 = vpop.f32.mrf.mxu1 }
  0xc4   : > { %1970 = vrcp.f32 %v2340_v12  ;;  %vm854_vm1 = vweird.f32 %v1965_v10  ;;  %v1425_v26 = vmul.f32 0.6931472, %v1967_v17  ;;  %v872_v51 = vand.u32 2147483647, %v2340_v12 }
  0xc5   : > { %v850_v18 = vsub.f32 1.0, %v849_v14  ;;  %1972 = vlog2.f32 %v2340_v12  ;;  %v706_v23 = vsub.f32 0.0, %v674_v19  ;;  %v659_v24 = vand.u32 2147483647, %v2344_v15  ;;  %vm855_vm3 = vmor %vm853_vm2, %vm854_vm1 }
  0xc6   : > { %v533_v25 = vpop.f32.mrf.mxu2  ;;  %v1488_v46 = vadd.f32 %v1425_v26, %v1392_v31  ;;  %v874_v45 = vand.u32 2147483648, %v2340_v12  ;;  %vm868_vm7 = vweird.f32 %v2340_v12  ;;  %vm873_vm9 = vcmp.eq.f32.partialorder %v872_v51, 8.507059e+37 }
  0xc7   : > { %v851_v22 = vmul.f32 %v1965_v10, %v850_v18  ;;  %v534_v28 = vadd.f32 %v2311_v42, %v533_v25  ;;  %v756_v32 = vmul.f32 1.442695, %v706_v23  ;;  %v691_v37 = vsub.f32 0.0, %v659_v24 }
  0xc8   : > { %v496_v39 = vpop.f32.mrf.mxu0  ;;  %v875_v8 = vor.u32 1.1754944e-38, %v874_v45  ;;  %vm802_vm0 = vcmp.ge.f32.partialorder %v2342_v13, 0.0 }
  0xc9   : > { %v2353_v29 = vpop.eup %1968  ;;  %v852_v30 = vadd.f32 %v1965_v10, %v851_v22  ;;  %v2359_v38 = vadd.f32 %v622_v33, %v534_v28  ;;  %1974 = vpow2.f32 %v756_v32  ;;  %v497_v52 = vadd.f32 %v2311_v42, %v496_v39  ;;  %v625_v33 = vpop.f32.mrf.mxu3 }
  0xca   : > { %v1971_v34 = vpop.eup %1970  ;;  %v2357_v36 = vadd.f32 1.0, %v2353_v29  ;;  %v726_v54 = vmul.f32 1.442695, %v691_v37 }
  0xcb   : > { %v856_v40 = vsel %vm855_vm3, %v1965_v10, %v852_v30  ;;  %v864_v41 = vmul.f32 %v1971_v34, %v2340_v12  ;;  %v1973_v43 = vpop.eup %1972  ;;  %vm869_vm6 = vweird.f32 %v1971_v34  ;;  %v675_v55 = vand.u32 2147483647, %v2359_v38 }
  0xcc   : > { %v861_v44 = vsel %vm858_vm4, %v860_v35, %v856_v40  ;;  %1976 = vrcp.f32 %v2357_v36  ;;  %v1427_v60 = vmul.f32 0.6931472, %v1973_v43  ;;  %v2388_v4 = vadd.f32 %v585_v62, %v497_v52  ;;  %vm870_vm8 = vmor %vm868_vm7, %vm869_vm6 }
  0xcd   : > { %v1328_v48 = vmul.f32 %v2325_v59, %v861_v44  ;;  %v865_v50 = vsub.f32 1.0, %v864_v41  ;;  %1978 = vlog2.f32 %v2357_v36  ;;  %v1555_v59 = vmul.f32 %v2350_v27, %v1488_v46 }
  0xce   : > { %1980 = vpow2.f32 %v726_v54  ;;  %v707_v0 = vsub.f32 0.0, %v675_v55  ;;  %v536_v10 = vpop.f32.mrf.mxu2  ;;  %v1489_v14 = vadd.f32 %v1427_v60, %v1393_v3  ;;  %v660_v12 = vand.u32 2147483647, %v2388_v4 }
  0xcf   : > { %v1360_v57 = vsel %vm784_vm5, %v861_v44, %v1328_v48  ;;  %v866_v58 = vmul.f32 %v1971_v34, %v865_v50  ;;  %v2377_v1 = vpop.eup %1974  ;;  %v537_v22 = vadd.f32 %v2311_v42, %v536_v10  ;;  %v887_v24 = vand.u32 2147483647, %v2357_v36 }
  0xd0   : > { %v1521_v61 = vmul.f32 %v2366_v47, %v1360_v57  ;;  %v2392_v9 = vadd.f32 1.0, %v2377_v1  ;;  %v758_v18 = vmul.f32 1.442695, %v707_v0  ;;  %v889_v25 = vand.u32 2147483648, %v2357_v36 }
  0xd1   : > { %v867_v2 = vadd.f32 %v1971_v34, %v866_v58  ;;  %v692_v26 = vsub.f32 0.0, %v660_v12  ;;  %v1556_v30 = vmul.f32 %v2350_v27, %v1489_v14  ;;  %vm883_vm13 = vweird.f32 %v2357_v36  ;;  %v498_v58 = vpop.f32.mrf.mxu0 }
  0xd2   : > { %v1977_v5 = vpop.eup %1976  ;;  %v1587_v7 = vadd.f32 %v1555_v59, %v1521_v61  ;;  %1982 = vrcp.f32 %v2392_v9  ;;  %v1394_v35 = vmax.f32 %v2329_v63, 0.0  ;;  %v2414_v37 = vadd.f32 %v625_v33, %v537_v22 }
  0xd3   : > { %v871_v11 = vsel %vm870_vm8, %v1971_v34, %v867_v2  ;;  %v879_v16 = vmul.f32 %v1977_v5, %v2357_v36  ;;  %v1979_v19 = vpop.eup %1978  ;;  %1984 = vlog2.f32 %v2392_v9  ;;  %vm884_vm12 = vweird.f32 %v1977_v5 }
  0xd4   : > { %1619 = vst [vmem:[%s2384_s20] sm:$0xff] %v1587_v7  ;;  %v876_v17 = vsel %vm873_vm9, %v875_v8, %v871_v11  ;;  %v2401_v23 = vpop.eup %1980  ;;  %v1429_v31 = vmul.f32 0.6931472, %v1979_v19  ;;  %1986 = vpow2.f32 %v758_v18  ;;  %vm885_vm14 = vmor %vm883_vm13, %vm884_vm12  ;;  %v890_v41 = vor.u32 1.1754944e-38, %v889_v25  ;;  %v587_v19 = vpop.f32.mrf.mxu1 }
  0xd5   : > { %v1329_v20 = vmul.f32 %v2333_v6, %v876_v17  ;;  %v880_v21 = vsub.f32 1.0, %v879_v16  ;;  %v2410_v32 = vadd.f32 1.0, %v2401_v23  ;;  %v728_v43 = vmul.f32 1.442695, %v692_v26 }
  0xd6   : > { %vm888_vm15 = vcmp.eq.f32.partialorder %v887_v24, 8.507059e+37  ;;  %v1410_v48 = vmax.f32 %v2342_v13, 0.0  ;;  %v1490_v51 = vadd.f32 %v1429_v31, %v1394_v35  ;;  %v1395_v52 = vmax.f32 %v2344_v15, 0.0 }
  0xd7   : > { %v1361_v28 = vsel %vm785_vm10, %v876_v17, %v1329_v20  ;;  %v881_v53 = vmul.f32 %v1977_v5, %v880_v21  ;;  %1988 = vrcp.f32 %v2410_v32  ;;  %v676_v45 = vand.u32 2147483647, %v2414_v37 }
  0xd8   : > { %v1522_v6 = vmul.f32 %v2366_v47, %v1361_v28  ;;  %v1983_v39 = vpop.eup %1982  ;;  %v1129_v57 = vand.u32 2147483648, %v2392_v9  ;;  %1990 = vlog2.f32 %v2410_v32  ;;  %v1127_v61 = vand.u32 2147483647, %v2392_v9  ;;  %v538_v28 = vpop.f32.mrf.mxu2 }
  0xd9   : > { %v882_v34 = vadd.f32 %v1977_v5, %v881_v53  ;;  %v1119_v46 = vmul.f32 %v1983_v39, %v2392_v9  ;;  %v1985_v50 = vpop.eup %1984  ;;  %vm1124_vm1 = vweird.f32 %v1983_v39  ;;  %1992 = vpow2.f32 %v728_v43 }
  0xda   : > { %v1588_v40 = vadd.f32 %v1556_v30, %v1522_v6  ;;  %v2425_v60 = vpop.eup %1986  ;;  %v708_v59 = vsub.f32 0.0, %v676_v45  ;;  %v1557_v7 = vmul.f32 %v2350_v27, %v1490_v51  ;;  %v1411_v8 = vmax.f32 %v2359_v38, 0.0 }
  0xdb   : > { %v886_v44 = vsel %vm885_vm14, %v1977_v5, %v882_v34  ;;  %v1120_v55 = vsub.f32 1.0, %v1119_v46  ;;  %v2432_v2 = vadd.f32 1.0, %v2425_v60  ;;  %v499_v10 = vadd.f32 %v2311_v42, %v498_v58 }
  0xdc   : > { %1620 = vst [vmem:[%s2384_s20 + $0x8] sm:$0xff] %v1588_v40  ;;  %v891_v36 = vsel %vm888_vm15, %v890_v41, %v886_v44  ;;  %vm1123_vm2 = vweird.f32 %v2392_v9  ;;  %v1130_v63 = vor.u32 1.1754944e-38, %v1129_v57  ;;  %v904_v12 = vand.u32 2147483648, %v2410_v32 }
  0xdd   : > { %v1330_v54 = vmul.f32 %v2353_v29, %v891_v36  ;;  %v1121_v0 = vmul.f32 %v1983_v39, %v1120_v55  ;;  %v1461_v29 = vmul.f32 0.6931472, %v1985_v50  ;;  %v1989_v3 = vpop.eup %1988  ;;  %vm1125_vm3 = vmor %vm1123_vm2, %vm1124_vm1  ;;  %1994 = vrcp.f32 %v2432_v2 }
  0xde   : > { %v894_v14 = vmul.f32 %v1989_v3, %v2410_v32  ;;  %v760_v17 = vmul.f32 1.442695, %v708_v59  ;;  %v1991_v18 = vpop.eup %1990  ;;  %vm1128_vm4 = vcmp.eq.f32.partialorder %v1127_v61, 8.507059e+37  ;;  %vm787_vm5 = vcmp.ge.f32.partialorder %v2344_v15, 0.0 }
  0xdf   : > { %v1362_v62 = vsel %vm786_vm11, %v891_v36, %v1330_v54  ;;  %v1122_v11 = vadd.f32 %v1983_v39, %v1121_v0  ;;  %v1506_v21 = vadd.f32 %v1461_v29, %v1410_v48  ;;  %v2443_v24 = vpop.eup %1992  ;;  %vm898_vm6 = vweird.f32 %v2410_v32 }
  0xe0   : > { %v1523_v5 = vmul.f32 %v2366_v47, %v1362_v62  ;;  %v895_v22 = vsub.f32 1.0, %v894_v14  ;;  %v902_v25 = vand.u32 2147483647, %v2410_v32  ;;  %v2449_v26 = vadd.f32 %v587_v19, %v499_v10  ;;  %v627_v32 = vpop.f32.mrf.mxu3  ;;  %v541_v14 = vpop.f32.mrf.mxu2 }
  0xe1   : > { %v1126_v20 = vsel %vm1125_vm3, %v1983_v39, %v1122_v11  ;;  %vm899_vm7 = vweird.f32 %v1989_v3  ;;  %1996 = vlog2.f32 %v2432_v2  ;;  %v905_v6 = vor.u32 1.1754944e-38, %v904_v12 }
  0xe2   : > { %v1589_v16 = vadd.f32 %v1557_v7, %v1523_v5  ;;  %v1131_v9 = vsel %vm1128_vm4, %v1130_v63, %v1126_v20  ;;  %v896_v53 = vmul.f32 %v1989_v3, %v895_v22  ;;  %v1431_v31 = vmul.f32 0.6931472, %v1991_v18  ;;  %vm900_vm8 = vmor %vm898_vm6, %vm899_vm7 }
  0xe3   : > { %v1346_v30 = vmul.f32 %v2377_v1, %v1131_v9  ;;  %v2454_v33 = vadd.f32 1.0, %v2443_v24  ;;  %1998 = vpow2.f32 %v760_v17  ;;  %v1573_v35 = vmul.f32 %v2350_v27, %v1506_v21  ;;  %v1995_v41 = vpop.eup %1994 }
  0xe4   : > { %1621 = vst [vmem:[%s2384_s20 + $0x10] sm:$0xff] %v1589_v16  ;;  %v897_v39 = vadd.f32 %v1989_v3, %v896_v53  ;;  %v539_v40 = vadd.f32 %v2311_v42, %v538_v28  ;;  %v1142_v43 = vand.u32 2147483647, %v2432_v2  ;;  %v661_v44 = vand.u32 2147483647, %v2449_v26 }
  0xe5   : > { %v1378_v34 = vsel %vm802_vm0, %v1131_v9, %v1346_v30  ;;  %2000 = vrcp.f32 %v2454_v33  ;;  %vm903_vm9 = vcmp.eq.f32.partialorder %v902_v25, 8.507059e+37  ;;  %v1134_v46 = vmul.f32 %v1995_v41, %v2432_v2 }
  0xe6   : > { %v1539_v1 = vmul.f32 %v2366_v47, %v1378_v34  ;;  %v901_v13 = vsel %vm900_vm8, %v1989_v3, %v897_v39  ;;  %v1396_v48 = vmax.f32 %v2388_v4, 0.0  ;;  %v1491_v51 = vadd.f32 %v1431_v31, %v1395_v52  ;;  %v501_v3 = vpop.f32.mrf.mxu0 }
  0xe7   : > { %v906_v36 = vsel %vm903_vm9, %v905_v6, %v901_v13  ;;  %2002 = vlog2.f32 %v2454_v33  ;;  %v1997_v45 = vpop.eup %1996  ;;  %v1135_v55 = vsub.f32 1.0, %v1134_v46  ;;  %v1144_v57 = vand.u32 2147483648, %v2432_v2  ;;  %v590_v6 = vpop.f32.mrf.mxu1 }
  0xe8   : > { %v1605_v50 = vadd.f32 %v1573_v35, %v1539_v1  ;;  %v1331_v54 = vmul.f32 %v2401_v23, %v906_v36  ;;  %v1412_v58 = vmax.f32 %v2414_v37, 0.0  ;;  %vm803_vm10 = vcmp.ge.f32.partialorder %v2359_v38, 0.0 }
  0xe9   : > { %v2474_v61 = vpop.eup %1998  ;;  %vm1138_vm11 = vweird.f32 %v2432_v2  ;;  %vm2479_vm12 = vcmp.eq.f32.partialorder %v1142_v43, 8.507059e+37  ;;  %v693_v59 = vsub.f32 0.0, %v661_v44  ;;  %v2483_v62 = vadd.f32 %v627_v32, %v539_v40 }
  0xea   : > { %1637 = vst [vmem:[%s2384_s20 + $0x90] sm:$0xff] %v1605_v50  ;;  %v1363_v23 = vsel %vm787_vm5, %v906_v36, %v1331_v54  ;;  %v1136_v0 = vmul.f32 %v1995_v41, %v1135_v55  ;;  %vm1139_vm13 = vweird.f32 %v1995_v41  ;;  %v2488_v29 = vadd.f32 1.0, %v2474_v61 }
  0xeb   : > { %v2001_v5 = vpop.eup %2000  ;;  %v1524_v7 = vmul.f32 %v2366_v47, %v1363_v23  ;;  %v1558_v10 = vmul.f32 %v2350_v27, %v1491_v51  ;;  %v1463_v11 = vmul.f32 0.6931472, %v1997_v45  ;;  %v677_v63 = vand.u32 2147483647, %v2483_v62  ;;  %vm1140_vm14 = vmor %vm1138_vm11, %vm1139_vm13 }
  0xec   : > { %v1137_v16 = vadd.f32 %v1995_v41, %v1136_v0  ;;  %v1145_v12 = vor.u32 1.1754944e-38, %v1144_v57  ;;  %v909_v15 = vmul.f32 %v2001_v5, %v2454_v33  ;;  %v917_v17 = vand.u32 2147483647, %v2454_v33 }
  0xed   : > { %v2003_v18 = vpop.eup %2002  ;;  %v1590_v19 = vadd.f32 %v1558_v10, %v1524_v7  ;;  %2004 = vrcp.f32 %v2488_v29  ;;  %v730_v20 = vmul.f32 1.442695, %v693_v59  ;;  %v502_v21 = vadd.f32 %v2311_v42, %v501_v3 }
  0xee   : > { %v1141_v22 = vsel %vm1140_vm14, %v1995_v41, %v1137_v16  ;;  %v910_v9 = vsub.f32 1.0, %v909_v15  ;;  %v919_v25 = vand.u32 2147483648, %v2454_v33  ;;  %v542_v28 = vadd.f32 %v2311_v42, %v541_v14  ;;  %v630_v41 = vpop.f32.mrf.mxu3  ;;  %v503_v57 = vpop.f32.mrf.mxu0 }
  0xef   : > { %1622 = vst [vmem:[%s2384_s20 + $0x18] sm:$0xff] %v1590_v19  ;;  %v1146_v30 = vsel %vm2479_vm12, %v1145_v12, %v1141_v22  ;;  %v1507_v53 = vadd.f32 %v1463_v11, %v1411_v8  ;;  %vm788_vm15 = vcmp.ge.f32.partialorder %v2388_v4, 0.0  ;;  %2006 = vlog2.f32 %v2488_v29 }
  0xf0   : > { %v709_v2 = vsub.f32 0.0, %v677_v63  ;;  %v1347_v31 = vmul.f32 %v2425_v60, %v1146_v30  ;;  %v911_v34 = vmul.f32 %v2001_v5, %v910_v9  ;;  %vm914_vm0 = vweird.f32 %v2001_v5 }
  0xf1   : > { %v1433_v35 = vmul.f32 0.6931472, %v2003_v18  ;;  %vm913_vm1 = vweird.f32 %v2454_v33  ;;  %2008 = vpow2.f32 %v730_v20  ;;  %v2511_v40 = vadd.f32 %v590_v6, %v502_v21  ;;  %v592_v18 = vpop.f32.mrf.mxu1 }
  0xf2   : > { %v762_v39 = vmul.f32 1.442695, %v709_v2  ;;  %v1379_v8 = vsel %vm803_vm10, %v1146_v30, %v1347_v31  ;;  %v912_v1 = vadd.f32 %v2001_v5, %v911_v34  ;;  %v920_v43 = vor.u32 1.1754944e-38, %v919_v25  ;;  %vm915_vm2 = vmor %vm913_vm1, %vm914_vm0 }
  0xf3   : > { %v2515_v44 = vadd.f32 %v630_v41, %v542_v28  ;;  %v2005_v13 = vpop.eup %2004  ;;  %v1540_v60 = vmul.f32 %v2366_v47, %v1379_v8  ;;  %v1574_v46 = vmul.f32 %v2350_v27, %v1507_v53  ;;  %v662_v33 = vand.u32 2147483647, %v2511_v40 }
  0xf4   : > { %2010 = vpow2.f32 %v762_v39  ;;  %v916_v50 = vsel %vm915_vm2, %v2001_v5, %v912_v1  ;;  %vm918_vm3 = vcmp.eq.f32.partialorder %v917_v17, 8.507059e+37  ;;  %v1492_v38 = vadd.f32 %v1433_v35, %v1396_v48 }
  0xf5   : > { %v1149_v36 = vmul.f32 %v2005_v13, %v2488_v29  ;;  %v2007_v51 = vpop.eup %2006  ;;  %v1606_v32 = vadd.f32 %v1574_v46, %v1540_v60  ;;  %v921_v45 = vsel %vm918_vm3, %v920_v43, %v916_v50  ;;  %v694_v54 = vsub.f32 0.0, %v662_v33 }
  0xf6   : > { %v678_v55 = vand.u32 2147483647, %v2515_v44  ;;  %v1332_v52 = vmul.f32 %v2443_v24, %v921_v45  ;;  %v1157_v23 = vand.u32 2147483647, %v2488_v29  ;;  %v1159_v0 = vand.u32 2147483648, %v2488_v29 }
  0xf7   : > { %v1150_v59 = vsub.f32 1.0, %v1149_v36  ;;  %v2527_v3 = vpop.eup %2008  ;;  %1638 = vst [vmem:[%s2384_s20 + $0x98] sm:$0xff] %v1606_v32  ;;  %vm1154_vm4 = vweird.f32 %v2005_v13  ;;  %v1465_v48 = vmul.f32 0.6931472, %v2007_v51  ;;  %v732_v5 = vmul.f32 1.442695, %v694_v54  ;;  %v506_v32 = vpop.f32.mrf.mxu0 }
  0xf8   : > { %v710_v7 = vsub.f32 0.0, %v678_v55  ;;  %v1364_v10 = vsel %vm788_vm15, %v921_v45, %v1332_v52  ;;  %v2533_v63 = vadd.f32 1.0, %v2527_v3  ;;  %v504_v24 = vadd.f32 %v2311_v42, %v503_v57 }
  0xf9   : > { %v1151_v11 = vmul.f32 %v2005_v13, %v1150_v59  ;;  %v1525_v16 = vmul.f32 %v2366_v47, %v1364_v10  ;;  %v1559_v12 = vmul.f32 %v2350_v27, %v1492_v38  ;;  %2012 = vpow2.f32 %v732_v5 }
  0xfa   : > { %v2536_v14 = vpop.eup %2010  ;;  %v764_v15 = vmul.f32 1.442695, %v710_v7  ;;  %vm1153_vm5 = vweird.f32 %v2488_v29  ;;  %vm1158_vm6 = vcmp.eq.f32.partialorder %v1157_v23, 8.507059e+37  ;;  %2014 = vrcp.f32 %v2533_v63 }
  0xfb   : > { %v1152_v17 = vadd.f32 %v2005_v13, %v1151_v11  ;;  %v1591_v4 = vadd.f32 %v1559_v12, %v1525_v16  ;;  %vm1155_vm7 = vmor %vm1153_vm5, %vm1154_vm4  ;;  %v1160_v19 = vor.u32 1.1754944e-38, %v1159_v0  ;;  %v1508_v20 = vadd.f32 %v1465_v48, %v1412_v58 }
  0xfc   : > { %2016 = vlog2.f32 %v2533_v63  ;;  %v2547_v22 = vadd.f32 1.0, %v2536_v14  ;;  %v2549_v9 = vadd.f32 %v592_v18, %v504_v24  ;;  %vm804_vm8 = vcmp.ge.f32.partialorder %v2414_v37, 0.0  ;;  %v595_v24 = vpop.f32.mrf.mxu1 }
  0xfd   : > { %v1156_v21 = vsel %vm1155_vm7, %v2005_v13, %v1152_v17  ;;  %2018 = vpow2.f32 %v764_v15  ;;  %1623 = vst [vmem:[%s2384_s20 + $0x20] sm:$0xff] %v1591_v4  ;;  %v932_v25 = vand.u32 2147483647, %v2533_v63  ;;  %v934_v30 = vand.u32 2147483648, %v2533_v63  ;;  %v543_v13 = vpop.f32.mrf.mxu2  ;;  %v632_v15 = vpop.f32.mrf.mxu3 }
  0xfe   : > { %v1161_v29 = vsel %vm1158_vm6, %v1160_v19, %v1156_v21  ;;  %v1397_v58 = vmax.f32 %v2449_v26, 0.0  ;;  %2020 = vrcp.f32 %v2547_v22  ;;  %v1413_v2 = vmax.f32 %v2483_v62, 0.0 }
  0xff   : > { %v1348_v28 = vmul.f32 %v2474_v61, %v1161_v29  ;;  %v2558_v53 = vpop.eup %2012  ;;  %2022 = vlog2.f32 %v2547_v22  ;;  %v1398_v6 = vmax.f32 %v2511_v40, 0.0  ;;  %v1414_v37 = vmax.f32 %v2515_v44, 0.0 }
 0x100   : > { %v2015_v31 = vpop.eup %2014  ;;  %v1575_v61 = vmul.f32 %v2350_v27, %v1508_v20  ;;  %v2566_v35 = vadd.f32 1.0, %v2558_v53  ;;  %v663_v39 = vand.u32 2147483647, %v2549_v9  ;;  %vm928_vm9 = vweird.f32 %v2533_v63 }
 0x101   : > { %v1380_v34 = vsel %vm804_vm8, %v1161_v29, %v1348_v28  ;;  %v924_v1 = vmul.f32 %v2015_v31, %v2533_v63  ;;  %vm2572_vm10 = vcmp.eq.f32.partialorder %v932_v25, 8.507059e+37  ;;  %v935_v46 = vor.u32 1.1754944e-38, %v934_v30 }
 0x102   : > { %v2017_v41 = vpop.eup %2016  ;;  %v1541_v8 = vmul.f32 %v2366_v47, %v1380_v34  ;;  %v1172_v50 = vand.u32 2147483647, %v2547_v22  ;;  %2024 = vrcp.f32 %v2566_v35  ;;  %vm1168_vm11 = vweird.f32 %v2547_v22 }
 0x103   : > { %v2576_v60 = vpop.eup %2018  ;;  %v1435_v33 = vmul.f32 0.6931472, %v2017_v41  ;;  %v925_v36 = vsub.f32 1.0, %v924_v1  ;;  %v1174_v51 = vand.u32 2147483648, %v2547_v22  ;;  %2026 = vlog2.f32 %v2566_v35 }
 0x104   : > { %v1607_v38 = vadd.f32 %v1575_v61, %v1541_v8  ;;  %v2021_v45 = vpop.eup %2020  ;;  %vm789_vm12 = vcmp.ge.f32.partialorder %v2449_v26, 0.0  ;;  %vm929_vm13 = vweird.f32 %v2015_v31  ;;  %v2585_v54 = vadd.f32 1.0, %v2576_v60 }
 0x105   : > { %v695_v55 = vsub.f32 0.0, %v663_v39  ;;  %v544_v57 = vadd.f32 %v2311_v42, %v543_v13  ;;  %v2023_v52 = vpop.eup %2022  ;;  %v926_v59 = vmul.f32 %v2015_v31, %v925_v36  ;;  %v1164_v23 = vmul.f32 %v2021_v45, %v2547_v22  ;;  %vm930_vm0 = vmor %vm928_vm9, %vm929_vm13  ;;  %v546_v43 = vpop.f32.mrf.mxu2 }
 0x106   : > { %1639 = vst [vmem:[%s2384_s20 + $0xa0] sm:$0xff] %v1607_v38  ;;  %v947_v0 = vand.u32 2147483647, %v2566_v35  ;;  %v949_v48 = vand.u32 2147483648, %v2566_v35  ;;  %v1493_v5 = vadd.f32 %v1435_v33, %v1397_v58  ;;  %vm2592_vm14 = vcmp.eq.f32.partialorder %v1172_v50, 8.507059e+37  ;;  %v508_v50 = vpop.f32.mrf.mxu0 }
 0x107   : > { %v1467_v10 = vmul.f32 0.6931472, %v2023_v52  ;;  %2028 = vrcp.f32 %v2585_v54  ;;  %v927_v11 = vadd.f32 %v2015_v31, %v926_v59  ;;  %v1165_v16 = vsub.f32 1.0, %v1164_v23 }
 0x108   : > { %v1175_v12 = vor.u32 1.1754944e-38, %v1174_v51  ;;  %vm943_vm15 = vweird.f32 %v2566_v35  ;;  %v2025_v17 = vpop.eup %2024  ;;  %vm805_vm1 = vcmp.ge.f32.partialorder %v2483_v62, 0.0  ;;  %vm1169_vm2 = vweird.f32 %v2021_v45 }
 0x109   : > { %2030 = vlog2.f32 %v2585_v54  ;;  %v734_v4 = vmul.f32 1.442695, %v695_v55  ;;  %v2603_v18 = vadd.f32 %v632_v15, %v544_v57  ;;  %v2027_v19 = vpop.eup %2026  ;;  %v931_v20 = vsel %vm930_vm0, %v2015_v31, %v927_v11  ;;  %vm1170_vm4 = vmor %vm1168_vm11, %vm1169_vm2  ;;  %v635_v15 = vpop.f32.mrf.mxu3 }
 0x10a   : > { %v1166_v21 = vmul.f32 %v2021_v45, %v1165_v16  ;;  %v939_v29 = vmul.f32 %v2025_v17, %v2566_v35  ;;  %vm2606_vm3 = vcmp.eq.f32.partialorder %v947_v0, 8.507059e+37  ;;  %v950_v28 = vor.u32 1.1754944e-38, %v949_v48 }
 0x10b   : > { %v936_v63 = vsel %vm2572_vm10, %v935_v46, %v931_v20  ;;  %v1560_v30 = vmul.f32 %v2350_v27, %v1493_v5  ;;  %v1509_v58 = vadd.f32 %v1467_v10, %v1413_v2  ;;  %v1187_v34 = vand.u32 2147483647, %v2585_v54  ;;  %v597_v5 = vpop.f32.mrf.mxu1 }
 0x10c   : > { %v1333_v31 = vmul.f32 %v2527_v3, %v936_v63  ;;  %v1167_v61 = vadd.f32 %v2021_v45, %v1166_v21  ;;  %v940_v39 = vsub.f32 1.0, %v939_v29  ;;  %v1437_v41 = vmul.f32 0.6931472, %v2027_v19 }
 0x10d   : > { %v2029_v8 = vpop.eup %2028  ;;  %vm790_vm5 = vcmp.ge.f32.partialorder %v2511_v40, 0.0  ;;  %vm944_vm6 = vweird.f32 %v2025_v17  ;;  %2032 = vpow2.f32 %v734_v4  ;;  %v679_v1 = vand.u32 2147483647, %v2603_v18 }
 0x10e   : > { %v507_v2 = vadd.f32 %v2311_v42, %v506_v32  ;;  %v1365_v3 = vsel %vm789_vm12, %v936_v63, %v1333_v31  ;;  %v1171_v13 = vsel %vm1170_vm4, %v2021_v45, %v1167_v61  ;;  %v941_v46 = vmul.f32 %v2025_v17, %v940_v39  ;;  %vm945_vm7 = vmor %vm943_vm15, %vm944_vm6  ;;  %v511_v40 = vpop.f32.mrf.mxu0 }
 0x10f   : > { %v1179_v33 = vmul.f32 %v2029_v8, %v2585_v54  ;;  %v2031_v38 = vpop.eup %2030  ;;  %v1526_v22 = vmul.f32 %v2366_v47, %v1365_v3  ;;  %v1176_v36 = vsel %vm2592_vm14, %v1175_v12, %v1171_v13  ;;  %v1576_v51 = vmul.f32 %v2350_v27, %v1509_v58 }
 0x110   : > { %v1189_v55 = vand.u32 2147483648, %v2585_v54  ;;  %v1349_v32 = vmul.f32 %v2536_v14, %v1176_v36  ;;  %v942_v26 = vadd.f32 %v2025_v17, %v941_v46  ;;  %v1494_v45 = vadd.f32 %v1437_v41, %v1398_v6 }
 0x111   : > { %v1180_v57 = vsub.f32 1.0, %v1179_v33  ;;  %v1592_v52 = vadd.f32 %v1560_v30, %v1526_v22  ;;  %vm1184_vm8 = vweird.f32 %v2029_v8  ;;  %v711_v59 = vsub.f32 0.0, %v679_v1 }
 0x112   : > { %v2637_v23 = vadd.f32 %v595_v24, %v507_v2  ;;  %v1381_v0 = vsel %vm805_vm1, %v1176_v36, %v1349_v32  ;;  %v946_v48 = vsel %vm945_vm7, %v2025_v17, %v942_v26  ;;  %v1469_v7 = vmul.f32 0.6931472, %v2031_v38  ;;  %v637_v38 = vpop.f32.mrf.mxu3 }
 0x113   : > { %v1181_v14 = vmul.f32 %v2029_v8, %v1180_v57  ;;  %v2641_v10 = vpop.eup %2032  ;;  %1624 = vst [vmem:[%s2384_s20 + $0x28] sm:$0xff] %v1592_v52  ;;  %v1542_v6 = vmul.f32 %v2366_v47, %v1381_v0  ;;  %v951_v35 = vsel %vm2606_vm3, %v950_v28, %v946_v48  ;;  %v766_v11 = vmul.f32 1.442695, %v711_v59  ;;  %v548_v28 = vpop.f32.mrf.mxu2 }
 0x114   : > { %v664_v24 = vand.u32 2147483647, %v2637_v23  ;;  %v1334_v16 = vmul.f32 %v2558_v53, %v951_v35  ;;  %vm1183_vm9 = vweird.f32 %v2585_v54  ;;  %v2651_v12 = vadd.f32 1.0, %v2641_v10  ;;  %v600_v1 = vpop.f32.mrf.mxu1 }
 0x115   : > { %v1182_v62 = vadd.f32 %v2029_v8, %v1181_v14  ;;  %v1608_v17 = vadd.f32 %v1576_v51, %v1542_v6  ;;  %vm1185_vm10 = vmor %vm1183_vm9, %vm1184_vm8  ;;  %v1190_v4 = vor.u32 1.1754944e-38, %v1189_v55  ;;  %2034 = vpow2.f32 %v766_v11 }
 0x116   : > { %v696_v19 = vsub.f32 0.0, %v664_v24  ;;  %v1366_v20 = vsel %vm790_vm5, %v951_v35, %v1334_v16  ;;  %vm1188_vm11 = vcmp.eq.f32.partialorder %v1187_v34, 8.507059e+37  ;;  %2036 = vrcp.f32 %v2651_v12  ;;  %v513_v6 = vpop.f32.mrf.mxu0  ;;  %v2709_v24 = vld [vmem:[%s3256_s2] ss:$0 sm:$0xff] }
 0x117   : > { %v1186_v21 = vsel %vm1185_vm10, %v2029_v8, %v1182_v62  ;;  %1640 = vst [vmem:[%s2384_s20 + $0xa8] sm:$0xff] %v1608_v17  ;;  %v1527_v53 = vmul.f32 %v2366_v47, %v1366_v20  ;;  %v1561_v54 = vmul.f32 %v2350_v27, %v1494_v45  ;;  %v1510_v25 = vadd.f32 %v1469_v7, %v1414_v37 }
 0x118   : > { %v1191_v29 = vsel %vm1188_vm11, %v1190_v4, %v1186_v21  ;;  %v736_v30 = vmul.f32 1.442695, %v696_v19  ;;  %vm806_vm12 = vcmp.ge.f32.partialorder %v2515_v44, 0.0  ;;  %2038 = vlog2.f32 %v2651_v12 }
 0x119   : > { %v1350_v63 = vmul.f32 %v2576_v60, %v1191_v29  ;;  %v1593_v58 = vadd.f32 %v1561_v54, %v1527_v53  ;;  %v547_v34 = vadd.f32 %v2311_v42, %v546_v43  ;;  %v509_v61 = vadd.f32 %v2311_v42, %v508_v50 }
 0x11a   : > { %2040 = vpow2.f32 %v736_v30  ;;  %v1577_v60 = vmul.f32 %v2350_v27, %v1510_v25  ;;  %v549_v44 = vadd.f32 %v2311_v42, %v548_v28  ;;  %v962_v46 = vand.u32 2147483647, %v2651_v12 }
 0x11b   : > { %v1382_v31 = vsel %vm806_vm12, %v1191_v29, %v1350_v63  ;;  %v2667_v39 = vpop.eup %2034  ;;  %1625 = vst [vmem:[%s2384_s20 + $0x30] sm:$0xff] %v1593_v58  ;;  %v2672_v41 = vadd.f32 %v635_v15, %v547_v34  ;;  %v964_v33 = vand.u32 2147483648, %v2651_v12  ;;  %v2683_v50 = vadd.f32 %v597_v5, %v509_v61  ;;  %v551_v0 = vpop.f32.mrf.mxu2 }
 0x11c   : > { %v1543_v37 = vmul.f32 %v2366_v47, %v1382_v31  ;;  %v2037_v8 = vpop.eup %2036  ;;  %v2676_v2 = vadd.f32 1.0, %v2667_v39  ;;  %v2687_v51 = vadd.f32 %v637_v38, %v549_v44  ;;  %vm791_vm13 = vcmp.ge.f32.partialorder %v2549_v9, 0.0  ;;  %v2728_v25 = vpop.f32.mrf.mxu1 }
 0x11d   : > { %v954_v3 = vmul.f32 %v2037_v8, %v2651_v12  ;;  %v680_v13 = vand.u32 2147483647, %v2672_v41  ;;  %vm958_vm14 = vweird.f32 %v2651_v12  ;;  %v1399_v32 = vmax.f32 %v2549_v9, 0.0 }
 0x11e   : > { %v1609_v43 = vadd.f32 %v1577_v60, %v1543_v37  ;;  %2042 = vrcp.f32 %v2676_v2  ;;  %v2039_v42 = vpop.eup %2038  ;;  %v1415_v26 = vmax.f32 %v2603_v18, 0.0  ;;  %v1400_v45 = vmax.f32 %v2637_v23, 0.0 }
 0x11f   : > { %v955_v22 = vsub.f32 1.0, %v954_v3  ;;  %2044 = vlog2.f32 %v2676_v2  ;;  %v712_v36 = vsub.f32 0.0, %v680_v13  ;;  %vm959_vm15 = vweird.f32 %v2037_v8 }
 0x120   : > { %1641 = vst [vmem:[%s2384_s20 + $0xb0] sm:$0xff] %v1609_v43  ;;  %v2689_v55 = vpop.eup %2040  ;;  %vm2699_vm0 = vcmp.eq.f32.partialorder %v962_v46, 8.507059e+37  ;;  %v965_v5 = vor.u32 1.1754944e-38, %v964_v33  ;;  %v1439_v14 = vmul.f32 0.6931472, %v2039_v42  ;;  %v512_v16 = vadd.f32 %v2709_v24, %v511_v40  ;;  %vm960_vm1 = vmor %vm958_vm14, %vm959_vm15 }
 0x121   : > { %v956_v57 = vmul.f32 %v2037_v8, %v955_v22  ;;  %v2697_v52 = vadd.f32 1.0, %v2689_v55  ;;  %v768_v59 = vmul.f32 1.442695, %v712_v36  ;;  %v665_v7 = vand.u32 2147483647, %v2683_v50 }
 0x122   : > { %v681_v11 = vand.u32 2147483647, %v2687_v51  ;;  %v1202_v15 = vand.u32 2147483647, %v2676_v2  ;;  %v2718_v4 = vadd.f32 %v2709_v24, %v551_v0  ;;  %v2722_v53 = vadd.f32 %v2709_v24, %v513_v6 }
 0x123   : > { %v957_v35 = vadd.f32 %v2037_v8, %v956_v57  ;;  %2046 = vrcp.f32 %v2697_v52  ;;  %v697_v17 = vsub.f32 0.0, %v665_v7  ;;  %v1495_v54 = vadd.f32 %v1439_v14, %v1399_v32 }
 0x124   : > { %v2043_v62 = vpop.eup %2042  ;;  %2048 = vlog2.f32 %v2697_v52  ;;  %vm1198_vm2 = vweird.f32 %v2676_v2  ;;  %v1204_v29 = vand.u32 2147483648, %v2676_v2  ;;  %v713_v40 = vsub.f32 0.0, %v681_v11  ;;  %v2773_v11 = vpop.f32.mrf.mxu1 }
 0x125   : > { %v2045_v19 = vpop.eup %2044  ;;  %v961_v20 = vsel %vm960_vm1, %v2037_v8, %v957_v35  ;;  %v1194_v21 = vmul.f32 %v2043_v62, %v2676_v2  ;;  %2050 = vpow2.f32 %v768_v59  ;;  %v738_v30 = vmul.f32 1.442695, %v697_v17  ;;  %v2787_v17 = vld [vmem:[%s3256_s2 + $0x1] ss:$0 sm:$0xff] }
 0x126   : > { %v966_v12 = vsel %vm2699_vm0, %v965_v5, %v961_v20  ;;  %vm807_vm3 = vcmp.ge.f32.partialorder %v2603_v18, 0.0  ;;  %vm1199_vm4 = vweird.f32 %v2043_v62  ;;  %vm2732_vm5 = vcmp.eq.f32.partialorder %v1202_v15, 8.507059e+37 }
 0x127   : > { %v1335_v28 = vmul.f32 %v2641_v10, %v966_v12  ;;  %v1195_v63 = vsub.f32 1.0, %v1194_v21  ;;  %v1471_v34 = vmul.f32 0.6931472, %v2045_v19  ;;  %v2736_v31 = vadd.f32 %v600_v1, %v512_v16  ;;  %vm1200_vm6 = vmor %vm1198_vm2, %vm1199_vm4  ;;  %v640_v21 = vpop.f32.mrf.mxu3 }
 0x128   : > { %2052 = vpow2.f32 %v738_v30  ;;  %v770_v10 = vmul.f32 1.442695, %v713_v40  ;;  %v1562_v43 = vmul.f32 %v2350_v27, %v1495_v54  ;;  %v1205_v3 = vor.u32 1.1754944e-38, %v1204_v29 }
 0x129   : > { %v2047_v61 = vpop.eup %2046  ;;  %v1367_v37 = vsel %vm791_vm13, %v966_v12, %v1335_v28  ;;  %v1196_v60 = vmul.f32 %v2043_v62, %v1195_v63  ;;  %v977_v33 = vand.u32 2147483647, %v2697_v52  ;;  %v666_v9 = vand.u32 2147483647, %v2736_v31 }
 0x12a   : > { %v2049_v44 = vpop.eup %2048  ;;  %v1528_v8 = vmul.f32 %v2366_v47, %v1367_v37  ;;  %v969_v13 = vmul.f32 %v2047_v61, %v2697_v52  ;;  %2054 = vpow2.f32 %v770_v10  ;;  %v979_v42 = vand.u32 2147483648, %v2697_v52 }
 0x12b   : > { %v2743_v46 = vpop.eup %2050  ;;  %v1197_v1 = vadd.f32 %v2043_v62, %v1196_v60  ;;  %v1511_v32 = vadd.f32 %v1471_v34, %v1415_v26  ;;  %vm792_vm7 = vcmp.ge.f32.partialorder %v2637_v23, 0.0  ;;  %v1441_v57 = vmul.f32 0.6931472, %v2049_v44 }
 0x12c   : > { %v1594_v38 = vadd.f32 %v1562_v43, %v1528_v8  ;;  %v970_v47 = vsub.f32 1.0, %v969_v13  ;;  %v2752_v22 = vadd.f32 1.0, %v2743_v46  ;;  %v698_v59 = vsub.f32 0.0, %v666_v9 }
 0x12d   : > { %v1201_v36 = vsel %vm1200_vm6, %v2043_v62, %v1197_v1  ;;  %vm974_vm8 = vweird.f32 %v2047_v61  ;;  %vm973_vm9 = vweird.f32 %v2697_v52  ;;  %vm2765_vm10 = vcmp.eq.f32.partialorder %v977_v33, 8.507059e+37 }
 0x12e   : > { %1626 = vst [vmem:[%s2384_s20 + $0x38] sm:$0xff] %v1594_v38  ;;  %v1206_v0 = vsel %vm2732_vm5, %v1205_v3, %v1201_v36  ;;  %v971_v2 = vmul.f32 %v2047_v61, %v970_v47  ;;  %2056 = vrcp.f32 %v2752_v22  ;;  %v2761_v48 = vpop.eup %2052  ;;  %v1416_v14 = vmax.f32 %v2672_v41, 0.0  ;;  %vm975_vm11 = vmor %vm973_vm9, %vm974_vm8 }
 0x12f   : > { %v1351_v5 = vmul.f32 %v2667_v39, %v1206_v0  ;;  %v980_v6 = vor.u32 1.1754944e-38, %v979_v42  ;;  %v2771_v35 = vadd.f32 1.0, %v2761_v48  ;;  %v740_v16 = vmul.f32 1.442695, %v698_v59 }
 0x130   : > { %v972_v7 = vadd.f32 %v2047_v61, %v971_v2  ;;  %v2775_v62 = vpop.eup %2054  ;;  %v1578_v52 = vmul.f32 %v2350_v27, %v1511_v32  ;;  %v1496_v15 = vadd.f32 %v1441_v57, %v1400_v45  ;;  %2058 = vlog2.f32 %v2752_v22  ;;  %v2831_v57 = vpop.f32.mrf.mxu1 }
 0x131   : > { %v1383_v39 = vsel %vm807_vm3, %v1206_v0, %v1351_v5  ;;  %v1217_v18 = vand.u32 2147483647, %v2752_v22  ;;  %2060 = vrcp.f32 %v2771_v35  ;;  %v1219_v45 = vand.u32 2147483648, %v2752_v22 }
 0x132   : > { %v1544_v19 = vmul.f32 %v2787_v17, %v1383_v39  ;;  %v976_v20 = vsel %vm975_vm11, %v2047_v61, %v972_v7  ;;  %2062 = vlog2.f32 %v2771_v35  ;;  %v2797_v54 = vadd.f32 %v640_v21, %v2718_v4 }
 0x133   : > { %v981_v12 = vsel %vm2765_vm10, %v980_v6, %v976_v20  ;;  %v2801_v30 = vadd.f32 1.0, %v2775_v62  ;;  %2064 = vpow2.f32 %v740_v16  ;;  %v1401_v58 = vmax.f32 %v2683_v50, 0.0 }
 0x134   : > { %v2057_v29 = vpop.eup %2056  ;;  %v1610_v28 = vadd.f32 %v1578_v52, %v1544_v19  ;;  %v1336_v63 = vmul.f32 %v2689_v55, %v981_v12  ;;  %v1417_v34 = vmax.f32 %v2687_v51, 0.0  ;;  %v1402_v61 = vmax.f32 %v2736_v31, 0.0 }
 0x135   : > { %v1209_v40 = vmul.f32 %v2057_v29, %v2752_v22  ;;  %v992_v37 = vand.u32 2147483647, %v2771_v35  ;;  %v994_v55 = vand.u32 2147483648, %v2771_v35  ;;  %2066 = vrcp.f32 %v2801_v30 }
 0x136   : > { %1642 = vst [vmem:[%s2384_s20 + $0xb8] sm:$0xff] %v1610_v28  ;;  %v1368_v4 = vsel %vm792_vm7, %v981_v12, %v1336_v63  ;;  %v2059_v60 = vpop.eup %2058  ;;  %v1563_v44 = vmul.f32 %v2350_v27, %v1496_v15  ;;  %vm1213_vm12 = vweird.f32 %v2752_v22  ;;  %vm808_vm13 = vcmp.ge.f32.partialorder %v2672_v41, 0.0 }
 0x137   : > { %v1529_v10 = vmul.f32 %v2787_v17, %v1368_v4  ;;  %v1210_v8 = vsub.f32 1.0, %v1209_v40  ;;  %v2061_v43 = vpop.eup %2060  ;;  %vm2817_vm14 = vcmp.eq.f32.partialorder %v1217_v18, 8.507059e+37  ;;  %v1220_v3 = vor.u32 1.1754944e-38, %v1219_v45  ;;  %v553_v45 = vpop.f32.mrf.mxu2 }
 0x138   : > { %2068 = vlog2.f32 %v2801_v30  ;;  %v682_v13 = vand.u32 2147483647, %v2797_v54  ;;  %v2063_v1 = vpop.eup %2062  ;;  %vm1214_vm15 = vweird.f32 %v2057_v29  ;;  %v984_v38 = vmul.f32 %v2061_v43, %v2771_v35 }
 0x139   : > { %v1595_v33 = vadd.f32 %v1563_v44, %v1529_v10  ;;  %v1211_v9 = vmul.f32 %v2057_v29, %v1210_v8  ;;  %v2824_v47 = vpop.eup %2064  ;;  %v1473_v42 = vmul.f32 0.6931472, %v2059_v60  ;;  %vm988_vm0 = vweird.f32 %v2771_v35  ;;  %vm1215_vm2 = vmor %vm1213_vm12, %vm1214_vm15 }
 0x13a   : > { %vm2827_vm1 = vcmp.eq.f32.partialorder %v992_v37, 8.507059e+37  ;;  %v995_v32 = vor.u32 1.1754944e-38, %v994_v55  ;;  %v985_v0 = vsub.f32 1.0, %v984_v38  ;;  %v2835_v2 = vadd.f32 1.0, %v2824_v47  ;;  %v642_v38 = vpop.f32.mrf.mxu3 }
 0x13b   : > { %1627 = vst [vmem:[%s2384_s20 + $0x40] sm:$0xff] %v1595_v33  ;;  %v1212_v59 = vadd.f32 %v2057_v29, %v1211_v9  ;;  %v714_v5 = vsub.f32 0.0, %v682_v13  ;;  %v2067_v26 = vpop.eup %2066  ;;  %vm793_vm3 = vcmp.ge.f32.partialorder %v2683_v50, 0.0  ;;  %v1443_v7 = vmul.f32 0.6931472, %v2063_v1  ;;  %v516_v13 = vpop.f32.mrf.mxu0 }
 0x13c   : > { %vm1228_vm4 = vweird.f32 %v2801_v30  ;;  %v1232_v6 = vand.u32 2147483647, %v2801_v30  ;;  %v2844_v16 = vadd.f32 %v2728_v25, %v2722_v53  ;;  %v986_v52 = vmul.f32 %v2061_v43, %v985_v0 }
 0x13d   : > { %v1216_v39 = vsel %vm1215_vm2, %v2057_v29, %v1212_v59  ;;  %vm989_vm5 = vweird.f32 %v2061_v43  ;;  %v1224_v15 = vmul.f32 %v2067_v26, %v2801_v30  ;;  %v1512_v20 = vadd.f32 %v1473_v42, %v1416_v14 }
 0x13e   : > { %v2069_v19 = vpop.eup %2068  ;;  %v1221_v22 = vsel %vm2817_vm14, %v1220_v3, %v1216_v39  ;;  %v1234_v18 = vand.u32 2147483648, %v2801_v30  ;;  %2070 = vrcp.f32 %v2835_v2  ;;  %v987_v53 = vadd.f32 %v2061_v43, %v986_v52  ;;  %vm990_vm6 = vmor %vm988_vm0, %vm989_vm5  ;;  %v2875_v3 = vpop.f32.mrf.mxu1 }
 0x13f   : > { %v1352_v21 = vmul.f32 %v2743_v46, %v1221_v22  ;;  %v1225_v25 = vsub.f32 1.0, %v1224_v15  ;;  %v772_v12 = vmul.f32 1.442695, %v714_v5  ;;  %v1497_v29 = vadd.f32 %v1443_v7, %v1401_v58 }
 0x140   : > { %vm809_vm7 = vcmp.ge.f32.partialorder %v2687_v51, 0.0  ;;  %vm1229_vm8 = vweird.f32 %v2067_v26  ;;  %2072 = vlog2.f32 %v2835_v2  ;;  %v667_v14 = vand.u32 2147483647, %v2844_v16 }
 0x141   : > { %v1384_v28 = vsel %vm808_vm13, %v1221_v22, %v1352_v21  ;;  %v991_v63 = vsel %vm990_vm6, %v2061_v43, %v987_v53  ;;  %v1226_v46 = vmul.f32 %v2067_v26, %v1225_v25  ;;  %v1475_v40 = vmul.f32 0.6931472, %v2069_v19  ;;  %vm1230_vm10 = vmor %vm1228_vm4, %vm1229_vm8 }
 0x142   : > { %v1545_v4 = vmul.f32 %v2787_v17, %v1384_v28  ;;  %v1579_v37 = vmul.f32 %v2350_v27, %v1512_v20  ;;  %v996_v35 = vsel %vm2827_vm1, %v995_v32, %v991_v63  ;;  %vm2865_vm9 = vcmp.eq.f32.partialorder %v1232_v6, 8.507059e+37 }
 0x143   : > { %v1337_v55 = vmul.f32 %v2761_v48, %v996_v35  ;;  %v1227_v60 = vadd.f32 %v2067_v26, %v1226_v46  ;;  %v1235_v10 = vor.u32 1.1754944e-38, %v1234_v18  ;;  %2074 = vpow2.f32 %v772_v12  ;;  %v518_v58 = vpop.f32.mrf.mxu0 }
 0x144   : > { %v2071_v41 = vpop.eup %2070  ;;  %v1611_v44 = vadd.f32 %v1579_v37, %v1545_v4  ;;  %v1564_v8 = vmul.f32 %v2350_v27, %v1497_v29  ;;  %v1007_v43 = vand.u32 2147483647, %v2835_v2  ;;  %v699_v23 = vsub.f32 0.0, %v667_v14 }
 0x145   : > { %v1369_v48 = vsel %vm793_vm3, %v996_v35, %v1337_v55  ;;  %v1231_v1 = vsel %vm1230_vm10, %v2067_v26, %v1227_v60  ;;  %v1513_v33 = vadd.f32 %v1475_v40, %v1417_v34  ;;  %v999_v9 = vmul.f32 %v2071_v41, %v2835_v2  ;;  %v645_v35 = vpop.f32.mrf.mxu3 }
 0x146   : > { %v2073_v42 = vpop.eup %2072  ;;  %1643 = vst [vmem:[%s2384_s20 + $0xc0] sm:$0xff] %v1611_v44  ;;  %v1530_v30 = vmul.f32 %v2787_v17, %v1369_v48  ;;  %v1236_v36 = vsel %vm2865_vm9, %v1235_v10, %v1231_v1  ;;  %v742_v32 = vmul.f32 1.442695, %v699_v23  ;;  %v554_v59 = vadd.f32 %v2709_v24, %v553_v45  ;;  %v2917_v46 = vpop.f32.mrf.mxu1 }
 0x147   : > { %v1353_v50 = vmul.f32 %v2775_v62, %v1236_v36  ;;  %v1000_v0 = vsub.f32 1.0, %v999_v9  ;;  %v1009_v5 = vand.u32 2147483648, %v2835_v2  ;;  %v517_v34 = vadd.f32 %v2709_v24, %v516_v13  ;;  %v556_v62 = vpop.f32.mrf.mxu2 }
 0x148   : > { %v1596_v26 = vadd.f32 %v1564_v8, %v1530_v30  ;;  %vm1004_vm11 = vweird.f32 %v2071_v41  ;;  %2076 = vpow2.f32 %v742_v32  ;;  %v2890_v7 = vadd.f32 %v642_v38, %v554_v59 }
 0x149   : > { %v2892_v6 = vpop.eup %2074  ;;  %v1385_v39 = vsel %vm809_vm7, %v1236_v36, %v1353_v50  ;;  %v1001_v52 = vmul.f32 %v2071_v41, %v1000_v0  ;;  %v1445_v15 = vmul.f32 0.6931472, %v2073_v42  ;;  %v2897_v19 = vadd.f32 %v2773_v11, %v517_v34 }
 0x14a   : > { %1628 = vst [vmem:[%s2384_s20 + $0x48] sm:$0xff] %v1596_v26  ;;  %v1546_v22 = vmul.f32 %v2787_v17, %v1385_v39  ;;  %v1580_v20 = vmul.f32 %v2350_v27, %v1513_v33  ;;  %v2903_v18 = vadd.f32 1.0, %v2892_v6  ;;  %v683_v21 = vand.u32 2147483647, %v2890_v7 }
 0x14b   : > { %v1002_v53 = vadd.f32 %v2071_v41, %v1001_v52  ;;  %vm1003_vm12 = vweird.f32 %v2835_v2  ;;  %vm1008_vm13 = vcmp.eq.f32.partialorder %v1007_v43, 8.507059e+37  ;;  %v668_v51 = vand.u32 2147483647, %v2897_v19 }
 0x14c   : > { %v1612_v11 = vadd.f32 %v1580_v20, %v1546_v22  ;;  %vm1005_vm14 = vmor %vm1003_vm12, %vm1004_vm11  ;;  %v1010_v25 = vor.u32 1.1754944e-38, %v1009_v5  ;;  %2078 = vrcp.f32 %v2903_v18  ;;  %v557_v12 = vadd.f32 %v2709_v24, %v556_v62 }
 0x14d   : > { %v1006_v45 = vsel %vm1005_vm14, %v2071_v41, %v1002_v53  ;;  %v1498_v29 = vadd.f32 %v1445_v15, %v1402_v61  ;;  %2080 = vlog2.f32 %v2903_v18  ;;  %v715_v14 = vsub.f32 0.0, %v683_v21 }
 0x14e   : > { %v2914_v28 = vpop.eup %2076  ;;  %1644 = vst [vmem:[%s2384_s20 + $0xc8] sm:$0xff] %v1612_v11  ;;  %v1011_v2 = vsel %vm1008_vm13, %v1010_v25, %v1006_v45  ;;  %v700_v63 = vsub.f32 0.0, %v668_v51  ;;  %vm794_vm15 = vcmp.ge.f32.partialorder %v2736_v31, 0.0  ;;  %v2924_v55 = vadd.f32 %v645_v35, %v557_v12  ;;  %v615_v15 = vpop.f32.mrf.mxu1 }
 0x14f   : > { %v1338_v40 = vmul.f32 %v2824_v47, %v1011_v2  ;;  %v2921_v4 = vadd.f32 1.0, %v2914_v28  ;;  %v774_v37 = vmul.f32 1.442695, %v715_v14  ;;  %v1565_v10 = vmul.f32 %v2350_v27, %v1498_v29  ;;  %v558_v29 = vpop.f32.mrf.mxu2 }
 0x150   : > { %v744_v61 = vmul.f32 1.442695, %v700_v63  ;;  %v684_v47 = vand.u32 2147483647, %v2924_v55  ;;  %v519_v8 = vadd.f32 %v2709_v24, %v518_v58  ;;  %v527_v31 = vadd.f32 %v2709_v24, %v2317_v49  ;;  %v521_v63 = vpop.f32.mrf.mxu0 }
 0x151   : > { %v1370_v60 = vsel %vm794_vm15, %v1011_v2, %v1338_v40  ;;  %2082 = vrcp.f32 %v2921_v4  ;;  %v1247_v13 = vand.u32 2147483647, %v2903_v18  ;;  %v2938_v48 = vadd.f32 %v2709_v24, %v2323_v56 }
 0x152   : > { %v2079_v41 = vpop.eup %2078  ;;  %v1531_v44 = vmul.f32 %v2787_v17, %v1370_v60  ;;  %2084 = vlog2.f32 %v2921_v4  ;;  %v1249_v33 = vand.u32 2147483648, %v2903_v18  ;;  %v1418_v38 = vmax.f32 %v2797_v54, 0.0 }
 0x153   : > { %v2081_v43 = vpop.eup %2080  ;;  %v1239_v23 = vmul.f32 %v2079_v41, %v2903_v18  ;;  %2086 = vpow2.f32 %v774_v37  ;;  %v1403_v42 = vmax.f32 %v2844_v16, 0.0  ;;  %v716_v30 = vsub.f32 0.0, %v684_v47 }
 0x154   : > { %v1597_v1 = vadd.f32 %v1565_v10, %v1531_v44  ;;  %2088 = vpow2.f32 %v744_v61  ;;  %vm810_vm0 = vcmp.ge.f32.partialorder %v2797_v54, 0.0  ;;  %vm1243_vm1 = vweird.f32 %v2903_v18 }
 0x155   : > { %v1240_v9 = vsub.f32 1.0, %v1239_v23  ;;  %v1477_v49 = vmul.f32 0.6931472, %v2081_v43  ;;  %v1419_v36 = vmax.f32 %v2890_v7, 0.0  ;;  %v2948_v56 = vadd.f32 %v2831_v57, %v519_v8 }
 0x156   : > { %1629 = vst [vmem:[%s2384_s20 + $0x50] sm:$0xff] %v1597_v1  ;;  %vm1244_vm2 = vweird.f32 %v2079_v41  ;;  %vm2950_vm3 = vcmp.eq.f32.partialorder %v1247_v13, 8.507059e+37  ;;  %v776_v0 = vmul.f32 1.442695, %v716_v30  ;;  %v1250_v34 = vor.u32 1.1754944e-38, %v1249_v33 }
 0x157   : > { %v2083_v32 = vpop.eup %2082  ;;  %v1241_v59 = vmul.f32 %v2079_v41, %v1240_v9  ;;  %v1022_v39 = vand.u32 2147483647, %v2921_v4  ;;  %v1404_v52 = vmax.f32 %v2897_v19, 0.0  ;;  %v1024_v22 = vand.u32 2147483648, %v2921_v4  ;;  %vm1245_vm4 = vmor %vm1243_vm1, %vm1244_vm2 }
 0x158   : > { %v2085_v5 = vpop.eup %2084  ;;  %v1014_v26 = vmul.f32 %v2083_v32, %v2921_v4  ;;  %2090 = vpow2.f32 %v776_v0  ;;  %v669_v20 = vand.u32 2147483647, %v2948_v56  ;;  %v1514_v53 = vadd.f32 %v1477_v49, %v1418_v38 }
 0x159   : > { %v2957_v62 = vpop.eup %2086  ;;  %v1242_v57 = vadd.f32 %v2079_v41, %v1241_v59  ;;  %vm1018_vm5 = vweird.f32 %v2921_v4  ;;  %vm795_vm6 = vcmp.ge.f32.partialorder %v2844_v16, 0.0  ;;  %vm1019_vm7 = vweird.f32 %v2083_v32 }
 0x15a   : > { %v2961_v21 = vpop.eup %2088  ;;  %v1015_v51 = vsub.f32 1.0, %v1014_v26  ;;  %v2968_v11 = vadd.f32 1.0, %v2957_v62  ;;  %v2974_v45 = vadd.f32 %v615_v15, %v527_v31  ;;  %v1447_v2 = vmul.f32 0.6931472, %v2085_v5  ;;  %vm1020_vm9 = vmor %vm1018_vm5, %vm1019_vm7 }
 0x15b   : > { %v1246_v25 = vsel %vm1245_vm4, %v2079_v41, %v1242_v57  ;;  %v2972_v12 = vadd.f32 1.0, %v2961_v21  ;;  %vm2980_vm8 = vcmp.eq.f32.partialorder %v1022_v39, 8.507059e+37  ;;  %v1025_v35 = vor.u32 1.1754944e-38, %v1024_v22 }
 0x15c   : > { %v1251_v18 = vsel %vm2950_vm3, %v1250_v34, %v1246_v25  ;;  %v1016_v14 = vmul.f32 %v2083_v32, %v1015_v51  ;;  %2092 = vrcp.f32 %v2968_v11  ;;  %v701_v58 = vsub.f32 0.0, %v669_v20 }
 0x15d   : > { %v1354_v40 = vmul.f32 %v2892_v6, %v1251_v18  ;;  %2094 = vlog2.f32 %v2968_v11  ;;  %v1420_v60 = vmax.f32 %v2924_v55, 0.0  ;;  %v559_v10 = vadd.f32 %v2709_v24, %v558_v29 }
 0x15e   : > { %v1017_v61 = vadd.f32 %v2083_v32, %v1016_v14  ;;  %v2987_v41 = vpop.eup %2090  ;;  %2096 = vrcp.f32 %v2972_v12  ;;  %v672_v6 = vand.u32 2147483647, %v2974_v45  ;;  %v2997_v47 = vadd.f32 %v2709_v24, %v521_v63  ;;  %v647_v14 = vpop.f32.mrf.mxu3 }
 0x15f   : > { %v1386_v44 = vsel %vm810_vm0, %v1251_v18, %v1354_v40  ;;  %v1581_v43 = vmul.f32 %v2350_v27, %v1514_v53  ;;  %v1499_v23 = vadd.f32 %v1447_v2, %v1403_v42  ;;  %2098 = vlog2.f32 %v2972_v12 }
 0x160   : > { %v1547_v8 = vmul.f32 %v2787_v17, %v1386_v44  ;;  %v1021_v31 = vsel %vm1020_vm9, %v2083_v32, %v1017_v61  ;;  %v3005_v4 = vadd.f32 1.0, %v2987_v41  ;;  %v746_v13 = vmul.f32 1.442695, %v701_v58 }
 0x161   : > { %v1026_v54 = vsel %vm2980_vm8, %v1025_v35, %v1021_v31  ;;  %v1262_v38 = vand.u32 2147483647, %v2968_v11  ;;  %v1264_v30 = vand.u32 2147483648, %v2968_v11  ;;  %vm1258_vm10 = vweird.f32 %v2968_v11 }
 0x162   : > { %v2093_v1 = vpop.eup %2092  ;;  %v1613_v33 = vadd.f32 %v1581_v43, %v1547_v8  ;;  %v1339_v9 = vmul.f32 %v2914_v28, %v1026_v54  ;;  %2100 = vrcp.f32 %v3005_v4  ;;  %v704_v42 = vsub.f32 0.0, %v672_v6 }
 0x163   : > { %v1254_v49 = vmul.f32 %v2093_v1, %v2968_v11  ;;  %v2095_v32 = vpop.eup %2094  ;;  %v1566_v50 = vmul.f32 %v2350_v27, %v1499_v23  ;;  %v1037_v28 = vand.u32 2147483647, %v2972_v12  ;;  %2102 = vlog2.f32 %v3005_v4 }
 0x164   : > { %1645 = vst [vmem:[%s2384_s20 + $0xd0] sm:$0xff] %v1613_v33  ;;  %v1371_v59 = vsel %vm795_vm6, %v1026_v54, %v1339_v9  ;;  %v2097_v0 = vpop.eup %2096  ;;  %vm1033_vm11 = vweird.f32 %v2972_v12  ;;  %2104 = vpow2.f32 %v746_v13  ;;  %vm811_vm12 = vcmp.ge.f32.partialorder %v2890_v7, 0.0 }
 0x165   : > { %v1532_v5 = vmul.f32 %v2787_v17, %v1371_v59  ;;  %v1255_v34 = vsub.f32 1.0, %v1254_v49  ;;  %vm3022_vm13 = vcmp.eq.f32.partialorder %v1262_v38, 8.507059e+37  ;;  %v1265_v16 = vor.u32 1.1754944e-38, %v1264_v30  ;;  %v2099_v57 = vpop.eup %2098 }
 0x166   : > { %v1029_v39 = vmul.f32 %v2097_v0, %v2972_v12  ;;  %v1039_v15 = vand.u32 2147483648, %v2972_v12  ;;  %vm1259_vm14 = vweird.f32 %v2093_v1  ;;  %v752_v53 = vmul.f32 1.442695, %v704_v42 }
 0x167   : > { %v1598_v22 = vadd.f32 %v1566_v50, %v1532_v5  ;;  %v1256_v20 = vmul.f32 %v2093_v1, %v1255_v34  ;;  %v1479_v51 = vmul.f32 0.6931472, %v2095_v32  ;;  %vm3028_vm15 = vcmp.eq.f32.partialorder %v1037_v28, 8.507059e+37  ;;  %vm1260_vm1 = vmor %vm1258_vm10, %vm1259_vm14 }
 0x168   : > { %v1030_v25 = vsub.f32 1.0, %v1029_v39  ;;  %v1277_v18 = vand.u32 2147483647, %v3005_v4  ;;  %v2101_v2 = vpop.eup %2100  ;;  %vm796_vm0 = vcmp.ge.f32.partialorder %v2897_v19, 0.0  ;;  %v1449_v40 = vmul.f32 0.6931472, %v2099_v57 }
 0x169   : > { %1630 = vst [vmem:[%s2384_s20 + $0x58] sm:$0xff] %v1598_v22  ;;  %v1257_v63 = vadd.f32 %v2093_v1, %v1256_v20  ;;  %2106 = vpow2.f32 %v752_v53  ;;  %v3035_v37 = vadd.f32 %v647_v14, %v559_v10  ;;  %v2103_v35 = vpop.eup %2102  ;;  %vm1034_vm2 = vweird.f32 %v2097_v0 }
 0x16a   : > { %v1031_v58 = vmul.f32 %v2097_v0, %v1030_v25  ;;  %v1040_v61 = vor.u32 1.1754944e-38, %v1039_v15  ;;  %v1269_v44 = vmul.f32 %v2101_v2, %v3005_v4  ;;  %v3041_v6 = vpop.eup %2104  ;;  %vm1273_vm3 = vweird.f32 %v3005_v4  ;;  %vm1035_vm4 = vmor %vm1033_vm11, %vm1034_vm2 }
 0x16b   : > { %v1261_v8 = vsel %vm1260_vm1, %v2093_v1, %v1257_v63  ;;  %v1279_v43 = vand.u32 2147483648, %v3005_v4  ;;  %v685_v10 = vand.u32 2147483647, %v3035_v37  ;;  %v1515_v11 = vadd.f32 %v1479_v51, %v1419_v36  ;;  %v617_v4 = vpop.f32.mrf.mxu1 }
 0x16c   : > { %v1266_v31 = vsel %vm3022_vm13, %v1265_v16, %v1261_v8  ;;  %v1032_v23 = vadd.f32 %v2097_v0, %v1031_v58  ;;  %v1270_v54 = vsub.f32 1.0, %v1269_v44  ;;  %v1500_v1 = vadd.f32 %v1449_v40, %v1404_v52 }
 0x16d   : > { %v1355_v13 = vmul.f32 %v2957_v62, %v1266_v31  ;;  %vm3055_vm5 = vcmp.eq.f32.partialorder %v1277_v18, 8.507059e+37  ;;  %v3060_v9 = vadd.f32 1.0, %v3041_v6  ;;  %vm1274_vm6 = vweird.f32 %v2101_v2  ;;  %v561_v18 = vpop.f32.mrf.mxu2 }
 0x16e   : > { %v1036_v38 = vsel %vm1035_vm4, %v2097_v0, %v1032_v23  ;;  %v1271_v30 = vmul.f32 %v2101_v2, %v1270_v54  ;;  %v1481_v36 = vmul.f32 0.6931472, %v2103_v35  ;;  %v717_v52 = vsub.f32 0.0, %v685_v10  ;;  %vm1275_vm7 = vmor %vm1273_vm3, %vm1274_vm6 }
 0x16f   : > { %v3062_v49 = vpop.eup %2106  ;;  %v1387_v62 = vsel %vm811_vm12, %v1266_v31, %v1355_v13  ;;  %v1041_v12 = vsel %vm3028_vm15, %v1040_v61, %v1036_v38  ;;  %2108 = vrcp.f32 %v3060_v9  ;;  %v1582_v32 = vmul.f32 %v2350_v27, %v1515_v11  ;;  %v650_v11 = vpop.f32.mrf.mxu3 }
 0x170   : > { %v1548_v42 = vmul.f32 %v2787_v17, %v1387_v62  ;;  %v1340_v59 = vmul.f32 %v2961_v21, %v1041_v12  ;;  %v1272_v50 = vadd.f32 %v2101_v2, %v1271_v30  ;;  %v1280_v28 = vor.u32 1.1754944e-38, %v1279_v43 }
 0x171   : > { %2110 = vlog2.f32 %v3060_v9  ;;  %v3076_v7 = vadd.f32 1.0, %v3062_v49  ;;  %v3080_v0 = vadd.f32 %v2875_v3, %v2997_v47  ;;  %v1516_v26 = vadd.f32 %v1481_v36, %v1420_v60 }
 0x172   : > { %v1614_v5 = vadd.f32 %v1582_v32, %v1548_v42  ;;  %v1372_v34 = vsel %vm796_vm0, %v1041_v12, %v1340_v59  ;;  %v1276_v21 = vsel %vm1275_vm7, %v2101_v2, %v1272_v50  ;;  %v1567_v39 = vmul.f32 %v2350_v27, %v1500_v1 }
 0x173   : > { %v1533_v16 = vmul.f32 %v2787_v17, %v1372_v34  ;;  %v1281_v15 = vsel %vm3055_vm5, %v1280_v28, %v1276_v21  ;;  %v778_v57 = vmul.f32 1.442695, %v717_v52  ;;  %2112 = vrcp.f32 %v3076_v7 }
 0x174   : > { %1646 = vst [vmem:[%s2384_s20 + $0xd8] sm:$0xff] %v1614_v5  ;;  %v1356_v3 = vmul.f32 %v2987_v41, %v1281_v15  ;;  %vm812_vm8 = vcmp.ge.f32.partialorder %v2924_v55, 0.0  ;;  %v670_v60 = vand.u32 2147483647, %v3080_v0  ;;  %v3096_v22 = vadd.f32 %v617_v4, %v2938_v48 }
 0x175   : > { %v2109_v19 = vpop.eup %2108  ;;  %v1599_v47 = vadd.f32 %v1567_v39, %v1533_v16  ;;  %v1583_v53 = vmul.f32 %v2350_v27, %v1516_v26  ;;  %2114 = vlog2.f32 %v3076_v7  ;;  %v1052_v29 = vand.u32 2147483647, %v3060_v9 }
 0x176   : > { %v1388_v20 = vsel %vm812_vm8, %v1281_v15, %v1356_v3  ;;  %v1044_v51 = vmul.f32 %v2109_v19, %v3060_v9  ;;  %2116 = vpow2.f32 %v778_v57  ;;  %v702_v55 = vsub.f32 0.0, %v670_v60 }
 0x177   : > { %v2111_v25 = vpop.eup %2110  ;;  %1631 = vst [vmem:[%s2384_s20 + $0x60] sm:$0xff] %v1599_v47  ;;  %v1549_v41 = vmul.f32 %v2787_v17, %v1388_v20  ;;  %v1054_v48 = vand.u32 2147483648, %v3060_v9  ;;  %v1405_v2 = vmax.f32 %v2948_v56, 0.0  ;;  %vm797_vm9 = vcmp.ge.f32.partialorder %v2948_v56, 0.0 }
 0x178   : > { %v1045_v14 = vsub.f32 1.0, %v1044_v51  ;;  %v1451_v40 = vmul.f32 0.6931472, %v2111_v25  ;;  %v748_v35 = vmul.f32 1.442695, %v702_v55  ;;  %vm1048_vm10 = vweird.f32 %v3060_v9  ;;  %v523_v9 = vpop.f32.mrf.mxu0  ;;  %v563_v55 = vpop.f32.mrf.mxu2 }
 0x179   : > { %v1615_v63 = vadd.f32 %v1583_v53, %v1549_v41  ;;  %v673_v58 = vand.u32 2147483647, %v3096_v22  ;;  %v2113_v61 = vpop.eup %2112  ;;  %vm1049_vm11 = vweird.f32 %v2109_v19  ;;  %v562_v8 = vadd.f32 %v2709_v24, %v561_v18 }
 0x17a   : > { %v1046_v44 = vmul.f32 %v2109_v19, %v1045_v14  ;;  %vm3111_vm12 = vcmp.eq.f32.partialorder %v1052_v29, 8.507059e+37  ;;  %v1089_v10 = vmul.f32 %v2113_v61, %v3076_v7  ;;  %2118 = vpow2.f32 %v748_v35  ;;  %vm1050_vm13 = vmor %vm1048_vm10, %vm1049_vm11 }
 0x17b   : > { %1647 = vst [vmem:[%s2384_s20 + $0xe0] sm:$0xff] %v1615_v63  ;;  %v705_v31 = vsub.f32 0.0, %v673_v58  ;;  %v2115_v23 = vpop.eup %2114  ;;  %v1055_v13 = vor.u32 1.1754944e-38, %v1054_v48  ;;  %v1097_v1 = vand.u32 2147483647, %v3076_v7  ;;  %v3117_v33 = vadd.f32 %v650_v11, %v562_v8 }
 0x17c   : > { %v1047_v54 = vadd.f32 %v2109_v19, %v1046_v44  ;;  %v3119_v38 = vpop.eup %2116  ;;  %v1501_v30 = vadd.f32 %v1451_v40, %v1405_v2  ;;  %v1090_v36 = vsub.f32 1.0, %v1089_v10  ;;  %v1099_v62 = vand.u32 2147483648, %v3076_v7 }
 0x17d   : > { %v754_v12 = vmul.f32 1.442695, %v705_v31  ;;  %vm1094_vm14 = vweird.f32 %v2113_v61  ;;  %v3125_v42 = vadd.f32 1.0, %v3119_v38  ;;  %v686_v32 = vand.u32 2147483647, %v3117_v33 }
 0x17e   : > { %v1051_v52 = vsel %vm1050_vm13, %v2109_v19, %v1047_v54  ;;  %v1091_v50 = vmul.f32 %v2113_v61, %v1090_v36  ;;  %v1457_v28 = vmul.f32 0.6931472, %v2115_v23  ;;  %vm1093_vm15 = vweird.f32 %v3076_v7 }
 0x17f   : > { %v1056_v59 = vsel %vm3111_vm12, %v1055_v13, %v1051_v52  ;;  %2120 = vpow2.f32 %v754_v12  ;;  %v1408_v34 = vmax.f32 %v2974_v45, 0.0  ;;  %v1568_v26 = vmul.f32 %v2350_v27, %v1501_v30  ;;  %vm1095_vm1 = vmor %vm1093_vm15, %vm1094_vm14 }
 0x180   : > { %v1341_v5 = vmul.f32 %v3041_v6, %v1056_v59  ;;  %2122 = vrcp.f32 %v3125_v42  ;;  %v3134_v21 = vpop.eup %2118  ;;  %v1092_v4 = vadd.f32 %v2113_v61, %v1091_v50  ;;  %vm1098_vm0 = vcmp.eq.f32.partialorder %v1097_v1, 8.507059e+37 }
 0x181   : > { %v1100_v16 = vor.u32 1.1754944e-38, %v1099_v62  ;;  %v3141_v6 = vadd.f32 1.0, %v3134_v21  ;;  %v718_v7 = vsub.f32 0.0, %v686_v32  ;;  %v524_v15 = vadd.f32 %v2709_v24, %v523_v9  ;;  %v652_v62 = vpop.f32.mrf.mxu3 }
 0x182   : > { %v1373_v39 = vsel %vm797_vm9, %v1056_v59, %v1341_v5  ;;  %v1096_v3 = vsel %vm1095_vm1, %v2113_v61, %v1092_v4  ;;  %v1504_v19 = vadd.f32 %v1457_v28, %v1408_v34  ;;  %2124 = vlog2.f32 %v3125_v42 }
 0x183   : > { %v1534_v57 = vmul.f32 %v2787_v17, %v1373_v39  ;;  %v1101_v47 = vsel %vm1098_vm0, %v1100_v16, %v1096_v3  ;;  %2126 = vrcp.f32 %v3141_v6  ;;  %vm800_vm2 = vcmp.ge.f32.partialorder %v2974_v45, 0.0 }
 0x184   : > { %v1344_v20 = vmul.f32 %v3062_v49, %v1101_v47  ;;  %2128 = vlog2.f32 %v3141_v6  ;;  %v1421_v51 = vmax.f32 %v3035_v37, 0.0  ;;  %v780_v41 = vmul.f32 1.442695, %v718_v7 }
 0x185   : > { %v3147_v56 = vpop.eup %2120  ;;  %v1600_v60 = vadd.f32 %v1568_v26, %v1534_v57  ;;  %v3157_v29 = vadd.f32 %v2917_v46, %v524_v15  ;;  %v1571_v14 = vmul.f32 %v2350_v27, %v1504_v19  ;;  %v1406_v49 = vmax.f32 %v3080_v0, 0.0 }
 0x186   : > { %v2123_v53 = vpop.eup %2122  ;;  %v3154_v25 = vadd.f32 1.0, %v3147_v56  ;;  %v1376_v18 = vsel %vm800_vm2, %v1101_v47, %v1344_v20  ;;  %v1292_v2 = vand.u32 2147483647, %v3125_v42  ;;  %v1294_v63 = vand.u32 2147483648, %v3125_v42 }
 0x187   : > { %1632 = vst [vmem:[%s2384_s20 + $0x68] sm:$0xff] %v1600_v60  ;;  %v1284_v45 = vmul.f32 %v2123_v53, %v3125_v42  ;;  %v1537_v48 = vmul.f32 %v2787_v17, %v1376_v18  ;;  %vm1288_vm3 = vweird.f32 %v3125_v42  ;;  %v1067_v35 = vand.u32 2147483647, %v3141_v6 }
 0x188   : > { %2130 = vrcp.f32 %v3154_v25  ;;  %v2125_v40 = vpop.eup %2124  ;;  %v564_v58 = vadd.f32 %v2709_v24, %v563_v55  ;;  %vm813_vm4 = vcmp.ge.f32.partialorder %v3035_v37, 0.0  ;;  %v1069_v8 = vand.u32 2147483648, %v3141_v6 }
 0x189   : > { %v1285_v46 = vsub.f32 1.0, %v1284_v45  ;;  %v2127_v61 = vpop.eup %2126  ;;  %v1603_v44 = vadd.f32 %v1571_v14, %v1537_v48  ;;  %2132 = vpow2.f32 %v780_v41  ;;  %v671_v43 = vand.u32 2147483647, %v3157_v29 }
 0x18a   : > { %v2129_v10 = vpop.eup %2128  ;;  %vm1289_vm5 = vweird.f32 %v2123_v53  ;;  %v1059_v11 = vmul.f32 %v2127_v61, %v3141_v6  ;;  %2134 = vlog2.f32 %v3154_v25  ;;  %vm3176_vm6 = vcmp.eq.f32.partialorder %v1292_v2, 8.507059e+37 }
 0x18b   : > { %v1286_v31 = vmul.f32 %v2123_v53, %v1285_v46  ;;  %1635 = vst [vmem:[%s2384_s20 + $0x80] sm:$0xff] %v1603_v44  ;;  %v1295_v24 = vor.u32 1.1754944e-38, %v1294_v63  ;;  %v1483_v54 = vmul.f32 0.6931472, %v2125_v40  ;;  %v703_v13 = vsub.f32 0.0, %v671_v43  ;;  %vm1290_vm9 = vmor %vm1288_vm3, %vm1289_vm5 }
 0x18c   : > { %v1060_v30 = vsub.f32 1.0, %v1059_v11  ;;  %vm1063_vm7 = vweird.f32 %v3141_v6  ;;  %vm3181_vm8 = vcmp.eq.f32.partialorder %v1067_v35, 8.507059e+37  ;;  %vm798_vm10 = vcmp.ge.f32.partialorder %v3080_v0, 0.0 }
 0x18d   : > { %v1287_v1 = vadd.f32 %v2123_v53, %v1286_v31  ;;  %v1070_v52 = vor.u32 1.1754944e-38, %v1069_v8  ;;  %v1453_v32 = vmul.f32 0.6931472, %v2129_v10  ;;  %v750_v59 = vmul.f32 1.442695, %v703_v13 }
 0x18e   : > { %v2131_v12 = vpop.eup %2130  ;;  %v3188_v50 = vadd.f32 %v652_v62, %v564_v58  ;;  %v1061_v9 = vmul.f32 %v2127_v61, %v1060_v30  ;;  %vm1064_vm11 = vweird.f32 %v2127_v61  ;;  %v1517_v4 = vadd.f32 %v1483_v54, %v1421_v51 }
 0x18f   : > { %v1291_v28 = vsel %vm1290_vm9, %v2123_v53, %v1287_v1  ;;  %v1104_v5 = vmul.f32 %v2131_v12, %v3154_v25  ;;  %v3191_v34 = vpop.eup %2132  ;;  %v1112_v42 = vand.u32 2147483647, %v3154_v25  ;;  %2136 = vpow2.f32 %v750_v59  ;;  %vm1065_vm12 = vmor %vm1063_vm7, %vm1064_vm11 }
 0x190   : > { %v1296_v26 = vsel %vm3176_vm6, %v1295_v24, %v1291_v28  ;;  %v2135_v16 = vpop.eup %2134  ;;  %v1062_v7 = vadd.f32 %v2127_v61, %v1061_v9  ;;  %v3198_v57 = vadd.f32 1.0, %v3191_v34  ;;  %v1502_v3 = vadd.f32 %v1453_v32, %v1406_v49 }
 0x191   : > { %v1357_v39 = vmul.f32 %v3119_v38, %v1296_v26  ;;  %v1105_v15 = vsub.f32 1.0, %v1104_v5  ;;  %vm1109_vm13 = vweird.f32 %v2131_v12  ;;  %v1114_v19 = vand.u32 2147483648, %v3154_v25 }
 0x192   : > { %v687_v47 = vand.u32 2147483647, %v3188_v50  ;;  %v1066_v20 = vsel %vm1065_vm12, %v2127_v61, %v1062_v7  ;;  %2138 = vrcp.f32 %v3198_v57  ;;  %v1584_v51 = vmul.f32 %v2350_v27, %v1517_v4 }
 0x193   : > { %v1389_v60 = vsel %vm813_vm4, %v1296_v26, %v1357_v39  ;;  %v1106_v53 = vmul.f32 %v2131_v12, %v1105_v15  ;;  %v1071_v6 = vsel %vm3181_vm8, %v1070_v52, %v1066_v20  ;;  %v1459_v41 = vmul.f32 0.6931472, %v2135_v16  ;;  %v2154_v15 = vld [vmem:[%s3256_s2 + $0x1] ss:$0 sm:$0xff] }
 0x194   : > { %v1550_v38 = vmul.f32 %v2787_v17, %v1389_v60  ;;  %v1342_v55 = vmul.f32 %v3134_v21, %v1071_v6  ;;  %vm1108_vm14 = vweird.f32 %v3154_v25  ;;  %v1409_v37 = vmax.f32 %v3096_v22, 0.0 }
 0x195   : > { %v1107_v18 = vadd.f32 %v2131_v12, %v1106_v53  ;;  %v3214_v14 = vpop.eup %2136  ;;  %vm1110_vm15 = vmor %vm1108_vm14, %vm1109_vm13  ;;  %v1115_v49 = vor.u32 1.1754944e-38, %v1114_v19  ;;  %2140 = vlog2.f32 %v3198_v57  ;;  %v719_v48 = vsub.f32 0.0, %v687_v47 }
 0x196   : > { %v1616_v45 = vadd.f32 %v1584_v51, %v1550_v38  ;;  %v1374_v2 = vsel %vm798_vm10, %v1071_v6, %v1342_v55  ;;  %v1569_v63 = vmul.f32 %v2350_v27, %v1502_v3  ;;  %vm1113_vm0 = vcmp.eq.f32.partialorder %v1112_v42, 8.507059e+37 }
 0x197   : > { %v1111_v21 = vsel %vm1110_vm15, %v2131_v12, %v1107_v18  ;;  %v1535_v25 = vmul.f32 %v2787_v17, %v1374_v2  ;;  %v1505_v46 = vadd.f32 %v1459_v41, %v1409_v37  ;;  %v831_v35 = vadd.f32 1.0, %v3214_v14 }
 0x198   : > { %1648 = vst [vmem:[%s2384_s20 + $0xe8] sm:$0xff] %v1616_v45  ;;  %v1116_v40 = vsel %vm1113_vm0, %v1115_v49, %v1111_v21  ;;  %v2139_v58 = vpop.eup %2138  ;;  %v782_v44 = vmul.f32 1.442695, %v719_v48  ;;  %vm801_vm1 = vcmp.ge.f32.partialorder %v3096_v22, 0.0  ;;  %v1309_v24 = vand.u32 2147483648, %v3198_v57 }
 0x199   : > { %v1345_v61 = vmul.f32 %v3147_v56, %v1116_v40  ;;  %v1601_v8 = vadd.f32 %v1569_v63, %v1535_v25  ;;  %v1299_v0 = vmul.f32 %v2139_v58, %v3198_v57  ;;  %2142 = vrcp.f32 %v831_v35 }
 0x19a   : > { %v1572_v11 = vmul.f32 %v2350_v27, %v1505_v46  ;;  %2144 = vlog2.f32 %v831_v35  ;;  %vm1304_vm2 = vweird.f32 %v2139_v58  ;;  %v1307_v22 = vand.u32 2147483647, %v3198_v57 }
 0x19b   : > { %v1377_v43 = vsel %vm801_vm1, %v1116_v40, %v1345_v61  ;;  %v2141_v10 = vpop.eup %2140  ;;  %1633 = vst [vmem:[%s2384_s20 + $0x70] sm:$0xff] %v1601_v8  ;;  %v1300_v23 = vsub.f32 1.0, %v1299_v0  ;;  %2146 = vpow2.f32 %v782_v44  ;;  %vm1303_vm3 = vweird.f32 %v3198_v57 }
 0x19c   : > { %v1538_v31 = vmul.f32 %v2787_v17, %v1377_v43  ;;  %v1485_v13 = vmul.f32 0.6931472, %v2141_v10  ;;  %vm1305_vm4 = vmor %vm1303_vm3, %vm1304_vm2  ;;  %v1310_v17 = vor.u32 1.1754944e-38, %v1309_v24  ;;  %v1422_v36 = vmax.f32 %v3117_v33, 0.0 }
 0x19d   : > { %v1301_v54 = vmul.f32 %v2139_v58, %v1300_v23  ;;  %vm1308_vm5 = vcmp.eq.f32.partialorder %v1307_v22, 8.507059e+37  ;;  %v1084_v26 = vand.u32 2147483648, %v831_v35  ;;  %vm814_vm6 = vcmp.ge.f32.partialorder %v3117_v33, 0.0 }
 0x19e   : > { %v1604_v56 = vadd.f32 %v1572_v11, %v1538_v31  ;;  %v1518_v28 = vadd.f32 %v1485_v13, %v1422_v36  ;;  %v1082_v16 = vand.u32 2147483647, %v831_v35  ;;  %vm1078_vm8 = vweird.f32 %v831_v35 }
 0x19f   : > { %v2143_v1 = vpop.eup %2142  ;;  %v1302_v30 = vadd.f32 %v2139_v58, %v1301_v54  ;;  %v1407_v33 = vmax.f32 %v3157_v29, 0.0  ;;  %vm799_vm11 = vcmp.ge.f32.partialorder %v3157_v29, 0.0  ;;  %v1423_v29 = vmax.f32 %v3188_v50, 0.0 }
 0x1a0   : > { %1636 = vst [vmem:[%s2384_s20 + $0x88] sm:$0xff] %v1604_v56  ;;  %v1074_v62 = vmul.f32 %v2143_v1, %v831_v35  ;;  %v2145_v12 = vpop.eup %2144  ;;  %vm1079_vm7 = vweird.f32 %v2143_v1  ;;  %v1585_v3 = vmul.f32 %v2350_v27, %v1518_v28  ;;  %vm1083_vm10 = vcmp.eq.f32.partialorder %v1082_v16, 8.507059e+37 }
 0x1a1   : > { %v1306_v52 = vsel %vm1305_vm4, %v2139_v58, %v1302_v30  ;;  %v2147_v32 = vpop.eup %2146  ;;  %v1455_v7 = vmul.f32 0.6931472, %v2145_v12  ;;  %vm1080_vm9 = vmor %vm1078_vm8, %vm1079_vm7  ;;  %vm815_vm0 = vcmp.ge.f32.partialorder %v3188_v50, 0.0 }
 0x1a2   : > { %v1311_v59 = vsel %vm1308_vm5, %v1310_v17, %v1306_v52  ;;  %v1075_v9 = vsub.f32 1.0, %v1074_v62  ;;  %v847_v4 = vadd.f32 1.0, %v2147_v32 }
 0x1a3   : > { %v1358_v5 = vmul.f32 %v3191_v34, %v1311_v59  ;;  %v1085_v34 = vor.u32 1.1754944e-38, %v1084_v26  ;;  %v1503_v53 = vadd.f32 %v1455_v7, %v1407_v33 }
 0x1a4   : > { %v1076_v42 = vmul.f32 %v2143_v1, %v1075_v9  ;;  %2148 = vrcp.f32 %v847_v4  ;;  %v1324_v48 = vand.u32 2147483648, %v847_v4  ;;  %v1322_v63 = vand.u32 2147483647, %v847_v4 }
 0x1a5   : > { %v1390_v39 = vsel %vm814_vm6, %v1311_v59, %v1358_v5  ;;  %2150 = vlog2.f32 %v847_v4  ;;  %v1570_v18 = vmul.f32 %v2350_v27, %v1503_v53  ;;  %vm1318_vm13 = vweird.f32 %v847_v4 }
 0x1a6   : > { %v1551_v57 = vmul.f32 %v2154_v15, %v1390_v39  ;;  %v1077_v19 = vadd.f32 %v2143_v1, %v1076_v42  ;;  %vm1323_vm15 = vcmp.eq.f32.partialorder %v1322_v63, 8.507059e+37 }
 0x1a8   : > { %v1617_v47 = vadd.f32 %v1585_v3, %v1551_v57  ;;  %v1081_v60 = vsel %vm1080_vm9, %v2143_v1, %v1077_v19 }
 0x1a9   : > { %v1086_v20 = vsel %vm1083_vm10, %v1085_v34, %v1081_v60 }
 0x1aa   : > { %1649 = vst [vmem:[%s2384_s20 + $0xf0] sm:$0xff] %v1617_v47  ;;  %v1343_v38 = vmul.f32 %v3214_v14, %v1086_v20  ;;  %v2149_v51 = vpop.eup %2148  ;;  %v1325_v14 = vor.u32 1.1754944e-38, %v1324_v48 }
 0x1ab   : > { %v1314_v41 = vmul.f32 %v2149_v51, %v847_v4  ;;  %v2151_v37 = vpop.eup %2150  ;;  %vm1319_vm12 = vweird.f32 %v2149_v51 }
 0x1ac   : > { %v1375_v6 = vsel %vm799_vm11, %v1086_v20, %v1343_v38  ;;  %v1487_v21 = vmul.f32 0.6931472, %v2151_v37  ;;  %vm1320_vm14 = vmor %vm1318_vm13, %vm1319_vm12 }
 0x1ad   : > { %v1536_v55 = vmul.f32 %v2154_v15, %v1375_v6  ;;  %v1315_v45 = vsub.f32 1.0, %v1314_v41 }
 0x1ae   : > { %v1519_v35 = vadd.f32 %v1487_v21, %v1423_v29 }
 0x1af   : > { %v1602_v49 = vadd.f32 %v1570_v18, %v1536_v55  ;;  %v1316_v2 = vmul.f32 %v2149_v51, %v1315_v45 }
 0x1b0   : > { %v1586_v8 = vmul.f32 %v2350_v27, %v1519_v35 }
 0x1b1   : > { %1634 = vst [vmem:[%s2384_s20 + $0x78] sm:$0xff] %v1602_v49  ;;  %v1317_v25 = vadd.f32 %v2149_v51, %v1316_v2 }
 0x1b3   : > { %v1321_v40 = vsel %vm1320_vm14, %v2149_v51, %v1317_v25 }
 0x1b4   : > { %v1326_v46 = vsel %vm1323_vm15, %v1325_v14, %v1321_v40 }
 0x1b5   : > { %v1359_v58 = vmul.f32 %v2147_v32, %v1326_v46 }
 0x1b7   : > { %v1391_v61 = vsel %vm815_vm0, %v1326_v46, %v1359_v58 }
 0x1b8   : > { %v1552_v44 = vmul.f32 %v2154_v15, %v1391_v61 }
 0x1ba   : > { %v1618_v0 = vadd.f32 %v1586_v8, %v1552_v44 }
 0x1bc   : > { %1650 = vst [vmem:[%s2384_s20 + $0xf8] sm:$0xff] %v1618_v0 }
 0x1bd PF: > { %s13_s12 = sadd.s32 1, %s2161_s12  }
 0x1be   : > { %p10_p4 = scmp.ge.s32.totalorder %s13_s12, 4  }
 0x1c0   :  { %12 = sbr.rel (!%p10_p4) target bundleno = 1 (0x1), region = 62 }

</bundles_post_ra>
